<compile_context>
chip_gen: v7x
topology: tpu7x:2x2x1
jax: 0.10.0
libtpu: 0.0.40
codegen_flags: <defaults>
</compile_context>

<pallas_src>
import functools

import jax
import jax.numpy as jnp
from jax.experimental import pallas as pl
from jax.experimental.pallas import tpu as pltpu


_LANE = 128
_TQ = 128   # dst-node tile for attention
_TK = 128   # src-node tile for attention (keep == _TQ so the diagonal tile of every
            # dst row is never skipped -> self-loops keep the softmax denom > 0)
_VMEM_LIMIT = 32 * 1024 * 1024   # explicit scoped-VMEM limit, safe on v5e/v6e/v7x


def _round_up(v, m):
    return (v + m - 1) // m * m


def _pad2d(x, rows, cols):
    return jnp.pad(x, ((0, rows - x.shape[0]), (0, cols - x.shape[1])))


def _pick_tile(dim, prefs):
    for t in prefs:
        if dim % t == 0:
            return t
    return dim   # small dims: single full-extent block


# ----------------------------------------------------------------------------
# Kernel 1: tiled matmul  C = A @ B + bias  (+ optional relu), f32 accumulation.
#   grid = (M/tm, N/tn, K/tk), accumulator in VMEM scratch, init/finalize with
#   pl.when, parallel/parallel/arbitrary for megacore + pipelined K streaming.
#   If B is stored in bf16, the A tile is cast to bf16 so the MXU runs the bf16
#   path; accumulation stays f32.
# ----------------------------------------------------------------------------
def _matmul_kernel(a_ref, b_ref, bias_ref, o_ref, acc_ref, *, apply_relu):
    k = pl.program_id(2)

    @pl.when(k == 0)
    def _():
        acc_ref[...] = jnp.zeros_like(acc_ref)

    a = a_ref[...]
    b = b_ref[...]
    if b.dtype == jnp.bfloat16 and a.dtype != jnp.bfloat16:
        a = a.astype(jnp.bfloat16)
    acc_ref[...] += jnp.dot(a, b, preferred_element_type=jnp.float32)

    @pl.when(k == pl.num_programs(2) - 1)
    def _():
        out = acc_ref[...] + bias_ref[...]
        if apply_relu:
            out = jnp.maximum(out, 0.0)
        o_ref[...] = out.astype(o_ref.dtype)


def tiled_matmul(a, b, bias, *, apply_relu=False):
    m, k = a.shape
    k2, n = b.shape
    assert k == k2
    tm = _pick_tile(m, (256, 128))          # m is always a multiple of 8 here
    tn = _pick_tile(n, (256, 128))          # n is a multiple of 128 (padded)
    tk = _pick_tile(k, (512, 256, 128))     # k is a multiple of 128 (padded)
    grid = (m // tm, n // tn, k // tk)
    return pl.pallas_call(
        functools.partial(_matmul_kernel, apply_relu=apply_relu),
        out_shape=jax.ShapeDtypeStruct((m, n), jnp.float32),
        grid_spec=pltpu.PrefetchScalarGridSpec(
            num_scalar_prefetch=0,
            grid=grid,
            in_specs=[
                pl.BlockSpec((tm, tk), lambda i, j, kk: (i, kk)),
                pl.BlockSpec((tk, tn), lambda i, j, kk: (kk, j)),
                pl.BlockSpec((1, tn), lambda i, j, kk: (0, j)),
            ],
            out_specs=pl.BlockSpec((tm, tn), lambda i, j, kk: (i, j)),
            scratch_shapes=[pltpu.VMEM((tm, tn), jnp.float32)],
        ),
        compiler_params=pltpu.CompilerParams(
            dimension_semantics=("parallel", "parallel", "arbitrary"),
            vmem_limit_bytes=_VMEM_LIMIT),
    )(a, b, bias)


# ----------------------------------------------------------------------------
# Kernel 2: flash-style GAT attention (heads=1, concat=True, slope=0.2).
#   h_i      = (W x)_i   (computed by tiled_matmul beforehand)
#   e_{i<-j} = LeakyReLU(a_dst.h_i + a_src.h_j)          (incl. self loops)
#   alpha    = softmax over neighbors j (duplicate edges counted, like PyG)
#   out_i    = sum_j alpha_ij h_j + bias                  (+ optional relu)
#
#   grid = (dst_tiles, src_tiles), online softmax (running max / denom / acc in
#   VMEM scratch).  A scalar-prefetched [dst_tiles, src_tiles] nonzero table in
#   SMEM skips all-zero adjacency tiles (block-diagonal batched graphs).
# ----------------------------------------------------------------------------
def _gat_attention_kernel(tmask_ref,                          # SMEM prefetch
                          hd_ref, hs_ref, adj_ref, asrc_ref, adst_ref, bias_ref,
                          o_ref,
                          m_ref, l_ref, acc_ref,
                          *, apply_relu):
    i = pl.program_id(0)
    j = pl.program_id(1)

    @pl.when(j == 0)
    def _():
        m_ref[...] = jnp.full(m_ref.shape, -1e30, jnp.float32)
        l_ref[...] = jnp.zeros_like(l_ref)
        acc_ref[...] = jnp.zeros_like(acc_ref)

    @pl.when(tmask_ref[i, j] > 0)          # skip all-zero adjacency tiles
    def _():
        h_dst = hd_ref[...]                                    # [tq, F]
        h_src = hs_ref[...]                                    # [tk, F]
        count = adj_ref[...].astype(jnp.float32)               # edge multiplicity

        # VPU/XLU reductions instead of two [*,F]@[F,1] MXU mat-vecs.
        e_dst = jnp.sum(h_dst * adst_ref[...], axis=-1, keepdims=True)   # [tq,1]
        e_src = jnp.sum(h_src * asrc_ref[...], axis=-1, keepdims=True)   # [tk,1]

        logits = e_dst + e_src.T                                # [tq, tk]
        logits = jnp.where(logits > 0, logits, 0.2 * logits)    # LeakyReLU(0.2)
        logits = jnp.where(count > 0.0, logits, -1e30)          # mask non-edges

        m_prev = m_ref[...]
        m_new = jnp.maximum(m_prev, jnp.max(logits, axis=-1, keepdims=True))
        corr = jnp.exp(m_prev - m_new)
        # multiplicative mask after exp also applies duplicate-edge multiplicity
        p = jnp.exp(logits - m_new) * count
        l_ref[...] = corr * l_ref[...] + jnp.sum(p, axis=-1, keepdims=True)
        acc_ref[...] = corr * acc_ref[...] + jnp.dot(
            p, h_src, preferred_element_type=jnp.float32)
        m_ref[...] = m_new

    @pl.when(j == pl.num_programs(1) - 1)
    def _():
        out = acc_ref[...] * pl.reciprocal(l_ref[...], approx=True) + bias_ref[...]
        if apply_relu:
            out = jnp.maximum(out, 0.0)
        o_ref[...] = out.astype(o_ref.dtype)


def gat_attention(h, adj, tile_mask, a_src, a_dst, bias, *, apply_relu):
    n_pad, f_pad = h.shape
    tq, tk = _TQ, _TK
    n_i, n_j = n_pad // tq, n_pad // tk
    grid_spec = pltpu.PrefetchScalarGridSpec(
        num_scalar_prefetch=1,
        grid=(n_i, n_j),
        in_specs=[
            pl.BlockSpec((tq, f_pad), lambda i, j, tmr: (i, 0)),   # h (dst rows)
            pl.BlockSpec((tk, f_pad), lambda i, j, tmr: (j, 0)),   # h (src rows)
            pl.BlockSpec((tq, tk), lambda i, j, tmr: (i, j)),      # adjacency counts
            pl.BlockSpec((1, f_pad), lambda i, j, tmr: (0, 0)),    # a_src row
            pl.BlockSpec((1, f_pad), lambda i, j, tmr: (0, 0)),    # a_dst row
            pl.BlockSpec((1, f_pad), lambda i, j, tmr: (0, 0)),    # bias row
        ],
        out_specs=pl.BlockSpec((tq, f_pad), lambda i, j, tmr: (i, 0)),
        scratch_shapes=[
            pltpu.VMEM((tq, 1), jnp.float32),       # running max
            pltpu.VMEM((tq, 1), jnp.float32),       # running denom
            pltpu.VMEM((tq, f_pad), jnp.float32),   # running accumulator
        ],
    )
    return pl.pallas_call(
        functools.partial(_gat_attention_kernel, apply_relu=apply_relu),
        out_shape=jax.ShapeDtypeStruct((n_pad, f_pad), jnp.float32),
        grid_spec=grid_spec,
        compiler_params=pltpu.CompilerParams(
            dimension_semantics=("parallel", "arbitrary"),
            vmem_limit_bytes=_VMEM_LIMIT),
    )(tile_mask, h, h, adj, a_src, a_dst, bias)


# ----------------------------------------------------------------------------
# Graph densification / pooling matrix (wrapper-side JAX, feeds the kernels).
# ----------------------------------------------------------------------------
def build_adjacency(edge_index, n_pad):
    """count[i, j] = multiplicity of edge j -> i (self loops removed then one
    self loop re-added per node, incl. padded nodes -> every softmax row is valid)."""
    src, dst = edge_index[0], edge_index[1]
    keep = (src != dst).astype(jnp.float32)          # GATConv: remove_self_loops
    adj = jnp.zeros((n_pad, n_pad), jnp.float32)
    adj = adj.at[dst, src].add(keep)                 # duplicates are counted
    diag = jnp.arange(n_pad)
    adj = adj.at[diag, diag].set(1.0)                # add_self_loops (exactly one)
    return adj


def build_pool_matrix(batch, g_pad, n_pad):
    """pool[g, i] = 1/|graph g| if batch[i] == g (padded nodes/graphs get 0)."""
    n = batch.shape[0]
    batch_full = jnp.concatenate(
        [batch.astype(jnp.int32), jnp.full((n_pad - n,), g_pad, jnp.int32)])
    onehot = (batch_full[None, :] == jnp.arange(g_pad)[:, None]).astype(jnp.float32)
    counts = jnp.maximum(onehot.sum(axis=1, keepdims=True), 1.0)
    return onehot / counts                           # [g_pad, n_pad]


# ----------------------------------------------------------------------------
# Parameter padding (done once, outside jit).  Feature dims -> multiples of 128
# so every kernel tile is 128-lane dense; Selfies weights stored in bf16.
# ----------------------------------------------------------------------------
def pad_gat_params(p):
    c, h = p["w1"].shape
    _, l = p["w2"].shape
    cp, hp, lp = _round_up(c, _LANE), _round_up(h, _LANE), _round_up(l, _LANE)
    return {
        "w1": _pad2d(p["w1"], cp, hp), "as1": _pad2d(p["as1"], 1, hp),
        "ad1": _pad2d(p["ad1"], 1, hp), "b1": _pad2d(p["b1"], 1, hp),
        "w2": _pad2d(p["w2"], hp, lp), "as2": _pad2d(p["as2"], 1, lp),
        "ad2": _pad2d(p["ad2"], 1, lp), "b2": _pad2d(p["b2"], 1, lp),
        "wl": _pad2d(p["wl"], lp, lp), "bl": _pad2d(p["bl"], 1, lp),
    }


def pad_selfies_params(p):
    si, sh = p["w1"].shape
    _, l = p["w2"].shape
    sip, shp, lp = _round_up(si, _LANE), _round_up(sh, _LANE), _round_up(l, _LANE)
    return {
        # bf16 weight storage halves HBM traffic of the weight-streaming GEMVs;
        # the matmul kernel accumulates in f32 (preferred_element_type).
        "w1": _pad2d(p["w1"], sip, shp).astype(jnp.bfloat16),
        "b1": _pad2d(p["b1"], 1, shp),
        "w2": _pad2d(p["w2"], shp, lp).astype(jnp.bfloat16),
        "b2": _pad2d(p["b2"], 1, lp),
    }


# ----------------------------------------------------------------------------
# Full forward pass.
# ----------------------------------------------------------------------------
@functools.partial(jax.jit, static_argnames=("num_graphs", "latent_dim"))
def ssclattr_forward(x, edge_index, batch, edge_attr, s, gat_pp, selfies_pp,
                     num_graphs, latent_dim):
    del edge_attr  # see TODO(synk) at top of file: GATConv has no edge_dim here.

    n = x.shape[0]
    n_pad = _round_up(n, _LANE)
    c_pad = gat_pp["w1"].shape[0]
    h_pad = gat_pp["w1"].shape[1]
    l_pad = gat_pp["w2"].shape[1]
    g_pad = _round_up(num_graphs, 8)

    x_pad = _pad2d(x, n_pad, c_pad)
    adj = build_adjacency(edge_index, n_pad)
    n_i, n_j = n_pad // _TQ, n_pad // _TK
    # per-(dst_tile, src_tile) nonzero table -> skip zero tiles (block-diag graphs)
    tile_mask = (adj.reshape(n_i, _TQ, n_j, _TK).sum(axis=(1, 3)) > 0).astype(jnp.int32)
    adj_bf16 = adj.astype(jnp.bfloat16)      # exact for small integer counts
    pool = build_pool_matrix(batch, g_pad, n_pad)

    zero_h = jnp.zeros((1, h_pad), jnp.float32)
    zero_l = jnp.zeros((1, l_pad), jnp.float32)

    # GATConv1 + relu (dropout == identity in eval mode)
    h1t = tiled_matmul(x_pad, gat_pp["w1"], zero_h)
    h1 = gat_attention(h1t, adj_bf16, tile_mask,
                       gat_pp["as1"], gat_pp["ad1"], gat_pp["b1"], apply_relu=True)
    # GATConv2
    h2t = tiled_matmul(h1, gat_pp["w2"], zero_l)
    h2 = gat_attention(h2t, adj_bf16, tile_mask,
                       gat_pp["as2"], gat_pp["ad2"], gat_pp["b2"], apply_relu=False)
    # Linear head
    h3 = tiled_matmul(h2, gat_pp["wl"], gat_pp["bl"])
    # global_mean_pool as a pooling matmul; lane-dense padded output, sliced here
    z_pad = tiled_matmul(pool, h3, zero_l)
    z = z_pad[:num_graphs, :latent_dim]

    # SelfiesEncoder: Linear -> relu -> Linear, tiled + bf16 weights
    b_s = s.shape[0]
    b_pad = _round_up(b_s, 8)
    si_pad = selfies_pp["w1"].shape[0]
    s_pad = _pad2d(s, b_pad, si_pad)
    sh = tiled_matmul(s_pad, selfies_pp["w1"], selfies_pp["b1"], apply_relu=True)
    s_hat_pad = tiled_matmul(sh, selfies_pp["w2"], selfies_pp["b2"])
    s_hat = s_hat_pad[:b_s, :latent_dim]

    return z, s_hat


# ----------------------------------------------------------------------------
# Deterministic parameter init.
# ----------------------------------------------------------------------------
def init_params(key, in_channels, hidden_dim, latent_dim, selfies_in, selfies_hidden):
    ks = jax.random.split(key, 14)

    def w(k, shape, scale=0.1):
        return (scale * jax.random.normal(k, shape)).astype(jnp.float32)

    gat_params = {
        # GATConv1: in_channels -> hidden_dim
        "w1":  w(ks[0], (in_channels, hidden_dim)),
        "as1": w(ks[1], (1, hidden_dim)),
        "ad1": w(ks[2], (1, hidden_dim)),
        "b1":  w(ks[3], (1, hidden_dim)),
        # GATConv2: hidden_dim -> latent_dim
        "w2":  w(ks[4], (hidden_dim, latent_dim)),
        "as2": w(ks[5], (1, latent_dim)),
        "ad2": w(ks[6], (1, latent_dim)),
        "b2":  w(ks[7], (1, latent_dim)),
        # Linear: latent_dim -> latent_dim
        "wl":  w(ks[8], (latent_dim, latent_dim)),
        "bl":  w(ks[9], (1, latent_dim)),
    }
    selfies_params = {
        # Original module hardcodes Linear(325220, 5000) / Linear(5000, latent_dim);
        # dims are scaled down so the example is runnable (kernels tile either way).
        "w1": w(ks[10], (selfies_in, selfies_hidden)),
        "b1": w(ks[11], (1, selfies_hidden)),
        "w2": w(ks[12], (selfies_hidden, latent_dim)),
        "b2": w(ks[13], (1, latent_dim)),
    }
    return gat_params, selfies_params


if __name__ == "__main__":
    key = jax.random.PRNGKey(0)
    k_x, k_e, k_s, k_p, k_a = jax.random.split(key, 5)

    # Small shapes consistent with the forward pass.
    num_nodes = 16
    in_channels = 8
    hidden_dim = 16
    latent_dim = 8
    num_graphs = 2
    num_edges = 32
    edge_dim = 4
    selfies_in, selfies_hidden = 64, 32     # original: 325220, 5000 (scaled down)
    selfies_batch = num_graphs

    x = jax.random.normal(k_x, (num_nodes, in_channels), jnp.float32)
    edge_index = jax.random.randint(k_e, (2, num_edges), 0, num_nodes, jnp.int32)
    batch = jnp.concatenate([jnp.zeros(num_nodes // 2, jnp.int32),
                             jnp.ones(num_nodes - num_nodes // 2, jnp.int32)])
    edge_attr = jax.random.normal(k_a, (num_edges, edge_dim), jnp.float32)
    s = jax.random.normal(k_s, (selfies_batch, selfies_in), jnp.float32)

    gat_params, selfies_params = init_params(
        k_p, in_channels, hidden_dim, latent_dim, selfies_in, selfies_hidden)
    gat_pp = pad_gat_params(gat_params)
    selfies_pp = pad_selfies_params(selfies_params)

    z, s_hat = ssclattr_forward(x, edge_index, batch, edge_attr, s,
                                gat_pp, selfies_pp,
                                num_graphs=num_graphs, latent_dim=latent_dim)
    jax.block_until_ready((z, s_hat))

    assert z.shape == (num_graphs, latent_dim)
    assert s_hat.shape == (selfies_batch, latent_dim)
    print("KERNEL_OK")
</pallas_src>

<mosaic_0001>
module attributes {stable_mosaic.version = 11 : i64} {
  func.func private @main(%arg0: i32) attributes {dimension_semantics = [#tpu.dimension_semantics<core_parallel>], iteration_bounds = array<i64: 2>, tpu.core_type = #tpu.core_type<sc_scalar_subcore>, window_params = []} {
    return
  }
}

module attributes {stable_mosaic.version = 11 : i64} {
  func.func private @main(%arg0: i32) attributes {dimension_semantics = [#tpu.dimension_semantics<core_parallel>], iteration_bounds = array<i64: 2>, tpu.core_type = #tpu.core_type<sc_scalar_subcore>, window_params = []} {
    return
  }
}

module attributes {stable_mosaic.version = 11 : i64} {
  func.func @_matmul_kernel(%arg0: i32, %arg1: i32, %arg2: i32, %arg3: memref<8x128xf32, #tpu.memory_space<vmem>>, %arg4: memref<128x128xbf16, #tpu.memory_space<vmem>>, %arg5: memref<1x128xf32, #tpu.memory_space<vmem>>, %arg6: memref<8x128xf32, #tpu.memory_space<vmem>>, %arg7: memref<8x128xf32, #tpu.memory_space<vmem>>) attributes {dimension_semantics = [#tpu.dimension_semantics<parallel>, #tpu.dimension_semantics<parallel>, #tpu.dimension_semantics<arbitrary>], iteration_bounds = array<i64: 1, 1, 1>, scalar_prefetch = 0 : i64, scratch_operands = 1 : i64, tpu.core_type = #tpu.core_type<tc>, window_params = [{transform_indices = @transform_0, window_bounds = array<i64: 8, 128>}, {transform_indices = @transform_1, window_bounds = array<i64: 128, 128>}, {transform_indices = @transform_2, window_bounds = array<i64: 1, 128>}, {transform_indices = @transform_3, window_bounds = array<i64: 8, 128>}]} {
    %c0_i32 = arith.constant 0 : i32
    %0 = arith.cmpi eq, %arg2, %c0_i32 : i32
    %1 = arith.extui %0 : i1 to i32
    %c0_i32_0 = arith.constant 0 : i32
    %2 = arith.cmpi ne, %1, %c0_i32_0 : i32
    scf.if %2 {
      %cst_10 = arith.constant 0.000000e+00 : f32
      %13 = vector.broadcast %cst_10 : f32 to vector<8x128xf32>
      %c0_11 = arith.constant 0 : index
      %c0_12 = arith.constant 0 : index
      %14 = vector.load %arg7[%c0_11, %c0_12] : memref<8x128xf32, #tpu.memory_space<vmem>>, vector<8x128xf32>
      tpu.vector_store %arg7[%c0_11, %c0_12], %13 {strides = array<i32>} : memref<8x128xf32, #tpu.memory_space<vmem>>, vector<8x128xf32>,
    } else {
    }
    %c0 = arith.constant 0 : index
    %c0_1 = arith.constant 0 : index
    %3 = vector.load %arg3[%c0, %c0_1] : memref<8x128xf32, #tpu.memory_space<vmem>>, vector<8x128xf32>
    %c0_2 = arith.constant 0 : index
    %c0_3 = arith.constant 0 : index
    %4 = vector.load %arg4[%c0_2, %c0_3] : memref<128x128xbf16, #tpu.memory_space<vmem>>, vector<128x128xbf16>
    %5 = arith.truncf %3 : vector<8x128xf32> to vector<8x128xbf16>
    %c0_4 = arith.constant 0 : index
    %c0_5 = arith.constant 0 : index
    %6 = vector.load %arg7[%c0_4, %c0_5] : memref<8x128xf32, #tpu.memory_space<vmem>>, vector<8x128xf32>
    %cst = arith.constant dense<0.000000e+00> : vector<8x128xf32>
    %7 = tpu.matmul %5, %4, %cst {dimension_numbers = #tpu.dot_dimension_numbers<[1], [0], [0], [1], [0, 0, 1, 1], [], []>} : vector<8x128xbf16>, vector<128x128xbf16>, vector<8x128xf32> -> vector<8x128xf32>
    %8 = arith.addf %6, %7 : vector<8x128xf32>
    %c0_6 = arith.constant 0 : index
    %c0_7 = arith.constant 0 : index
    %9 = vector.load %arg7[%c0_6, %c0_7] : memref<8x128xf32, #tpu.memory_space<vmem>>, vector<8x128xf32>
    tpu.vector_store %arg7[%c0_6, %c0_7], %8 {strides = array<i32>} : memref<8x128xf32, #tpu.memory_space<vmem>>, vector<8x128xf32>,
    %c0_i32_8 = arith.constant 0 : i32
    %10 = arith.cmpi eq, %arg2, %c0_i32_8 : i32
    %11 = arith.extui %10 : i1 to i32
    %c0_i32_9 = arith.constant 0 : i32
    %12 = arith.cmpi ne, %11, %c0_i32_9 : i32
    scf.if %12 {
      %c0_10 = arith.constant 0 : index
      %c0_11 = arith.constant 0 : index
      %13 = vector.load %arg7[%c0_10, %c0_11] : memref<8x128xf32, #tpu.memory_space<vmem>>, vector<8x128xf32>
      %c0_12 = arith.constant 0 : index
      %c0_13 = arith.constant 0 : index
      %14 = vector.load %arg5[%c0_12, %c0_13] : memref<1x128xf32, #tpu.memory_space<vmem>>, vector<1x128xf32>
      %15 = vector.broadcast %14 : vector<1x128xf32> to vector<8x128xf32>
      %16 = arith.addf %13, %15 : vector<8x128xf32>
      %cst_14 = arith.constant 0.000000e+00 : f32
      %17 = vector.broadcast %cst_14 : f32 to vector<8x128xf32>
      %18 = arith.maximumf %16, %17 : vector<8x128xf32>
      %c0_15 = arith.constant 0 : index
      %c0_16 = arith.constant 0 : index
      %19 = vector.load %arg6[%c0_15, %c0_16] : memref<8x128xf32, #tpu.memory_space<vmem>>, vector<8x128xf32>
      tpu.vector_store %arg6[%c0_15, %c0_16], %18 {strides = array<i32>} : memref<8x128xf32, #tpu.memory_space<vmem>>, vector<8x128xf32>,
    } else {
    }
    return
  }
  func.func @transform_0(%arg0: i32, %arg1: i32, %arg2: i32) -> (i32, i32) {
    %c0_i32 = arith.constant 0 : i32
    return %arg0, %arg2 : i32, i32
  }
  func.func @transform_1(%arg0: i32, %arg1: i32, %arg2: i32) -> (i32, i32) {
    %c0_i32 = arith.constant 0 : i32
    return %arg2, %arg1 : i32, i32
  }
  func.func @transform_2(%arg0: i32, %arg1: i32, %arg2: i32) -> (i32, i32) {
    %c0_i32 = arith.constant 0 : i32
    %c0_i32_0 = arith.constant 0 : i32
    return %c0_i32, %arg1 : i32, i32
  }
  func.func @transform_3(%arg0: i32, %arg1: i32, %arg2: i32) -> (i32, i32) {
    %c0_i32 = arith.constant 0 : i32
    return %arg0, %arg1 : i32, i32
  }
}

module attributes {stable_mosaic.version = 11 : i64} {
  func.func @_matmul_kernel(%arg0: i32, %arg1: i32, %arg2: i32, %arg3: memref<8x128xf32, #tpu.memory_space<vmem>>, %arg4: memref<128x128xbf16, #tpu.memory_space<vmem>>, %arg5: memref<1x128xf32, #tpu.memory_space<vmem>>, %arg6: memref<8x128xf32, #tpu.memory_space<vmem>>, %arg7: memref<8x128xf32, #tpu.memory_space<vmem>>) attributes {dimension_semantics = [#tpu.dimension_semantics<parallel>, #tpu.dimension_semantics<parallel>, #tpu.dimension_semantics<arbitrary>], iteration_bounds = array<i64: 1, 1, 1>, scalar_prefetch = 0 : i64, scratch_operands = 1 : i64, tpu.core_type = #tpu.core_type<tc>, window_params = [{transform_indices = @transform_0, window_bounds = array<i64: 8, 128>}, {transform_indices = @transform_1, window_bounds = array<i64: 128, 128>}, {transform_indices = @transform_2, window_bounds = array<i64: 1, 128>}, {transform_indices = @transform_3, window_bounds = array<i64: 8, 128>}]} {
    %c0_i32 = arith.constant 0 : i32
    %0 = arith.cmpi eq, %arg2, %c0_i32 : i32
    %1 = arith.extui %0 : i1 to i32
    %c0_i32_0 = arith.constant 0 : i32
    %2 = arith.cmpi ne, %1, %c0_i32_0 : i32
    scf.if %2 {
      %cst_10 = arith.constant 0.000000e+00 : f32
      %13 = vector.broadcast %cst_10 : f32 to vector<8x128xf32>
      %c0_11 = arith.constant 0 : index
      %c0_12 = arith.constant 0 : index
      %14 = vector.load %arg7[%c0_11, %c0_12] : memref<8x128xf32, #tpu.memory_space<vmem>>, vector<8x128xf32>
      tpu.vector_store %arg7[%c0_11, %c0_12], %13 {strides = array<i32>} : memref<8x128xf32, #tpu.memory_space<vmem>>, vector<8x128xf32>,
    } else {
    }
    %c0 = arith.constant 0 : index
    %c0_1 = arith.constant 0 : index
    %3 = vector.load %arg3[%c0, %c0_1] : memref<8x128xf32, #tpu.memory_space<vmem>>, vector<8x128xf32>
    %c0_2 = arith.constant 0 : index
    %c0_3 = arith.constant 0 : index
    %4 = vector.load %arg4[%c0_2, %c0_3] : memref<128x128xbf16, #tpu.memory_space<vmem>>, vector<128x128xbf16>
    %5 = arith.truncf %3 : vector<8x128xf32> to vector<8x128xbf16>
    %c0_4 = arith.constant 0 : index
    %c0_5 = arith.constant 0 : index
    %6 = vector.load %arg7[%c0_4, %c0_5] : memref<8x128xf32, #tpu.memory_space<vmem>>, vector<8x128xf32>
    %cst = arith.constant dense<0.000000e+00> : vector<8x128xf32>
    %7 = tpu.matmul %5, %4, %cst {dimension_numbers = #tpu.dot_dimension_numbers<[1], [0], [0], [1], [0, 0, 1, 1], [], []>} : vector<8x128xbf16>, vector<128x128xbf16>, vector<8x128xf32> -> vector<8x128xf32>
    %8 = arith.addf %6, %7 : vector<8x128xf32>
    %c0_6 = arith.constant 0 : index
    %c0_7 = arith.constant 0 : index
    %9 = vector.load %arg7[%c0_6, %c0_7] : memref<8x128xf32, #tpu.memory_space<vmem>>, vector<8x128xf32>
    tpu.vector_store %arg7[%c0_6, %c0_7], %8 {strides = array<i32>} : memref<8x128xf32, #tpu.memory_space<vmem>>, vector<8x128xf32>,
    %c0_i32_8 = arith.constant 0 : i32
    %10 = arith.cmpi eq, %arg2, %c0_i32_8 : i32
    %11 = arith.extui %10 : i1 to i32
    %c0_i32_9 = arith.constant 0 : i32
    %12 = arith.cmpi ne, %11, %c0_i32_9 : i32
    scf.if %12 {
      %c0_10 = arith.constant 0 : index
      %c0_11 = arith.constant 0 : index
      %13 = vector.load %arg7[%c0_10, %c0_11] : memref<8x128xf32, #tpu.memory_space<vmem>>, vector<8x128xf32>
      %c0_12 = arith.constant 0 : index
      %c0_13 = arith.constant 0 : index
      %14 = vector.load %arg5[%c0_12, %c0_13] : memref<1x128xf32, #tpu.memory_space<vmem>>, vector<1x128xf32>
      %15 = vector.broadcast %14 : vector<1x128xf32> to vector<8x128xf32>
      %16 = arith.addf %13, %15 : vector<8x128xf32>
      %c0_14 = arith.constant 0 : index
      %c0_15 = arith.constant 0 : index
      %17 = vector.load %arg6[%c0_14, %c0_15] : memref<8x128xf32, #tpu.memory_space<vmem>>, vector<8x128xf32>
      tpu.vector_store %arg6[%c0_14, %c0_15], %16 {strides = array<i32>} : memref<8x128xf32, #tpu.memory_space<vmem>>, vector<8x128xf32>,
    } else {
    }
    return
  }
  func.func @transform_0(%arg0: i32, %arg1: i32, %arg2: i32) -> (i32, i32) {
    %c0_i32 = arith.constant 0 : i32
    return %arg0, %arg2 : i32, i32
  }
  func.func @transform_1(%arg0: i32, %arg1: i32, %arg2: i32) -> (i32, i32) {
    %c0_i32 = arith.constant 0 : i32
    return %arg2, %arg1 : i32, i32
  }
  func.func @transform_2(%arg0: i32, %arg1: i32, %arg2: i32) -> (i32, i32) {
    %c0_i32 = arith.constant 0 : i32
    %c0_i32_0 = arith.constant 0 : i32
    return %c0_i32, %arg1 : i32, i32
  }
  func.func @transform_3(%arg0: i32, %arg1: i32, %arg2: i32) -> (i32, i32) {
    %c0_i32 = arith.constant 0 : i32
    return %arg0, %arg1 : i32, i32
  }
}

module attributes {stable_mosaic.version = 11 : i64} {
  func.func @_matmul_kernel(%arg0: i32, %arg1: i32, %arg2: i32, %arg3: memref<128x128xf32, #tpu.memory_space<vmem>>, %arg4: memref<128x128xf32, #tpu.memory_space<vmem>>, %arg5: memref<1x128xf32, #tpu.memory_space<vmem>>, %arg6: memref<128x128xf32, #tpu.memory_space<vmem>>, %arg7: memref<128x128xf32, #tpu.memory_space<vmem>>) attributes {dimension_semantics = [#tpu.dimension_semantics<parallel>, #tpu.dimension_semantics<parallel>, #tpu.dimension_semantics<arbitrary>], iteration_bounds = array<i64: 1, 1, 1>, scalar_prefetch = 0 : i64, scratch_operands = 1 : i64, tpu.core_type = #tpu.core_type<tc>, window_params = [{transform_indices = @transform_0, window_bounds = array<i64: 128, 128>}, {transform_indices = @transform_1, window_bounds = array<i64: 128, 128>}, {transform_indices = @transform_2, window_bounds = array<i64: 1, 128>}, {transform_indices = @transform_3, window_bounds = array<i64: 128, 128>}]} {
    %c0_i32 = arith.constant 0 : i32
    %0 = arith.cmpi eq, %arg2, %c0_i32 : i32
    %1 = arith.extui %0 : i1 to i32
    %c0_i32_0 = arith.constant 0 : i32
    %2 = arith.cmpi ne, %1, %c0_i32_0 : i32
    scf.if %2 {
      %cst_10 = arith.constant 0.000000e+00 : f32
      %12 = vector.broadcast %cst_10 : f32 to vector<128x128xf32>
      %c0_11 = arith.constant 0 : index
      %c0_12 = arith.constant 0 : index
      %13 = vector.load %arg7[%c0_11, %c0_12] : memref<128x128xf32, #tpu.memory_space<vmem>>, vector<128x128xf32>
      tpu.vector_store %arg7[%c0_11, %c0_12], %12 {strides = array<i32>} : memref<128x128xf32, #tpu.memory_space<vmem>>, vector<128x128xf32>,
    } else {
    }
    %c0 = arith.constant 0 : index
    %c0_1 = arith.constant 0 : index
    %3 = vector.load %arg3[%c0, %c0_1] : memref<128x128xf32, #tpu.memory_space<vmem>>, vector<128x128xf32>
    %c0_2 = arith.constant 0 : index
    %c0_3 = arith.constant 0 : index
    %4 = vector.load %arg4[%c0_2, %c0_3] : memref<128x128xf32, #tpu.memory_space<vmem>>, vector<128x128xf32>
    %c0_4 = arith.constant 0 : index
    %c0_5 = arith.constant 0 : index
    %5 = vector.load %arg7[%c0_4, %c0_5] : memref<128x128xf32, #tpu.memory_space<vmem>>, vector<128x128xf32>
    %cst = arith.constant dense<0.000000e+00> : vector<128x128xf32>
    %6 = tpu.matmul %3, %4, %cst {dimension_numbers = #tpu.dot_dimension_numbers<[1], [0], [0], [1], [0, 0, 1, 1], [], []>} : vector<128x128xf32>, vector<128x128xf32>, vector<128x128xf32> -> vector<128x128xf32>
    %7 = arith.addf %5, %6 : vector<128x128xf32>
    %c0_6 = arith.constant 0 : index
    %c0_7 = arith.constant 0 : index
    %8 = vector.load %arg7[%c0_6, %c0_7] : memref<128x128xf32, #tpu.memory_space<vmem>>, vector<128x128xf32>
    tpu.vector_store %arg7[%c0_6, %c0_7], %7 {strides = array<i32>} : memref<128x128xf32, #tpu.memory_space<vmem>>, vector<128x128xf32>,
    %c0_i32_8 = arith.constant 0 : i32
    %9 = arith.cmpi eq, %arg2, %c0_i32_8 : i32
    %10 = arith.extui %9 : i1 to i32
    %c0_i32_9 = arith.constant 0 : i32
    %11 = arith.cmpi ne, %10, %c0_i32_9 : i32
    scf.if %11 {
      %c0_10 = arith.constant 0 : index
      %c0_11 = arith.constant 0 : index
      %12 = vector.load %arg7[%c0_10, %c0_11] : memref<128x128xf32, #tpu.memory_space<vmem>>, vector<128x128xf32>
      %c0_12 = arith.constant 0 : index
      %c0_13 = arith.constant 0 : index
      %13 = vector.load %arg5[%c0_12, %c0_13] : memref<1x128xf32, #tpu.memory_space<vmem>>, vector<1x128xf32>
      %14 = vector.broadcast %13 : vector<1x128xf32> to vector<128x128xf32>
      %15 = arith.addf %12, %14 : vector<128x128xf32>
      %c0_14 = arith.constant 0 : index
      %c0_15 = arith.constant 0 : index
      %16 = vector.load %arg6[%c0_14, %c0_15] : memref<128x128xf32, #tpu.memory_space<vmem>>, vector<128x128xf32>
      tpu.vector_store %arg6[%c0_14, %c0_15], %15 {strides = array<i32>} : memref<128x128xf32, #tpu.memory_space<vmem>>, vector<128x128xf32>,
    } else {
    }
    return
  }
  func.func @transform_0(%arg0: i32, %arg1: i32, %arg2: i32) -> (i32, i32) {
    %c0_i32 = arith.constant 0 : i32
    return %arg0, %arg2 : i32, i32
  }
  func.func @transform_1(%arg0: i32, %arg1: i32, %arg2: i32) -> (i32, i32) {
    %c0_i32 = arith.constant 0 : i32
    return %arg2, %arg1 : i32, i32
  }
  func.func @transform_2(%arg0: i32, %arg1: i32, %arg2: i32) -> (i32, i32) {
    %c0_i32 = arith.constant 0 : i32
    %c0_i32_0 = arith.constant 0 : i32
    return %c0_i32, %arg1 : i32, i32
  }
  func.func @transform_3(%arg0: i32, %arg1: i32, %arg2: i32) -> (i32, i32) {
    %c0_i32 = arith.constant 0 : i32
    return %arg0, %arg1 : i32, i32
  }
}

module attributes {stable_mosaic.version = 11 : i64} {
  func.func @_gat_attention_kernel(%arg0: i32, %arg1: i32, %arg2: memref<1x1xi32, #tpu.memory_space<smem>>, %arg3: memref<128x128xf32, #tpu.memory_space<vmem>>, %arg4: memref<128x128xf32, #tpu.memory_space<vmem>>, %arg5: memref<128x128xbf16, #tpu.memory_space<vmem>>, %arg6: memref<1x128xf32, #tpu.memory_space<vmem>>, %arg7: memref<1x128xf32, #tpu.memory_space<vmem>>, %arg8: memref<1x128xf32, #tpu.memory_space<vmem>>, %arg9: memref<128x128xf32, #tpu.memory_space<vmem>>, %arg10: memref<128x1xf32, #tpu.memory_space<vmem>>, %arg11: memref<128x1xf32, #tpu.memory_space<vmem>>, %arg12: memref<128x128xf32, #tpu.memory_space<vmem>>) attributes {dimension_semantics = [#tpu.dimension_semantics<parallel>, #tpu.dimension_semantics<arbitrary>], iteration_bounds = array<i64: 1, 1>, scalar_prefetch = 1 : i64, scratch_operands = 3 : i64, tpu.core_type = #tpu.core_type<tc>, window_params = [{transform_indices = @transform_0, window_bounds = array<i64: 128, 128>}, {transform_indices = @transform_1, window_bounds = array<i64: 128, 128>}, {transform_indices = @transform_2, window_bounds = array<i64: 128, 128>}, {pipeline_mode = #tpu.pipeline_mode<synchronous>, transform_indices = @transform_3, window_bounds = array<i64: 1, 128>}, {pipeline_mode = #tpu.pipeline_mode<synchronous>, transform_indices = @transform_4, window_bounds = array<i64: 1, 128>}, {pipeline_mode = #tpu.pipeline_mode<synchronous>, transform_indices = @transform_5, window_bounds = array<i64: 1, 128>}, {transform_indices = @transform_6, window_bounds = array<i64: 128, 128>}]} {
    %c0_i32 = arith.constant 0 : i32
    %0 = arith.cmpi eq, %arg1, %c0_i32 : i32
    %1 = arith.extui %0 : i1 to i32
    %c0_i32_0 = arith.constant 0 : i32
    %2 = arith.cmpi ne, %1, %c0_i32_0 : i32
    scf.if %2 {
      %cst = arith.constant -1.000000e+30 : f32
      %12 = vector.broadcast %cst : f32 to vector<128x1xf32>
      %c0 = arith.constant 0 : index
      %c0_5 = arith.constant 0 : index
      %13 = vector.load %arg10[%c0, %c0_5] : memref<128x1xf32, #tpu.memory_space<vmem>>, vector<128x1xf32>
      tpu.vector_store %arg10[%c0, %c0_5], %12 {strides = array<i32>} : memref<128x1xf32, #tpu.memory_space<vmem>>, vector<128x1xf32>,
      %cst_6 = arith.constant 0.000000e+00 : f32
      %14 = vector.broadcast %cst_6 : f32 to vector<128x1xf32>
      %c0_7 = arith.constant 0 : index
      %c0_8 = arith.constant 0 : index
      %15 = vector.load %arg11[%c0_7, %c0_8] : memref<128x1xf32, #tpu.memory_space<vmem>>, vector<128x1xf32>
      tpu.vector_store %arg11[%c0_7, %c0_8], %14 {strides = array<i32>} : memref<128x1xf32, #tpu.memory_space<vmem>>, vector<128x1xf32>,
      %cst_9 = arith.constant 0.000000e+00 : f32
      %16 = vector.broadcast %cst_9 : f32 to vector<128x128xf32>
      %c0_10 = arith.constant 0 : index
      %c0_11 = arith.constant 0 : index
      %17 = vector.load %arg12[%c0_10, %c0_11] : memref<128x128xf32, #tpu.memory_space<vmem>>, vector<128x128xf32>
      tpu.vector_store %arg12[%c0_10, %c0_11], %16 {strides = array<i32>} : memref<128x128xf32, #tpu.memory_space<vmem>>, vector<128x128xf32>,
    } else {
    }
    %3 = arith.index_cast %arg0 : i32 to index
    %4 = arith.index_cast %arg1 : i32 to index
    %5 = memref.load %arg2[%3, %4] : memref<1x1xi32, #tpu.memory_space<smem>>
    %c0_i32_1 = arith.constant 0 : i32
    %6 = arith.cmpi sgt, %5, %c0_i32_1 : i32
    %7 = arith.extui %6 : i1 to i32
    %c0_i32_2 = arith.constant 0 : i32
    %8 = arith.cmpi ne, %7, %c0_i32_2 : i32
    scf.if %8 {
      %c0 = arith.constant 0 : index
      %c0_5 = arith.constant 0 : index
      %12 = vector.load %arg3[%c0, %c0_5] : memref<128x128xf32, #tpu.memory_space<vmem>>, vector<128x128xf32>
      %c0_6 = arith.constant 0 : index
      %c0_7 = arith.constant 0 : index
      %13 = vector.load %arg4[%c0_6, %c0_7] : memref<128x128xf32, #tpu.memory_space<vmem>>, vector<128x128xf32>
      %c0_8 = arith.constant 0 : index
      %c0_9 = arith.constant 0 : index
      %14 = vector.load %arg5[%c0_8, %c0_9] : memref<128x128xbf16, #tpu.memory_space<vmem>>, vector<128x128xbf16>
      %15 = arith.extf %14 : vector<128x128xbf16> to vector<128x128xf32>
      %c0_10 = arith.constant 0 : index
      %c0_11 = arith.constant 0 : index
      %16 = vector.load %arg7[%c0_10, %c0_11] : memref<1x128xf32, #tpu.memory_space<vmem>>, vector<1x128xf32>
      %17 = vector.broadcast %16 : vector<1x128xf32> to vector<128x128xf32>
      %18 = arith.mulf %12, %17 : vector<128x128xf32>
      %cst = arith.constant dense<0.000000e+00> : vector<128xf32>
      %19 = vector.multi_reduction <add>, %18, %cst [1] : vector<128x128xf32> to vector<128xf32>
      %20 = vector.shape_cast %19 : vector<128xf32> to vector<128x1xf32>
      %c0_12 = arith.constant 0 : index
      %c0_13 = arith.constant 0 : index
      %21 = vector.load %arg6[%c0_12, %c0_13] : memref<1x128xf32, #tpu.memory_space<vmem>>, vector<1x128xf32>
      %22 = vector.broadcast %21 : vector<1x128xf32> to vector<128x128xf32>
      %23 = arith.mulf %13, %22 : vector<128x128xf32>
      %cst_14 = arith.constant dense<0.000000e+00> : vector<128xf32>
      %24 = vector.multi_reduction <add>, %23, %cst_14 [1] : vector<128x128xf32> to vector<128xf32>
      %25 = vector.shape_cast %24 : vector<128xf32> to vector<128x1xf32>
      %26 = tpu.transpose %25, [1, 0] : vector<128x1xf32> -> vector<1x128xf32>
      %27 = vector.broadcast %20 : vector<128x1xf32> to vector<128x128xf32>
      %28 = vector.broadcast %26 : vector<1x128xf32> to vector<128x128xf32>
      %29 = arith.addf %27, %28 : vector<128x128xf32>
      %cst_15 = arith.constant 0.000000e+00 : f32
      %30 = vector.broadcast %cst_15 : f32 to vector<128x128xf32>
      %31 = arith.cmpf ogt, %29, %30 : vector<128x128xf32>
      %cst_16 = arith.constant 2.000000e-01 : f32
      %32 = vector.broadcast %cst_16 : f32 to vector<128x128xf32>
      %33 = arith.mulf %32, %29 : vector<128x128xf32>
      %34 = arith.select %31, %29, %33 : vector<128x128xi1>, vector<128x128xf32>
      %cst_17 = arith.constant 0.000000e+00 : f32
      %35 = vector.broadcast %cst_17 : f32 to vector<128x128xf32>
      %36 = arith.cmpf ogt, %15, %35 : vector<128x128xf32>
      %cst_18 = arith.constant -1.000000e+30 : f32
      %37 = vector.broadcast %cst_18 : f32 to vector<128x128xf32>
      %38 = arith.select %36, %34, %37 : vector<128x128xi1>, vector<128x128xf32>
      %c0_19 = arith.constant 0 : index
      %c0_20 = arith.constant 0 : index
      %39 = vector.load %arg10[%c0_19, %c0_20] : memref<128x1xf32, #tpu.memory_space<vmem>>, vector<128x1xf32>
      %cst_21 = arith.constant dense<0xFF800000> : vector<128xf32>
      %40 = vector.multi_reduction <maximumf>, %38, %cst_21 [1] : vector<128x128xf32> to vector<128xf32>
      %41 = vector.shape_cast %40 : vector<128xf32> to vector<128x1xf32>
      %42 = arith.maximumf %39, %41 : vector<128x1xf32>
      %43 = arith.subf %39, %42 : vector<128x1xf32>
      %44 = math.exp %43 : vector<128x1xf32>
      %45 = vector.broadcast %42 : vector<128x1xf32> to vector<128x128xf32>
      %46 = arith.subf %38, %45 : vector<128x128xf32>
      %47 = math.exp %46 : vector<128x128xf32>
      %48 = arith.mulf %47, %15 : vector<128x128xf32>
      %c0_22 = arith.constant 0 : index
      %c0_23 = arith.constant 0 : index
      %49 = vector.load %arg11[%c0_22, %c0_23] : memref<128x1xf32, #tpu.memory_space<vmem>>, vector<128x1xf32>
      %50 = arith.mulf %44, %49 : vector<128x1xf32>
      %cst_24 = arith.constant dense<0.000000e+00> : vector<128xf32>
      %51 = vector.multi_reduction <add>, %48, %cst_24 [1] : vector<128x128xf32> to vector<128xf32>
      %52 = vector.shape_cast %51 : vector<128xf32> to vector<128x1xf32>
      %53 = arith.addf %50, %52 : vector<128x1xf32>
      %c0_25 = arith.constant 0 : index
      %c0_26 = arith.constant 0 : index
      %54 = vector.load %arg11[%c0_25, %c0_26] : memref<128x1xf32, #tpu.memory_space<vmem>>, vector<128x1xf32>
      tpu.vector_store %arg11[%c0_25, %c0_26], %53 {strides = array<i32>} : memref<128x1xf32, #tpu.memory_space<vmem>>, vector<128x1xf32>,
      %c0_27 = arith.constant 0 : index
      %c0_28 = arith.constant 0 : index
      %55 = vector.load %arg12[%c0_27, %c0_28] : memref<128x128xf32, #tpu.memory_space<vmem>>, vector<128x128xf32>
      %56 = vector.broadcast %44 : vector<128x1xf32> to vector<128x128xf32>
      %57 = arith.mulf %56, %55 : vector<128x128xf32>
      %cst_29 = arith.constant dense<0.000000e+00> : vector<128x128xf32>
      %58 = tpu.matmul %48, %13, %cst_29 {dimension_numbers = #tpu.dot_dimension_numbers<[1], [0], [0], [1], [0, 0, 1, 1], [], []>} : vector<128x128xf32>, vector<128x128xf32>, vector<128x128xf32> -> vector<128x128xf32>
      %59 = arith.addf %57, %58 : vector<128x128xf32>
      %c0_30 = arith.constant 0 : index
      %c0_31 = arith.constant 0 : index
      %60 = vector.load %arg12[%c0_30, %c0_31] : memref<128x128xf32, #tpu.memory_space<vmem>>, vector<128x128xf32>
      tpu.vector_store %arg12[%c0_30, %c0_31], %59 {strides = array<i32>} : memref<128x128xf32, #tpu.memory_space<vmem>>, vector<128x128xf32>,
      %c0_32 = arith.constant 0 : index
      %c0_33 = arith.constant 0 : index
      %61 = vector.load %arg10[%c0_32, %c0_33] : memref<128x1xf32, #tpu.memory_space<vmem>>, vector<128x1xf32>
      tpu.vector_store %arg10[%c0_32, %c0_33], %42 {strides = array<i32>} : memref<128x1xf32, #tpu.memory_space<vmem>>, vector<128x1xf32>,
    } else {
    }
    %c0_i32_3 = arith.constant 0 : i32
    %9 = arith.cmpi eq, %arg1, %c0_i32_3 : i32
    %10 = arith.extui %9 : i1 to i32
    %c0_i32_4 = arith.constant 0 : i32
    %11 = arith.cmpi ne, %10, %c0_i32_4 : i32
    scf.if %11 {
      %c0 = arith.constant 0 : index
      %c0_5 = arith.constant 0 : index
      %12 = vector.load %arg12[%c0, %c0_5] : memref<128x128xf32, #tpu.memory_space<vmem>>, vector<128x128xf32>
      %c0_6 = arith.constant 0 : index
      %c0_7 = arith.constant 0 : index
      %13 = vector.load %arg11[%c0_6, %c0_7] : memref<128x1xf32, #tpu.memory_space<vmem>>, vector<128x1xf32>
      %14 = tpu.reciprocal %13 {approx = true} : vector<128x1xf32> -> vector<128x1xf32>
      %15 = vector.broadcast %14 : vector<128x1xf32> to vector<128x128xf32>
      %16 = arith.mulf %12, %15 : vector<128x128xf32>
      %c0_8 = arith.constant 0 : index
      %c0_9 = arith.constant 0 : index
      %17 = vector.load %arg8[%c0_8, %c0_9] : memref<1x128xf32, #tpu.memory_space<vmem>>, vector<1x128xf32>
      %18 = vector.broadcast %17 : vector<1x128xf32> to vector<128x128xf32>
      %19 = arith.addf %16, %18 : vector<128x128xf32>
      %cst = arith.constant 0.000000e+00 : f32
      %20 = vector.broadcast %cst : f32 to vector<128x128xf32>
      %21 = arith.maximumf %19, %20 : vector<128x128xf32>
      %c0_10 = arith.constant 0 : index
      %c0_11 = arith.constant 0 : index
      %22 = vector.load %arg9[%c0_10, %c0_11] : memref<128x128xf32, #tpu.memory_space<vmem>>, vector<128x128xf32>
      tpu.vector_store %arg9[%c0_10, %c0_11], %21 {strides = array<i32>} : memref<128x128xf32, #tpu.memory_space<vmem>>, vector<128x128xf32>,
    } else {
    }
    return
  }
  func.func @transform_0(%arg0: i32, %arg1: i32, %arg2: memref<1x1xi32, #tpu.memory_space<smem>>) -> (i32, i32) {
    %c0_i32 = arith.constant 0 : i32
    %c0_i32_0 = arith.constant 0 : i32
    return %arg0, %c0_i32 : i32, i32
  }
  func.func @transform_1(%arg0: i32, %arg1: i32, %arg2: memref<1x1xi32, #tpu.memory_space<smem>>) -> (i32, i32) {
    %c0_i32 = arith.constant 0 : i32
    %c0_i32_0 = arith.constant 0 : i32
    return %arg1, %c0_i32 : i32, i32
  }
  func.func @transform_2(%arg0: i32, %arg1: i32, %arg2: memref<1x1xi32, #tpu.memory_space<smem>>) -> (i32, i32) {
    %c0_i32 = arith.constant 0 : i32
    return %arg0, %arg1 : i32, i32
  }
  func.func @transform_3(%arg0: i32, %arg1: i32, %arg2: memref<1x1xi32, #tpu.memory_space<smem>>) -> (i32, i32) {
    %c0_i32 = arith.constant 0 : i32
    %c0_i32_0 = arith.constant 0 : i32
    %c0_i32_1 = arith.constant 0 : i32
    return %c0_i32, %c0_i32_0 : i32, i32
  }
  func.func @transform_4(%arg0: i32, %arg1: i32, %arg2: memref<1x1xi32, #tpu.memory_space<smem>>) -> (i32, i32) {
    %c0_i32 = arith.constant 0 : i32
    %c0_i32_0 = arith.constant 0 : i32
    %c0_i32_1 = arith.constant 0 : i32
    return %c0_i32, %c0_i32_0 : i32, i32
  }
  func.func @transform_5(%arg0: i32, %arg1: i32, %arg2: memref<1x1xi32, #tpu.memory_space<smem>>) -> (i32, i32) {
    %c0_i32 = arith.constant 0 : i32
    %c0_i32_0 = arith.constant 0 : i32
    %c0_i32_1 = arith.constant 0 : i32
    return %c0_i32, %c0_i32_0 : i32, i32
  }
  func.func @transform_6(%arg0: i32, %arg1: i32, %arg2: memref<1x1xi32, #tpu.memory_space<smem>>) -> (i32, i32) {
    %c0_i32 = arith.constant 0 : i32
    %c0_i32_0 = arith.constant 0 : i32
    return %arg0, %c0_i32 : i32, i32
  }
}

module attributes {stable_mosaic.version = 11 : i64} {
  func.func @_matmul_kernel(%arg0: i32, %arg1: i32, %arg2: i32, %arg3: memref<8x128xf32, #tpu.memory_space<vmem>>, %arg4: memref<128x128xf32, #tpu.memory_space<vmem>>, %arg5: memref<1x128xf32, #tpu.memory_space<vmem>>, %arg6: memref<8x128xf32, #tpu.memory_space<vmem>>, %arg7: memref<8x128xf32, #tpu.memory_space<vmem>>) attributes {dimension_semantics = [#tpu.dimension_semantics<parallel>, #tpu.dimension_semantics<parallel>, #tpu.dimension_semantics<arbitrary>], iteration_bounds = array<i64: 1, 1, 1>, scalar_prefetch = 0 : i64, scratch_operands = 1 : i64, tpu.core_type = #tpu.core_type<tc>, window_params = [{transform_indices = @transform_0, window_bounds = array<i64: 8, 128>}, {transform_indices = @transform_1, window_bounds = array<i64: 128, 128>}, {transform_indices = @transform_2, window_bounds = array<i64: 1, 128>}, {transform_indices = @transform_3, window_bounds = array<i64: 8, 128>}]} {
    %c0_i32 = arith.constant 0 : i32
    %0 = arith.cmpi eq, %arg2, %c0_i32 : i32
    %1 = arith.extui %0 : i1 to i32
    %c0_i32_0 = arith.constant 0 : i32
    %2 = arith.cmpi ne, %1, %c0_i32_0 : i32
    scf.if %2 {
      %cst_10 = arith.constant 0.000000e+00 : f32
      %12 = vector.broadcast %cst_10 : f32 to vector<8x128xf32>
      %c0_11 = arith.constant 0 : index
      %c0_12 = arith.constant 0 : index
      %13 = vector.load %arg7[%c0_11, %c0_12] : memref<8x128xf32, #tpu.memory_space<vmem>>, vector<8x128xf32>
      tpu.vector_store %arg7[%c0_11, %c0_12], %12 {strides = array<i32>} : memref<8x128xf32, #tpu.memory_space<vmem>>, vector<8x128xf32>,
    } else {
    }
    %c0 = arith.constant 0 : index
    %c0_1 = arith.constant 0 : index
    %3 = vector.load %arg3[%c0, %c0_1] : memref<8x128xf32, #tpu.memory_space<vmem>>, vector<8x128xf32>
    %c0_2 = arith.constant 0 : index
    %c0_3 = arith.constant 0 : index
    %4 = vector.load %arg4[%c0_2, %c0_3] : memref<128x128xf32, #tpu.memory_space<vmem>>, vector<128x128xf32>
    %c0_4 = arith.constant 0 : index
    %c0_5 = arith.constant 0 : index
    %5 = vector.load %arg7[%c0_4, %c0_5] : memref<8x128xf32, #tpu.memory_space<vmem>>, vector<8x128xf32>
    %cst = arith.constant dense<0.000000e+00> : vector<8x128xf32>
    %6 = tpu.matmul %3, %4, %cst {dimension_numbers = #tpu.dot_dimension_numbers<[1], [0], [0], [1], [0, 0, 1, 1], [], []>} : vector<8x128xf32>, vector<128x128xf32>, vector<8x128xf32> -> vector<8x128xf32>
    %7 = arith.addf %5, %6 : vector<8x128xf32>
    %c0_6 = arith.constant 0 : index
    %c0_7 = arith.constant 0 : index
    %8 = vector.load %arg7[%c0_6, %c0_7] : memref<8x128xf32, #tpu.memory_space<vmem>>, vector<8x128xf32>
    tpu.vector_store %arg7[%c0_6, %c0_7], %7 {strides = array<i32>} : memref<8x128xf32, #tpu.memory_space<vmem>>, vector<8x128xf32>,
    %c0_i32_8 = arith.constant 0 : i32
    %9 = arith.cmpi eq, %arg2, %c0_i32_8 : i32
    %10 = arith.extui %9 : i1 to i32
    %c0_i32_9 = arith.constant 0 : i32
    %11 = arith.cmpi ne, %10, %c0_i32_9 : i32
    scf.if %11 {
      %c0_10 = arith.constant 0 : index
      %c0_11 = arith.constant 0 : index
      %12 = vector.load %arg7[%c0_10, %c0_11] : memref<8x128xf32, #tpu.memory_space<vmem>>, vector<8x128xf32>
      %c0_12 = arith.constant 0 : index
      %c0_13 = arith.constant 0 : index
      %13 = vector.load %arg5[%c0_12, %c0_13] : memref<1x128xf32, #tpu.memory_space<vmem>>, vector<1x128xf32>
      %14 = vector.broadcast %13 : vector<1x128xf32> to vector<8x128xf32>
      %15 = arith.addf %12, %14 : vector<8x128xf32>
      %c0_14 = arith.constant 0 : index
      %c0_15 = arith.constant 0 : index
      %16 = vector.load %arg6[%c0_14, %c0_15] : memref<8x128xf32, #tpu.memory_space<vmem>>, vector<8x128xf32>
      tpu.vector_store %arg6[%c0_14, %c0_15], %15 {strides = array<i32>} : memref<8x128xf32, #tpu.memory_space<vmem>>, vector<8x128xf32>,
    } else {
    }
    return
  }
  func.func @transform_0(%arg0: i32, %arg1: i32, %arg2: i32) -> (i32, i32) {
    %c0_i32 = arith.constant 0 : i32
    return %arg0, %arg2 : i32, i32
  }
  func.func @transform_1(%arg0: i32, %arg1: i32, %arg2: i32) -> (i32, i32) {
    %c0_i32 = arith.constant 0 : i32
    return %arg2, %arg1 : i32, i32
  }
  func.func @transform_2(%arg0: i32, %arg1: i32, %arg2: i32) -> (i32, i32) {
    %c0_i32 = arith.constant 0 : i32
    %c0_i32_0 = arith.constant 0 : i32
    return %c0_i32, %arg1 : i32, i32
  }
  func.func @transform_3(%arg0: i32, %arg1: i32, %arg2: i32) -> (i32, i32) {
    %c0_i32 = arith.constant 0 : i32
    return %arg0, %arg1 : i32, i32
  }
}

module attributes {stable_mosaic.version = 11 : i64} {
  func.func @_gat_attention_kernel(%arg0: i32, %arg1: i32, %arg2: memref<1x1xi32, #tpu.memory_space<smem>>, %arg3: memref<128x128xf32, #tpu.memory_space<vmem>>, %arg4: memref<128x128xf32, #tpu.memory_space<vmem>>, %arg5: memref<128x128xbf16, #tpu.memory_space<vmem>>, %arg6: memref<1x128xf32, #tpu.memory_space<vmem>>, %arg7: memref<1x128xf32, #tpu.memory_space<vmem>>, %arg8: memref<1x128xf32, #tpu.memory_space<vmem>>, %arg9: memref<128x128xf32, #tpu.memory_space<vmem>>, %arg10: memref<128x1xf32, #tpu.memory_space<vmem>>, %arg11: memref<128x1xf32, #tpu.memory_space<vmem>>, %arg12: memref<128x128xf32, #tpu.memory_space<vmem>>) attributes {dimension_semantics = [#tpu.dimension_semantics<parallel>, #tpu.dimension_semantics<arbitrary>], iteration_bounds = array<i64: 1, 1>, scalar_prefetch = 1 : i64, scratch_operands = 3 : i64, tpu.core_type = #tpu.core_type<tc>, window_params = [{transform_indices = @transform_0, window_bounds = array<i64: 128, 128>}, {transform_indices = @transform_1, window_bounds = array<i64: 128, 128>}, {transform_indices = @transform_2, window_bounds = array<i64: 128, 128>}, {pipeline_mode = #tpu.pipeline_mode<synchronous>, transform_indices = @transform_3, window_bounds = array<i64: 1, 128>}, {pipeline_mode = #tpu.pipeline_mode<synchronous>, transform_indices = @transform_4, window_bounds = array<i64: 1, 128>}, {pipeline_mode = #tpu.pipeline_mode<synchronous>, transform_indices = @transform_5, window_bounds = array<i64: 1, 128>}, {transform_indices = @transform_6, window_bounds = array<i64: 128, 128>}]} {
    %c0_i32 = arith.constant 0 : i32
    %0 = arith.cmpi eq, %arg1, %c0_i32 : i32
    %1 = arith.extui %0 : i1 to i32
    %c0_i32_0 = arith.constant 0 : i32
    %2 = arith.cmpi ne, %1, %c0_i32_0 : i32
    scf.if %2 {
      %cst = arith.constant -1.000000e+30 : f32
      %12 = vector.broadcast %cst : f32 to vector<128x1xf32>
      %c0 = arith.constant 0 : index
      %c0_5 = arith.constant 0 : index
      %13 = vector.load %arg10[%c0, %c0_5] : memref<128x1xf32, #tpu.memory_space<vmem>>, vector<128x1xf32>
      tpu.vector_store %arg10[%c0, %c0_5], %12 {strides = array<i32>} : memref<128x1xf32, #tpu.memory_space<vmem>>, vector<128x1xf32>,
      %cst_6 = arith.constant 0.000000e+00 : f32
      %14 = vector.broadcast %cst_6 : f32 to vector<128x1xf32>
      %c0_7 = arith.constant 0 : index
      %c0_8 = arith.constant 0 : index
      %15 = vector.load %arg11[%c0_7, %c0_8] : memref<128x1xf32, #tpu.memory_space<vmem>>, vector<128x1xf32>
      tpu.vector_store %arg11[%c0_7, %c0_8], %14 {strides = array<i32>} : memref<128x1xf32, #tpu.memory_space<vmem>>, vector<128x1xf32>,
      %cst_9 = arith.constant 0.000000e+00 : f32
      %16 = vector.broadcast %cst_9 : f32 to vector<128x128xf32>
      %c0_10 = arith.constant 0 : index
      %c0_11 = arith.constant 0 : index
      %17 = vector.load %arg12[%c0_10, %c0_11] : memref<128x128xf32, #tpu.memory_space<vmem>>, vector<128x128xf32>
      tpu.vector_store %arg12[%c0_10, %c0_11], %16 {strides = array<i32>} : memref<128x128xf32, #tpu.memory_space<vmem>>, vector<128x128xf32>,
    } else {
    }
    %3 = arith.index_cast %arg0 : i32 to index
    %4 = arith.index_cast %arg1 : i32 to index
    %5 = memref.load %arg2[%3, %4] : memref<1x1xi32, #tpu.memory_space<smem>>
    %c0_i32_1 = arith.constant 0 : i32
    %6 = arith.cmpi sgt, %5, %c0_i32_1 : i32
    %7 = arith.extui %6 : i1 to i32
    %c0_i32_2 = arith.constant 0 : i32
    %8 = arith.cmpi ne, %7, %c0_i32_2 : i32
    scf.if %8 {
      %c0 = arith.constant 0 : index
      %c0_5 = arith.constant 0 : index
      %12 = vector.load %arg3[%c0, %c0_5] : memref<128x128xf32, #tpu.memory_space<vmem>>, vector<128x128xf32>
      %c0_6 = arith.constant 0 : index
      %c0_7 = arith.constant 0 : index
      %13 = vector.load %arg4[%c0_6, %c0_7] : memref<128x128xf32, #tpu.memory_space<vmem>>, vector<128x128xf32>
      %c0_8 = arith.constant 0 : index
      %c0_9 = arith.constant 0 : index
      %14 = vector.load %arg5[%c0_8, %c0_9] : memref<128x128xbf16, #tpu.memory_space<vmem>>, vector<128x128xbf16>
      %15 = arith.extf %14 : vector<128x128xbf16> to vector<128x128xf32>
      %c0_10 = arith.constant 0 : index
      %c0_11 = arith.constant 0 : index
      %16 = vector.load %arg7[%c0_10, %c0_11] : memref<1x128xf32, #tpu.memory_space<vmem>>, vector<1x128xf32>
      %17 = vector.broadcast %16 : vector<1x128xf32> to vector<128x128xf32>
      %18 = arith.mulf %12, %17 : vector<128x128xf32>
      %cst = arith.constant dense<0.000000e+00> : vector<128xf32>
      %19 = vector.multi_reduction <add>, %18, %cst [1] : vector<128x128xf32> to vector<128xf32>
      %20 = vector.shape_cast %19 : vector<128xf32> to vector<128x1xf32>
      %c0_12 = arith.constant 0 : index
      %c0_13 = arith.constant 0 : index
      %21 = vector.load %arg6[%c0_12, %c0_13] : memref<1x128xf32, #tpu.memory_space<vmem>>, vector<1x128xf32>
      %22 = vector.broadcast %21 : vector<1x128xf32> to vector<128x128xf32>
      %23 = arith.mulf %13, %22 : vector<128x128xf32>
      %cst_14 = arith.constant dense<0.000000e+00> : vector<128xf32>
      %24 = vector.multi_reduction <add>, %23, %cst_14 [1] : vector<128x128xf32> to vector<128xf32>
      %25 = vector.shape_cast %24 : vector<128xf32> to vector<128x1xf32>
      %26 = tpu.transpose %25, [1, 0] : vector<128x1xf32> -> vector<1x128xf32>
      %27 = vector.broadcast %20 : vector<128x1xf32> to vector<128x128xf32>
      %28 = vector.broadcast %26 : vector<1x128xf32> to vector<128x128xf32>
      %29 = arith.addf %27, %28 : vector<128x128xf32>
      %cst_15 = arith.constant 0.000000e+00 : f32
      %30 = vector.broadcast %cst_15 : f32 to vector<128x128xf32>
      %31 = arith.cmpf ogt, %29, %30 : vector<128x128xf32>
      %cst_16 = arith.constant 2.000000e-01 : f32
      %32 = vector.broadcast %cst_16 : f32 to vector<128x128xf32>
      %33 = arith.mulf %32, %29 : vector<128x128xf32>
      %34 = arith.select %31, %29, %33 : vector<128x128xi1>, vector<128x128xf32>
      %cst_17 = arith.constant 0.000000e+00 : f32
      %35 = vector.broadcast %cst_17 : f32 to vector<128x128xf32>
      %36 = arith.cmpf ogt, %15, %35 : vector<128x128xf32>
      %cst_18 = arith.constant -1.000000e+30 : f32
      %37 = vector.broadcast %cst_18 : f32 to vector<128x128xf32>
      %38 = arith.select %36, %34, %37 : vector<128x128xi1>, vector<128x128xf32>
      %c0_19 = arith.constant 0 : index
      %c0_20 = arith.constant 0 : index
      %39 = vector.load %arg10[%c0_19, %c0_20] : memref<128x1xf32, #tpu.memory_space<vmem>>, vector<128x1xf32>
      %cst_21 = arith.constant dense<0xFF800000> : vector<128xf32>
      %40 = vector.multi_reduction <maximumf>, %38, %cst_21 [1] : vector<128x128xf32> to vector<128xf32>
      %41 = vector.shape_cast %40 : vector<128xf32> to vector<128x1xf32>
      %42 = arith.maximumf %39, %41 : vector<128x1xf32>
      %43 = arith.subf %39, %42 : vector<128x1xf32>
      %44 = math.exp %43 : vector<128x1xf32>
      %45 = vector.broadcast %42 : vector<128x1xf32> to vector<128x128xf32>
      %46 = arith.subf %38, %45 : vector<128x128xf32>
      %47 = math.exp %46 : vector<128x128xf32>
      %48 = arith.mulf %47, %15 : vector<128x128xf32>
      %c0_22 = arith.constant 0 : index
      %c0_23 = arith.constant 0 : index
      %49 = vector.load %arg11[%c0_22, %c0_23] : memref<128x1xf32, #tpu.memory_space<vmem>>, vector<128x1xf32>
      %50 = arith.mulf %44, %49 : vector<128x1xf32>
      %cst_24 = arith.constant dense<0.000000e+00> : vector<128xf32>
      %51 = vector.multi_reduction <add>, %48, %cst_24 [1] : vector<128x128xf32> to vector<128xf32>
      %52 = vector.shape_cast %51 : vector<128xf32> to vector<128x1xf32>
      %53 = arith.addf %50, %52 : vector<128x1xf32>
      %c0_25 = arith.constant 0 : index
      %c0_26 = arith.constant 0 : index
      %54 = vector.load %arg11[%c0_25, %c0_26] : memref<128x1xf32, #tpu.memory_space<vmem>>, vector<128x1xf32>
      tpu.vector_store %arg11[%c0_25, %c0_26], %53 {strides = array<i32>} : memref<128x1xf32, #tpu.memory_space<vmem>>, vector<128x1xf32>,
      %c0_27 = arith.constant 0 : index
      %c0_28 = arith.constant 0 : index
      %55 = vector.load %arg12[%c0_27, %c0_28] : memref<128x128xf32, #tpu.memory_space<vmem>>, vector<128x128xf32>
      %56 = vector.broadcast %44 : vector<128x1xf32> to vector<128x128xf32>
      %57 = arith.mulf %56, %55 : vector<128x128xf32>
      %cst_29 = arith.constant dense<0.000000e+00> : vector<128x128xf32>
      %58 = tpu.matmul %48, %13, %cst_29 {dimension_numbers = #tpu.dot_dimension_numbers<[1], [0], [0], [1], [0, 0, 1, 1], [], []>} : vector<128x128xf32>, vector<128x128xf32>, vector<128x128xf32> -> vector<128x128xf32>
      %59 = arith.addf %57, %58 : vector<128x128xf32>
      %c0_30 = arith.constant 0 : index
      %c0_31 = arith.constant 0 : index
      %60 = vector.load %arg12[%c0_30, %c0_31] : memref<128x128xf32, #tpu.memory_space<vmem>>, vector<128x128xf32>
      tpu.vector_store %arg12[%c0_30, %c0_31], %59 {strides = array<i32>} : memref<128x128xf32, #tpu.memory_space<vmem>>, vector<128x128xf32>,
      %c0_32 = arith.constant 0 : index
      %c0_33 = arith.constant 0 : index
      %61 = vector.load %arg10[%c0_32, %c0_33] : memref<128x1xf32, #tpu.memory_space<vmem>>, vector<128x1xf32>
      tpu.vector_store %arg10[%c0_32, %c0_33], %42 {strides = array<i32>} : memref<128x1xf32, #tpu.memory_space<vmem>>, vector<128x1xf32>,
    } else {
    }
    %c0_i32_3 = arith.constant 0 : i32
    %9 = arith.cmpi eq, %arg1, %c0_i32_3 : i32
    %10 = arith.extui %9 : i1 to i32
    %c0_i32_4 = arith.constant 0 : i32
    %11 = arith.cmpi ne, %10, %c0_i32_4 : i32
    scf.if %11 {
      %c0 = arith.constant 0 : index
      %c0_5 = arith.constant 0 : index
      %12 = vector.load %arg12[%c0, %c0_5] : memref<128x128xf32, #tpu.memory_space<vmem>>, vector<128x128xf32>
      %c0_6 = arith.constant 0 : index
      %c0_7 = arith.constant 0 : index
      %13 = vector.load %arg11[%c0_6, %c0_7] : memref<128x1xf32, #tpu.memory_space<vmem>>, vector<128x1xf32>
      %14 = tpu.reciprocal %13 {approx = true} : vector<128x1xf32> -> vector<128x1xf32>
      %15 = vector.broadcast %14 : vector<128x1xf32> to vector<128x128xf32>
      %16 = arith.mulf %12, %15 : vector<128x128xf32>
      %c0_8 = arith.constant 0 : index
      %c0_9 = arith.constant 0 : index
      %17 = vector.load %arg8[%c0_8, %c0_9] : memref<1x128xf32, #tpu.memory_space<vmem>>, vector<1x128xf32>
      %18 = vector.broadcast %17 : vector<1x128xf32> to vector<128x128xf32>
      %19 = arith.addf %16, %18 : vector<128x128xf32>
      %c0_10 = arith.constant 0 : index
      %c0_11 = arith.constant 0 : index
      %20 = vector.load %arg9[%c0_10, %c0_11] : memref<128x128xf32, #tpu.memory_space<vmem>>, vector<128x128xf32>
      tpu.vector_store %arg9[%c0_10, %c0_11], %19 {strides = array<i32>} : memref<128x128xf32, #tpu.memory_space<vmem>>, vector<128x128xf32>,
    } else {
    }
    return
  }
  func.func @transform_0(%arg0: i32, %arg1: i32, %arg2: memref<1x1xi32, #tpu.memory_space<smem>>) -> (i32, i32) {
    %c0_i32 = arith.constant 0 : i32
    %c0_i32_0 = arith.constant 0 : i32
    return %arg0, %c0_i32 : i32, i32
  }
  func.func @transform_1(%arg0: i32, %arg1: i32, %arg2: memref<1x1xi32, #tpu.memory_space<smem>>) -> (i32, i32) {
    %c0_i32 = arith.constant 0 : i32
    %c0_i32_0 = arith.constant 0 : i32
    return %arg1, %c0_i32 : i32, i32
  }
  func.func @transform_2(%arg0: i32, %arg1: i32, %arg2: memref<1x1xi32, #tpu.memory_space<smem>>) -> (i32, i32) {
    %c0_i32 = arith.constant 0 : i32
    return %arg0, %arg1 : i32, i32
  }
  func.func @transform_3(%arg0: i32, %arg1: i32, %arg2: memref<1x1xi32, #tpu.memory_space<smem>>) -> (i32, i32) {
    %c0_i32 = arith.constant 0 : i32
    %c0_i32_0 = arith.constant 0 : i32
    %c0_i32_1 = arith.constant 0 : i32
    return %c0_i32, %c0_i32_0 : i32, i32
  }
  func.func @transform_4(%arg0: i32, %arg1: i32, %arg2: memref<1x1xi32, #tpu.memory_space<smem>>) -> (i32, i32) {
    %c0_i32 = arith.constant 0 : i32
    %c0_i32_0 = arith.constant 0 : i32
    %c0_i32_1 = arith.constant 0 : i32
    return %c0_i32, %c0_i32_0 : i32, i32
  }
  func.func @transform_5(%arg0: i32, %arg1: i32, %arg2: memref<1x1xi32, #tpu.memory_space<smem>>) -> (i32, i32) {
    %c0_i32 = arith.constant 0 : i32
    %c0_i32_0 = arith.constant 0 : i32
    %c0_i32_1 = arith.constant 0 : i32
    return %c0_i32, %c0_i32_0 : i32, i32
  }
  func.func @transform_6(%arg0: i32, %arg1: i32, %arg2: memref<1x1xi32, #tpu.memory_space<smem>>) -> (i32, i32) {
    %c0_i32 = arith.constant 0 : i32
    %c0_i32_0 = arith.constant 0 : i32
    return %arg0, %c0_i32 : i32, i32
  }
}

</mosaic_0001>

<bundles_post_ra>
// kernel: ssclattr_forward.14
= control target key start
LH: loop header
LB: loop body
LE: loop exit
PB: predicated region body
PF: predicated region fallthrough
CT: control target
= control target key end

     0   :  { %v195_v0 = vmov 0.0   ;;  %vm196_vm0 = vmmov 0   ;;  %s250_s1 = inlined_call_operand.vmem [shape: bf16[128,128], index: 1, kind: input, shape index: {}]   ;;  %s251_s0 = inlined_call_operand.vmem [shape: f32[8,128], index: 0, kind: input, shape index: {}]   ;;  %s252_s2 = inlined_call_operand.vmem [shape: f32[1,128], index: 2, kind: input, shape index: {}]   ;;  %s253_s3 = inlined_call_operand.vmem [shape: f32[8,128], index: 3, kind: output, shape index: {}]  }
   0x1   :  { %165 = vmatprep.subr.bf16.mxu0 %v195_v0  ;;  %v187_v1 = vld [vmem:[%s250_s1] sm:$0xff]   ;;  %181 = vmatprep.mubr.msk.bf16.mxu0 %vm196_vm0, %v195_v0  ;;  %v188_v2 = vld [vmem:[%s250_s1 + $0x8] sm:$0xff]   ;;  %v189_v3 = vld [vmem:[%s250_s1 + $0x10] sm:$0xff]  }
   0x2   :  { %166 = vmatpush3.bf16.msra.mxu0 %v187_v1  ;;  %v190_v4 = vld [vmem:[%s250_s1 + $0x18] sm:$0xff]   ;;  %v191_v5 = vld [vmem:[%s250_s1 + $0x20] sm:$0xff]   ;;  %v192_v6 = vld [vmem:[%s250_s1 + $0x28] sm:$0xff]  }
   0x3   :  { %167 = vmatprep.subr.bf16.mxu0 %v195_v0  ;;  %v193_v7 = vld [vmem:[%s250_s1 + $0x30] sm:$0xff]   ;;  %v194_v8 = vld [vmem:[%s250_s1 + $0x38] sm:$0xff]   ;;  %v20_v9 = vld [vmem:[%s251_s0] sm:$0xff] }
   0x4   :  { %v37_v10 = vpack.c.bf16 %v20_v9, %v20_v9  ;;  %v155_v11 = vld [vmem:[%s252_s2] ss:$0 sm:$0xff] }
   0x6   :  { %168 = vmatpush3.bf16.msra.mxu0 %v188_v2 }
   0x7   :  { %169 = vmatprep.subr.bf16.mxu0 %v195_v0 }
   0xa   :  { %170 = vmatpush3.bf16.msra.mxu0 %v189_v3 }
   0xb   :  { %171 = vmatprep.subr.bf16.mxu0 %v195_v0 }
   0xe   :  { %172 = vmatpush3.bf16.msra.mxu0 %v190_v4 }
   0xf   :  { %173 = vmatprep.subr.bf16.mxu0 %v195_v0 }
  0x12   :  { %174 = vmatpush3.bf16.msra.mxu0 %v191_v5 }
  0x13   :  { %175 = vmatprep.subr.bf16.mxu0 %v195_v0 }
  0x16   :  { %176 = vmatpush3.bf16.msra.mxu0 %v192_v6 }
  0x17   :  { %177 = vmatprep.subr.bf16.mxu0 %v195_v0 }
  0x1a   :  { %178 = vmatpush3.bf16.msra.mxu0 %v193_v7 }
  0x1b   :  { %179 = vmatprep.subr.bf16.mxu0 %v195_v0 }
  0x1e   :  { %180 = vmatpush3.bf16.msra.mxu0 %v194_v8 }
  0x21   :  { %182 = vmatmul.mubr.bf16.vlgmr.msra.gmra.mrb[0].mxu0 %v37_v10 }
  0xf4   :  { %v121_v12 = vpop.f32.mrb[0].mxu0 }
  0xf5   :  { %v140_v13 = vadd.f32 %v155_v11, %v121_v12  ;;  %v183_v14 = vpop.f32.mrb[1].mxu0 }
  0xf6   :  { %v124_v15 = vpop.f32.mrb[2].mxu0 }
  0xf7   :  { %v141_v16 = vmax.f32 %v140_v13, 0.0  ;;  %v184_v17 = vpop.f32.mrb[3].mxu0 }
  0xf9   :  { %142 = vst [vmem:[%s253_s3] sm:$0xff] %v141_v16 }

// kernel: ssclattr_forward.15
= control target key start
LH: loop header
LB: loop body
LE: loop exit
PB: predicated region body
PF: predicated region fallthrough
CT: control target
= control target key end

     0   :  { %v194_v0 = vmov 0.0   ;;  %vm195_vm0 = vmmov 0   ;;  %s249_s1 = inlined_call_operand.vmem [shape: bf16[128,128], index: 1, kind: input, shape index: {}]   ;;  %s250_s0 = inlined_call_operand.vmem [shape: f32[8,128], index: 0, kind: input, shape index: {}]   ;;  %s251_s2 = inlined_call_operand.vmem [shape: f32[1,128], index: 2, kind: input, shape index: {}]   ;;  %s252_s3 = inlined_call_operand.vmem [shape: f32[8,128], index: 3, kind: output, shape index: {}]  }
   0x1   :  { %164 = vmatprep.subr.bf16.mxu0 %v194_v0  ;;  %v186_v1 = vld [vmem:[%s249_s1] sm:$0xff]   ;;  %180 = vmatprep.mubr.msk.bf16.mxu0 %vm195_vm0, %v194_v0  ;;  %v187_v2 = vld [vmem:[%s249_s1 + $0x8] sm:$0xff]   ;;  %v188_v3 = vld [vmem:[%s249_s1 + $0x10] sm:$0xff]  }
   0x2   :  { %165 = vmatpush3.bf16.msra.mxu0 %v186_v1  ;;  %v189_v4 = vld [vmem:[%s249_s1 + $0x18] sm:$0xff]   ;;  %v190_v5 = vld [vmem:[%s249_s1 + $0x20] sm:$0xff]   ;;  %v191_v6 = vld [vmem:[%s249_s1 + $0x28] sm:$0xff]  }
   0x3   :  { %166 = vmatprep.subr.bf16.mxu0 %v194_v0  ;;  %v192_v7 = vld [vmem:[%s249_s1 + $0x30] sm:$0xff]   ;;  %v193_v8 = vld [vmem:[%s249_s1 + $0x38] sm:$0xff]   ;;  %v20_v9 = vld [vmem:[%s250_s0] sm:$0xff] }
   0x4   :  { %v37_v10 = vpack.c.bf16 %v20_v9, %v20_v9  ;;  %v154_v11 = vld [vmem:[%s251_s2] ss:$0 sm:$0xff] }
   0x6   :  { %167 = vmatpush3.bf16.msra.mxu0 %v187_v2 }
   0x7   :  { %168 = vmatprep.subr.bf16.mxu0 %v194_v0 }
   0xa   :  { %169 = vmatpush3.bf16.msra.mxu0 %v188_v3 }
   0xb   :  { %170 = vmatprep.subr.bf16.mxu0 %v194_v0 }
   0xe   :  { %171 = vmatpush3.bf16.msra.mxu0 %v189_v4 }
   0xf   :  { %172 = vmatprep.subr.bf16.mxu0 %v194_v0 }
  0x12   :  { %173 = vmatpush3.bf16.msra.mxu0 %v190_v5 }
  0x13   :  { %174 = vmatprep.subr.bf16.mxu0 %v194_v0 }
  0x16   :  { %175 = vmatpush3.bf16.msra.mxu0 %v191_v6 }
  0x17   :  { %176 = vmatprep.subr.bf16.mxu0 %v194_v0 }
  0x1a   :  { %177 = vmatpush3.bf16.msra.mxu0 %v192_v7 }
  0x1b   :  { %178 = vmatprep.subr.bf16.mxu0 %v194_v0 }
  0x1e   :  { %179 = vmatpush3.bf16.msra.mxu0 %v193_v8 }
  0x21   :  { %181 = vmatmul.mubr.bf16.vlgmr.msra.gmra.mrb[0].mxu0 %v37_v10 }
  0xf4   :  { %v121_v12 = vpop.f32.mrb[0].mxu0 }
  0xf5   :  { %v140_v13 = vadd.f32 %v154_v11, %v121_v12  ;;  %v182_v14 = vpop.f32.mrb[1].mxu0 }
  0xf6   :  { %v124_v15 = vpop.f32.mrb[2].mxu0 }
  0xf7   :  { %141 = vst [vmem:[%s252_s3] sm:$0xff] %v140_v13  ;;  %v183_v16 = vpop.f32.mrb[3].mxu0 }

// kernel: ssclattr_forward.8
= control target key start
LH: loop header
LB: loop body
LE: loop exit
PB: predicated region body
PF: predicated region fallthrough
CT: control target
= control target key end

     0   :  { %s625_s1 = inlined_call_operand.vmem [shape: f32[128,128], index: 1, kind: input, shape index: {}]   ;;  %s626_s0 = inlined_call_operand.vmem [shape: f32[128,128], index: 0, kind: input, shape index: {}]   ;;  %s627_s2 = inlined_call_operand.vmem [shape: f32[1,128], index: 2, kind: input, shape index: {}]   ;;  %s628_s3 = inlined_call_operand.vmem [shape: f32[128,128], index: 3, kind: output, shape index: {}]  }
   0x1   :  { %v50_v0 = vld [vmem:[%s625_s1] sm:$0xff]  ;;  %v51_v1 = vld [vmem:[%s625_s1 + $0x8] sm:$0xff]  ;;  %v52_v2 = vld [vmem:[%s625_s1 + $0x10] sm:$0xff] }
   0x2   :  { %v410_v3 = vpack.c.bf16 %v51_v1, %v50_v0  ;;  %v53_v4 = vld [vmem:[%s625_s1 + $0x18] sm:$0xff]  ;;  %v54_v6 = vld [vmem:[%s625_s1 + $0x20] sm:$0xff]  ;;  %v55_v7 = vld [vmem:[%s625_s1 + $0x28] sm:$0xff] }
   0x3   :  { %v414_v5 = vpack.c.bf16 %v53_v4, %v52_v2  ;;  %v418_v8 = vpack.c.bf16 %v55_v7, %v54_v6  ;;  %v34_v9 = vld [vmem:[%s626_s0] sm:$0xff]  ;;  %v56_v11 = vld [vmem:[%s625_s1 + $0x30] sm:$0xff]  ;;  %v57_v12 = vld [vmem:[%s625_s1 + $0x38] sm:$0xff] }
   0x4   :  { %411 = vmatprep.subr.bf16.mxu0 %v410_v3  ;;  %442 = vmatprep.subr.bf16.mxu1 %v410_v3  ;;  %v42_v10 = vld [vmem:[%s626_s0 + $0x40] sm:$0xff]  ;;  %v422_v13 = vpack.c.bf16 %v57_v12, %v56_v11  ;;  %v59_v15 = vld [vmem:[%s625_s1 + $0x48] sm:$0xff]  ;;  %v60_v17 = vld [vmem:[%s625_s1 + $0x50] sm:$0xff] }
   0x5   :  { %413 = vmatpush3.bf16.msra.mxu0 %v410_v3  ;;  %450 = vmatpush3.bf16.msra.mxu1 %v410_v3  ;;  %v58_v14 = vld [vmem:[%s625_s1 + $0x40] sm:$0xff]  ;;  %v61_v18 = vld [vmem:[%s625_s1 + $0x58] sm:$0xff]  ;;  %v63_v21 = vld [vmem:[%s625_s1 + $0x68] sm:$0xff] }
   0x6   :  { %415 = vmatprep.subr.bf16.mxu0 %v414_v5  ;;  %443 = vmatprep.subr.bf16.mxu1 %v414_v5  ;;  %v426_v16 = vpack.c.bf16 %v59_v15, %v58_v14  ;;  %v430_v19 = vpack.c.bf16 %v61_v18, %v60_v17  ;;  %v62_v20 = vld [vmem:[%s625_s1 + $0x60] sm:$0xff]  ;;  %v64_v23 = vld [vmem:[%s625_s1 + $0x70] sm:$0xff]  ;;  %v65_v24 = vld [vmem:[%s625_s1 + $0x78] sm:$0xff] }
   0x7   :  { %386 = vmatprep.mubr.f32.mxu0 %v34_v9  ;;  %398 = vmatprep.mubr.f32.mxu1 %v42_v10  ;;  %v434_v22 = vpack.c.bf16 %v63_v21, %v62_v20  ;;  %v438_v25 = vpack.c.bf16 %v65_v24, %v64_v23  ;;  %v35_v26 = vld [vmem:[%s626_s0 + $0x8] sm:$0xff]  ;;  %v36_v28 = vld [vmem:[%s626_s0 + $0x10] sm:$0xff]  ;;  %v37_v30 = vld [vmem:[%s626_s0 + $0x18] sm:$0xff] }
   0x8   :  { %v43_v27 = vld [vmem:[%s626_s0 + $0x48] sm:$0xff]  ;;  %v44_v29 = vld [vmem:[%s626_s0 + $0x50] sm:$0xff]  ;;  %v45_v31 = vld [vmem:[%s626_s0 + $0x58] sm:$0xff] }
   0x9   :  { %417 = vmatpush3.bf16.msra.mxu0 %v414_v5  ;;  %451 = vmatpush3.bf16.msra.mxu1 %v414_v5  ;;  %v38_v32 = vld [vmem:[%s626_s0 + $0x20] sm:$0xff]  ;;  %v39_v34 = vld [vmem:[%s626_s0 + $0x28] sm:$0xff]  ;;  %v40_v36 = vld [vmem:[%s626_s0 + $0x30] sm:$0xff] }
   0xa   :  { %419 = vmatprep.subr.bf16.mxu0 %v418_v8  ;;  %444 = vmatprep.subr.bf16.mxu1 %v418_v8  ;;  %v46_v33 = vld [vmem:[%s626_s0 + $0x60] sm:$0xff]  ;;  %v47_v35 = vld [vmem:[%s626_s0 + $0x68] sm:$0xff]  ;;  %v48_v37 = vld [vmem:[%s626_s0 + $0x70] sm:$0xff] }
   0xb   :  { %v41_v38 = vld [vmem:[%s626_s0 + $0x38] sm:$0xff]  ;;  %v321_v40 = vld [vmem:[%s627_s2] ss:$0 sm:$0xff] }
   0xc   :  { %v49_v39 = vld [vmem:[%s626_s0 + $0x78] sm:$0xff] }
   0xd   :  { %421 = vmatpush3.bf16.msra.mxu0 %v418_v8  ;;  %452 = vmatpush3.bf16.msra.mxu1 %v418_v8 }
   0xe   :  { %423 = vmatprep.subr.bf16.mxu0 %v422_v13  ;;  %445 = vmatprep.subr.bf16.mxu1 %v422_v13 }
  0x11   :  { %425 = vmatpush3.bf16.msra.mxu0 %v422_v13  ;;  %453 = vmatpush3.bf16.msra.mxu1 %v422_v13 }
  0x12   :  { %427 = vmatprep.subr.bf16.mxu0 %v426_v16  ;;  %446 = vmatprep.subr.bf16.mxu1 %v426_v16 }
  0x15   :  { %429 = vmatpush3.bf16.msra.mxu0 %v426_v16  ;;  %454 = vmatpush3.bf16.msra.mxu1 %v426_v16 }
  0x16   :  { %431 = vmatprep.subr.bf16.mxu0 %v430_v19  ;;  %447 = vmatprep.subr.bf16.mxu1 %v430_v19 }
  0x19   :  { %433 = vmatpush3.bf16.msra.mxu0 %v430_v19  ;;  %455 = vmatpush3.bf16.msra.mxu1 %v430_v19 }
  0x1a   :  { %435 = vmatprep.subr.bf16.mxu0 %v434_v22  ;;  %448 = vmatprep.subr.bf16.mxu1 %v434_v22 }
  0x1d   :  { %437 = vmatpush3.bf16.msra.mxu0 %v434_v22  ;;  %456 = vmatpush3.bf16.msra.mxu1 %v434_v22 }
  0x1e   :  { %439 = vmatprep.subr.bf16.mxu0 %v438_v25  ;;  %449 = vmatprep.subr.bf16.mxu1 %v438_v25 }
  0x21   :  { %441 = vmatpush3.bf16.msra.mxu0 %v438_v25  ;;  %457 = vmatpush3.bf16.msra.mxu1 %v438_v25 }
  0x24   :  { %387 = vmatmul.mubr.f32.vlgmr.msra.gmra.mrb[0].mxu0 %v35_v26  ;;  %399 = vmatmul.mubr.f32.vlgmr.msra.gmra.mrb[0].mxu1 %v43_v27 }
  0x25   :  { %389 = vmatprep.mubr.f32.mxu0 %v36_v28  ;;  %401 = vmatprep.mubr.f32.mxu1 %v44_v29 }
  0x28   :  { %390 = vmatmul.mubr.f32.gmra.mrb[2].mxu0 %v37_v30  ;;  %402 = vmatmul.mubr.f32.gmra.mrb[2].mxu1 %v45_v31 }
  0x29   :  { %392 = vmatprep.mubr.f32.mxu0 %v38_v32  ;;  %404 = vmatprep.mubr.f32.mxu1 %v46_v33 }
  0x2c   :  { %393 = vmatmul.mubr.f32.gmra.mrb[4].mxu0 %v39_v34  ;;  %405 = vmatmul.mubr.f32.gmra.mrb[4].mxu1 %v47_v35 }
  0x2d   :  { %395 = vmatprep.mubr.f32.mxu0 %v40_v36  ;;  %407 = vmatprep.mubr.f32.mxu1 %v48_v37 }
  0x30   :  { %396 = vmatmul.mubr.f32.gmra.mrb[6].mxu0 %v41_v38  ;;  %408 = vmatmul.mubr.f32.gmra.mrb[6].mxu1 %v49_v39 }
  0xf7   :  { %v388_v41 = vpop.f32.mrb[0].mxu0  ;;  %v400_v42 = vpop.f32.mrb[0].mxu1 }
  0xf8   :  { %v286_v43 = vadd.f32 %v388_v41, %v321_v40  ;;  %v294_v44 = vadd.f32 %v400_v42, %v321_v40  ;;  %v148_v45 = vpop.f32.mrb[1].mxu0  ;;  %v188_v46 = vpop.f32.mrb[1].mxu1 }
  0xf9   :  { %v285_v47 = vadd.f32 %v321_v40, %v148_v45  ;;  %v293_v48 = vadd.f32 %v321_v40, %v188_v46 }
  0xfa   :  { %302 = vst [vmem:[%s628_s3 + $0x8] sm:$0xff] %v286_v43  ;;  %310 = vst [vmem:[%s628_s3 + $0x48] sm:$0xff] %v294_v44 }
  0xfb   :  { %301 = vst [vmem:[%s628_s3] sm:$0xff] %v285_v47  ;;  %309 = vst [vmem:[%s628_s3 + $0x40] sm:$0xff] %v293_v48  ;;  %v391_v49 = vpop.f32.mrb[2].mxu0  ;;  %v403_v50 = vpop.f32.mrb[2].mxu1 }
  0xfc   :  { %v288_v51 = vadd.f32 %v391_v49, %v321_v40  ;;  %v296_v52 = vadd.f32 %v403_v50, %v321_v40  ;;  %v158_v53 = vpop.f32.mrb[3].mxu0  ;;  %v198_v54 = vpop.f32.mrb[3].mxu1 }
  0xfd   :  { %v287_v55 = vadd.f32 %v321_v40, %v158_v53  ;;  %v295_v56 = vadd.f32 %v321_v40, %v198_v54 }
  0xfe   :  { %304 = vst [vmem:[%s628_s3 + $0x18] sm:$0xff] %v288_v51  ;;  %312 = vst [vmem:[%s628_s3 + $0x58] sm:$0xff] %v296_v52 }
  0xff   :  { %303 = vst [vmem:[%s628_s3 + $0x10] sm:$0xff] %v287_v55  ;;  %311 = vst [vmem:[%s628_s3 + $0x50] sm:$0xff] %v295_v56  ;;  %v394_v57 = vpop.f32.mrb[4].mxu0  ;;  %v406_v58 = vpop.f32.mrb[4].mxu1 }
 0x100   :  { %v290_v59 = vadd.f32 %v394_v57, %v321_v40  ;;  %v298_v60 = vadd.f32 %v406_v58, %v321_v40  ;;  %v168_v61 = vpop.f32.mrb[5].mxu0  ;;  %v208_v62 = vpop.f32.mrb[5].mxu1 }
 0x101   :  { %v289_v63 = vadd.f32 %v321_v40, %v168_v61  ;;  %v297_v0 = vadd.f32 %v321_v40, %v208_v62 }
 0x102   :  { %306 = vst [vmem:[%s628_s3 + $0x28] sm:$0xff] %v290_v59  ;;  %314 = vst [vmem:[%s628_s3 + $0x68] sm:$0xff] %v298_v60 }
 0x103   :  { %305 = vst [vmem:[%s628_s3 + $0x20] sm:$0xff] %v289_v63  ;;  %313 = vst [vmem:[%s628_s3 + $0x60] sm:$0xff] %v297_v0  ;;  %v397_v1 = vpop.f32.mrb[6].mxu0  ;;  %v409_v2 = vpop.f32.mrb[6].mxu1 }
 0x104   :  { %v292_v3 = vadd.f32 %v397_v1, %v321_v40  ;;  %v300_v4 = vadd.f32 %v409_v2, %v321_v40  ;;  %v178_v5 = vpop.f32.mrb[7].mxu0  ;;  %v218_v6 = vpop.f32.mrb[7].mxu1 }
 0x105   :  { %v291_v7 = vadd.f32 %v321_v40, %v178_v5  ;;  %v299_v8 = vadd.f32 %v321_v40, %v218_v6 }
 0x106   :  { %308 = vst [vmem:[%s628_s3 + $0x38] sm:$0xff] %v292_v3  ;;  %316 = vst [vmem:[%s628_s3 + $0x78] sm:$0xff] %v300_v4 }
 0x107   :  { %307 = vst [vmem:[%s628_s3 + $0x30] sm:$0xff] %v291_v7  ;;  %315 = vst [vmem:[%s628_s3 + $0x70] sm:$0xff] %v299_v8 }

// kernel: ssclattr_forward.13
= control target key start
LH: loop header
LB: loop body
LE: loop exit
PB: predicated region body
PF: predicated region fallthrough
CT: control target
= control target key end

     0   :  { %v206_v0 = vmov 0.0|0.0   ;;  %vm207_vm0 = vmmov 0   ;;  %v208_v4 = vmov 0.0   ;;  %s286_s1 = inlined_call_operand.vmem [shape: f32[128,128], index: 1, kind: input, shape index: {}]   ;;  %s287_s0 = inlined_call_operand.vmem [shape: f32[8,128], index: 0, kind: input, shape index: {}]   ;;  %s288_s2 = inlined_call_operand.vmem [shape: f32[1,128], index: 2, kind: input, shape index: {}]   ;;  %s289_s3 = inlined_call_operand.vmem [shape: f32[8,128], index: 3, kind: output, shape index: {}]  }
   0x1   :  { %179 = vmatprep.subr.bf16.mxu0 %v206_v0  ;;  %v20_v1 = vld [vmem:[%s286_s1] sm:$0xff]  ;;  %v21_v2 = vld [vmem:[%s286_s1 + $0x8] sm:$0xff]  ;;  %v22_v3 = vld [vmem:[%s286_s1 + $0x10] sm:$0xff]  ;;  %176 = vmatprep.mubr.msk.f32.mxu0 %vm207_vm0, %v208_v4 }
   0x2   :  { %v180_v5 = vpack.c.bf16 %v21_v2, %v20_v1  ;;  %v23_v6 = vld [vmem:[%s286_s1 + $0x18] sm:$0xff]  ;;  %v24_v8 = vld [vmem:[%s286_s1 + $0x20] sm:$0xff]  ;;  %v25_v9 = vld [vmem:[%s286_s1 + $0x28] sm:$0xff] }
   0x3   :  { %v183_v7 = vpack.c.bf16 %v23_v6, %v22_v3  ;;  %v186_v10 = vpack.c.bf16 %v25_v9, %v24_v8  ;;  %v26_v11 = vld [vmem:[%s286_s1 + $0x30] sm:$0xff]  ;;  %v27_v12 = vld [vmem:[%s286_s1 + $0x38] sm:$0xff]  ;;  %v28_v14 = vld [vmem:[%s286_s1 + $0x40] sm:$0xff] }
   0x4   :  { %181 = vmatpush3.bf16.msra.mxu0 %v180_v5  ;;  %v189_v13 = vpack.c.bf16 %v27_v12, %v26_v11  ;;  %v29_v15 = vld [vmem:[%s286_s1 + $0x48] sm:$0xff]  ;;  %v30_v17 = vld [vmem:[%s286_s1 + $0x50] sm:$0xff]  ;;  %v31_v18 = vld [vmem:[%s286_s1 + $0x58] sm:$0xff] }
   0x5   :  { %182 = vmatprep.subr.bf16.mxu0 %v206_v0  ;;  %v192_v16 = vpack.c.bf16 %v29_v15, %v28_v14  ;;  %v195_v19 = vpack.c.bf16 %v31_v18, %v30_v17  ;;  %v32_v20 = vld [vmem:[%s286_s1 + $0x60] sm:$0xff]  ;;  %v33_v21 = vld [vmem:[%s286_s1 + $0x68] sm:$0xff]  ;;  %v34_v23 = vld [vmem:[%s286_s1 + $0x70] sm:$0xff] }
   0x6   :  { %v198_v22 = vpack.c.bf16 %v33_v21, %v32_v20  ;;  %v35_v24 = vld [vmem:[%s286_s1 + $0x78] sm:$0xff]  ;;  %v19_v26 = vld [vmem:[%s287_s0] sm:$0xff] }
   0x7   :  { %v201_v25 = vpack.c.bf16 %v35_v24, %v34_v23  ;;  %v126_v27 = vld [vmem:[%s288_s2] ss:$0 sm:$0xff] }
   0x8   :  { %184 = vmatpush3.bf16.msra.mxu0 %v183_v7 }
   0x9   :  { %185 = vmatprep.subr.bf16.mxu0 %v206_v0 }
   0xc   :  { %187 = vmatpush3.bf16.msra.mxu0 %v186_v10 }
   0xd   :  { %188 = vmatprep.subr.bf16.mxu0 %v206_v0 }
  0x10   :  { %190 = vmatpush3.bf16.msra.mxu0 %v189_v13 }
  0x11   :  { %191 = vmatprep.subr.bf16.mxu0 %v206_v0 }
  0x14   :  { %193 = vmatpush3.bf16.msra.mxu0 %v192_v16 }
  0x15   :  { %194 = vmatprep.subr.bf16.mxu0 %v206_v0 }
  0x18   :  { %196 = vmatpush3.bf16.msra.mxu0 %v195_v19 }
  0x19   :  { %197 = vmatprep.subr.bf16.mxu0 %v206_v0 }
  0x1c   :  { %199 = vmatpush3.bf16.msra.mxu0 %v198_v22 }
  0x1d   :  { %200 = vmatprep.subr.bf16.mxu0 %v206_v0 }
  0x20   :  { %202 = vmatpush3.bf16.msra.mxu0 %v201_v25 }
  0x23   :  { %177 = vmatmul.mubr.f32.vlgmr.msra.gmra.mrb[0].mxu0 %v19_v26 }
  0xf6   :  { %v103_v28 = vpop.f32.mrb[0].mxu0 }
  0xf7   :  { %v120_v29 = vadd.f32 %v126_v27, %v103_v28  ;;  %v178_v30 = vpop.f32.mrb[1].mxu0 }
  0xf9   :  { %121 = vst [vmem:[%s289_s3] sm:$0xff] %v120_v29 }

// kernel: ssclattr_forward.9
= control target key start
LH: loop header
LB: loop body
LE: loop exit
PB: predicated region body
PF: predicated region fallthrough
CT: control target
= control target key end

     0   :  { %vm29_vm0 = vcmask 7168   ;;  %v1539_v0 = vmov -1e+30   ;;  %v1540_v1 = vmov 0.0   ;;  %s2265_s0 = inlined_call_operand.<no memory space> [shape: s32[1,1], index: 0, kind: input, shape index: {}]   ;;  %s2266_s1 = inlined_call_operand.vmem [shape: f32[128,128], index: 1, kind: input, shape index: {}, may-alias: {1,2}]   ;;  %s2267_s2 = inlined_call_operand.vmem [shape: f32[128,128], index: 2, kind: input, shape index: {}, may-alias: {1,2}]   ;;  %s2268_s3 = inlined_call_operand.vmem [shape: bf16[128,128], index: 3, kind: input, shape index: {}]   ;;  %s2269_s4 = inlined_call_operand.vmem [shape: f32[1,128], index: 4, kind: input, shape index: {}]   ;;  %s2270_s5 = inlined_call_operand.vmem [shape: f32[1,128], index: 5, kind: input, shape index: {}]   ;;  %s2271_s6 = inlined_call_operand.vmem [shape: f32[1,128], index: 6, kind: input, shape index: {}]   ;;  %s2272_s7 = inlined_call_operand.vmem [shape: f32[128,128], index: 7, kind: output, shape index: {}]  }
   0x1   :  { %30 = vst.msk [vmem:[#allocation2] sm:$0xff] %vm29_vm0, %v1539_v0  ;;  %31 = vst.msk [vmem:[#allocation2 + $0x8] sm:$0xff] %vm29_vm0, %v1539_v0  ;;  %p1256_p0 = scmp.le.s32.totalorder %s2265_s0, 0 }
   0x2   :  { %32 = vst.msk [vmem:[#allocation2 + $0x10] sm:$0xff] %vm29_vm0, %v1539_v0  ;;  %33 = vst.msk [vmem:[#allocation2 + $0x18] sm:$0xff] %vm29_vm0, %v1539_v0  ;;  %v102_v2 = vld [vmem:[%s2267_s2] sm:$0xff] (!%p1256_p0)  ;;  %v103_v3 = vld [vmem:[%s2267_s2 + $0x8] sm:$0xff] (!%p1256_p0) }
   0x3   :  { %34 = vst.msk [vmem:[#allocation2 + $0x20] sm:$0xff] %vm29_vm0, %v1539_v0  ;;  %35 = vst.msk [vmem:[#allocation2 + $0x28] sm:$0xff] %vm29_vm0, %v1539_v0  ;;  %v1627_v4 = vld [vmem:[%s2269_s4] ss:$0 sm:$0xff] (!%p1256_p0)  ;;  %v1387_v6 = vpack.c.bf16 (!%p1256_p0), %v103_v3, %v102_v2  ;;  %v104_v7 = vld [vmem:[%s2267_s2 + $0x10] sm:$0xff] (!%p1256_p0) }
   0x4   :  { %36 = vst.msk [vmem:[#allocation2 + $0x30] sm:$0xff] %vm29_vm0, %v1539_v0  ;;  %37 = vst.msk [vmem:[#allocation2 + $0x38] sm:$0xff] %vm29_vm0, %v1539_v0  ;;  %v212_v5 = vmul.f32 (!%p1256_p0), %v1627_v4, %v102_v2  ;;  %v105_v8 = vld [vmem:[%s2267_s2 + $0x18] sm:$0xff] (!%p1256_p0)  ;;  %v214_v9 = vmul.f32 (!%p1256_p0), %v1627_v4, %v104_v7  ;;  %v213_v10 = vmul.f32 (!%p1256_p0), %v1627_v4, %v103_v3  ;;  %v106_v12 = vld [vmem:[%s2267_s2 + $0x20] sm:$0xff] (!%p1256_p0) }
   0x5   :  { %38 = vst.msk [vmem:[#allocation2 + $0x40] sm:$0xff] %vm29_vm0, %v1539_v0  ;;  %39 = vst.msk [vmem:[#allocation2 + $0x48] sm:$0xff] %vm29_vm0, %v1539_v0  ;;  %v215_v11 = vmul.f32 (!%p1256_p0), %v1627_v4, %v105_v8  ;;  %v1391_v13 = vpack.c.bf16 (!%p1256_p0), %v105_v8, %v104_v7  ;;  %v107_v14 = vld [vmem:[%s2267_s2 + $0x28] sm:$0xff] (!%p1256_p0)  ;;  %1388 = vmatprep.subr.bf16.mxu0 (!%p1256_p0), %v1387_v6  ;;  %v216_v15 = vmul.f32 (!%p1256_p0), %v1627_v4, %v106_v12  ;;  %v108_v18 = vld [vmem:[%s2267_s2 + $0x30] sm:$0xff] (!%p1256_p0) }
   0x6   :  { %40 = vst.msk [vmem:[#allocation2 + $0x50] sm:$0xff] %vm29_vm0, %v1539_v0  ;;  %41 = vst.msk [vmem:[#allocation2 + $0x58] sm:$0xff] %vm29_vm0, %v1539_v0  ;;  %228 = vadd.xlane.f32.xlu0 (!%p1256_p0), %v212_v5  ;;  %232 = vadd.xlane.f32.xlu1 (!%p1256_p0), %v214_v9  ;;  %v1395_v16 = vpack.c.bf16 (!%p1256_p0), %v107_v14, %v106_v12  ;;  %v217_v17 = vmul.f32 (!%p1256_p0), %v1627_v4, %v107_v14  ;;  %v109_v19 = vld [vmem:[%s2267_s2 + $0x38] sm:$0xff] (!%p1256_p0)  ;;  %v110_v23 = vld [vmem:[%s2267_s2 + $0x40] sm:$0xff] (!%p1256_p0) }
   0x7   :  { %42 = vst.msk [vmem:[#allocation2 + $0x60] sm:$0xff] %vm29_vm0, %v1539_v0  ;;  %43 = vst.msk [vmem:[#allocation2 + $0x68] sm:$0xff] %vm29_vm0, %v1539_v0  ;;  %1390 = vmatpush3.bf16.msra.mxu0 (!%p1256_p0), %v1387_v6  ;;  %1419 = vmatprep.subr.bf16.mxu1 (!%p1256_p0), %v1387_v6  ;;  %v218_v20 = vmul.f32 (!%p1256_p0), %v1627_v4, %v108_v18  ;;  %v1399_v21 = vpack.c.bf16 (!%p1256_p0), %v109_v19, %v108_v18  ;;  %v111_v24 = vld [vmem:[%s2267_s2 + $0x48] sm:$0xff] (!%p1256_p0)  ;;  %v112_v28 = vld [vmem:[%s2267_s2 + $0x50] sm:$0xff] (!%p1256_p0) }
   0x8   :  { %44 = vst.msk [vmem:[#allocation2 + $0x70] sm:$0xff] %vm29_vm0, %v1539_v0  ;;  %45 = vst.msk [vmem:[#allocation2 + $0x78] sm:$0xff] %vm29_vm0, %v1539_v0  ;;  %1392 = vmatprep.subr.bf16.mxu0 (!%p1256_p0), %v1391_v13  ;;  %1427 = vmatpush3.bf16.msra.mxu1 (!%p1256_p0), %v1387_v6  ;;  %v219_v22 = vmul.f32 (!%p1256_p0), %v1627_v4, %v109_v19  ;;  %v220_v25 = vmul.f32 (!%p1256_p0), %v1627_v4, %v110_v23  ;;  %v113_v29 = vld [vmem:[%s2267_s2 + $0x58] sm:$0xff] (!%p1256_p0)  ;;  %v114_v33 = vld [vmem:[%s2267_s2 + $0x60] sm:$0xff] (!%p1256_p0) }
   0x9   :  { %46 = vst.msk [vmem:[#allocation3] sm:$0xff] %vm29_vm0, %v1540_v1  ;;  %47 = vst.msk [vmem:[#allocation3 + $0x8] sm:$0xff] %vm29_vm0, %v1540_v1  ;;  %1420 = vmatprep.subr.bf16.mxu1 (!%p1256_p0), %v1391_v13  ;;  %v1403_v26 = vpack.c.bf16 (!%p1256_p0), %v111_v24, %v110_v23  ;;  %v221_v27 = vmul.f32 (!%p1256_p0), %v1627_v4, %v111_v24  ;;  %v222_v30 = vmul.f32 (!%p1256_p0), %v1627_v4, %v112_v28  ;;  %v115_v34 = vld [vmem:[%s2267_s2 + $0x68] sm:$0xff] (!%p1256_p0)  ;;  %v116_v38 = vld [vmem:[%s2267_s2 + $0x70] sm:$0xff] (!%p1256_p0) }
   0xa   :  { %48 = vst.msk [vmem:[#allocation3 + $0x10] sm:$0xff] %vm29_vm0, %v1540_v1  ;;  %49 = vst.msk [vmem:[#allocation3 + $0x18] sm:$0xff] %vm29_vm0, %v1540_v1  ;;  %230 = vadd.xlane.f32.xlu0 (!%p1256_p0), %v213_v10  ;;  %234 = vadd.xlane.f32.xlu1 (!%p1256_p0), %v215_v11  ;;  %v1407_v31 = vpack.c.bf16 (!%p1256_p0), %v113_v29, %v112_v28  ;;  %v223_v32 = vmul.f32 (!%p1256_p0), %v1627_v4, %v113_v29  ;;  %v117_v39 = vld [vmem:[%s2267_s2 + $0x78] sm:$0xff] (!%p1256_p0)  ;;  %v86_v43 = vld [vmem:[%s2266_s1] sm:$0xff] (!%p1256_p0) }
   0xb   :  { %50 = vst.msk [vmem:[#allocation3 + $0x20] sm:$0xff] %vm29_vm0, %v1540_v1  ;;  %51 = vst.msk [vmem:[#allocation3 + $0x28] sm:$0xff] %vm29_vm0, %v1540_v1  ;;  %1394 = vmatpush3.bf16.msra.mxu0 (!%p1256_p0), %v1391_v13  ;;  %v224_v35 = vmul.f32 (!%p1256_p0), %v1627_v4, %v114_v33  ;;  %v1411_v36 = vpack.c.bf16 (!%p1256_p0), %v115_v34, %v114_v33  ;;  %v225_v37 = vmul.f32 (!%p1256_p0), %v1627_v4, %v115_v34  ;;  %v1257_v44 = vld [vmem:[%s2270_s5] ss:$0 sm:$0xff] (!%p1256_p0)  ;;  %v87_v47 = vld [vmem:[%s2266_s1 + $0x8] sm:$0xff] (!%p1256_p0)  ;;  %v292_v34 = vlaneseq (!%p1256_p0) }
   0xc   :  { %52 = vst.msk [vmem:[#allocation3 + $0x30] sm:$0xff] %vm29_vm0, %v1540_v1  ;;  %53 = vst.msk [vmem:[#allocation3 + $0x38] sm:$0xff] %vm29_vm0, %v1540_v1  ;;  %1396 = vmatprep.subr.bf16.mxu0 (!%p1256_p0), %v1395_v16  ;;  %1428 = vmatpush3.bf16.msra.mxu1 (!%p1256_p0), %v1391_v13  ;;  %v226_v40 = vmul.f32 (!%p1256_p0), %v1627_v4, %v116_v38  ;;  %v1415_v41 = vpack.c.bf16 (!%p1256_p0), %v117_v39, %v116_v38  ;;  %v94_v45 = vld [vmem:[%s2266_s1 + $0x40] sm:$0xff] (!%p1256_p0)  ;;  %v95_v49 = vld [vmem:[%s2266_s1 + $0x48] sm:$0xff] (!%p1256_p0) }
   0xd   :  { %54 = vst.msk [vmem:[#allocation3 + $0x40] sm:$0xff] %vm29_vm0, %v1540_v1  ;;  %55 = vst.msk [vmem:[#allocation3 + $0x48] sm:$0xff] %vm29_vm0, %v1540_v1  ;;  %1421 = vmatprep.subr.bf16.mxu1 (!%p1256_p0), %v1395_v16  ;;  %v227_v42 = vmul.f32 (!%p1256_p0), %v1627_v4, %v117_v39  ;;  %v157_v46 = vmul.f32 (!%p1256_p0), %v1257_v44, %v86_v43  ;;  %v165_v48 = vmul.f32 (!%p1256_p0), %v1257_v44, %v94_v45  ;;  %v88_v51 = vld [vmem:[%s2266_s1 + $0x10] sm:$0xff] (!%p1256_p0)  ;;  %v89_v55 = vld [vmem:[%s2266_s1 + $0x18] sm:$0xff] (!%p1256_p0) }
   0xe   :  { %56 = vst.msk [vmem:[#allocation3 + $0x50] sm:$0xff] %vm29_vm0, %v1540_v1  ;;  %57 = vst.msk [vmem:[#allocation3 + $0x58] sm:$0xff] %vm29_vm0, %v1540_v1  ;;  %236 = vadd.xlane.f32.xlu0 (!%p1256_p0), %v216_v15  ;;  %238 = vadd.xlane.f32.xlu1 (!%p1256_p0), %v217_v17  ;;  %v158_v50 = vmul.f32 (!%p1256_p0), %v1257_v44, %v87_v47  ;;  %v166_v52 = vmul.f32 (!%p1256_p0), %v1257_v44, %v95_v49  ;;  %v96_v53 = vld [vmem:[%s2266_s1 + $0x50] sm:$0xff] (!%p1256_p0)  ;;  %v97_v57 = vld [vmem:[%s2266_s1 + $0x58] sm:$0xff] (!%p1256_p0) }
   0xf   :  { %58 = vst.msk [vmem:[#allocation3 + $0x60] sm:$0xff] %vm29_vm0, %v1540_v1  ;;  %59 = vst.msk [vmem:[#allocation3 + $0x68] sm:$0xff] %vm29_vm0, %v1540_v1  ;;  %1398 = vmatpush3.bf16.msra.mxu0 (!%p1256_p0), %v1395_v16  ;;  %v159_v54 = vmul.f32 (!%p1256_p0), %v1257_v44, %v88_v51  ;;  %v167_v56 = vmul.f32 (!%p1256_p0), %v1257_v44, %v96_v53  ;;  %v160_v58 = vmul.f32 (!%p1256_p0), %v1257_v44, %v89_v55  ;;  %v90_v59 = vld [vmem:[%s2266_s1 + $0x20] sm:$0xff] (!%p1256_p0)  ;;  %v91_v63 = vld [vmem:[%s2266_s1 + $0x28] sm:$0xff] (!%p1256_p0) }
  0x10   :  { %60 = vst.msk [vmem:[#allocation3 + $0x70] sm:$0xff] %vm29_vm0, %v1540_v1  ;;  %61 = vst.msk [vmem:[#allocation3 + $0x78] sm:$0xff] %vm29_vm0, %v1540_v1  ;;  %1400 = vmatprep.subr.bf16.mxu0 (!%p1256_p0), %v1399_v21  ;;  %1429 = vmatpush3.bf16.msra.mxu1 (!%p1256_p0), %v1395_v16  ;;  %v168_v60 = vmul.f32 (!%p1256_p0), %v1257_v44, %v97_v57  ;;  %v98_v61 = vld [vmem:[%s2266_s1 + $0x60] sm:$0xff] (!%p1256_p0)  ;;  %v161_v62 = vmul.f32 (!%p1256_p0), %v1257_v44, %v90_v59  ;;  %v92_v3 = vld [vmem:[%s2266_s1 + $0x30] sm:$0xff] (!%p1256_p0) }
  0x11   :  { %62 = vst [vmem:[#allocation4] sm:$0xff] %v1540_v1  ;;  %63 = vst [vmem:[#allocation4 + $0x8] sm:$0xff] %v1540_v1  ;;  %1422 = vmatprep.subr.bf16.mxu1 (!%p1256_p0), %v1399_v21  ;;  %v169_v0 = vmul.f32 (!%p1256_p0), %v1257_v44, %v98_v61  ;;  %v162_v2 = vmul.f32 (!%p1256_p0), %v1257_v44, %v91_v63  ;;  %v100_v5 = vld [vmem:[%s2266_s1 + $0x70] sm:$0xff] (!%p1256_p0)  ;;  %v163_v6 = vmul.f32 (!%p1256_p0), %v1257_v44, %v92_v3  ;;  %v93_v7 = vld [vmem:[%s2266_s1 + $0x38] sm:$0xff] (!%p1256_p0) }
  0x12   :  { %64 = vst [vmem:[#allocation4 + $0x10] sm:$0xff] %v1540_v1  ;;  %65 = vst [vmem:[#allocation4 + $0x18] sm:$0xff] %v1540_v1  ;;  %85 = sbr.rel (%p1256_p0) target bundleno = 851 (0x353), region = 33  ;;  %240 = vadd.xlane.f32.xlu0 (!%p1256_p0), %v218_v20  ;;  %242 = vadd.xlane.f32.xlu1 (!%p1256_p0), %v219_v22  ;;  %v171_v8 = vmul.f32 (!%p1256_p0), %v1257_v44, %v100_v5  ;;  %v101_v9 = vld [vmem:[%s2266_s1 + $0x78] sm:$0xff] (!%p1256_p0)  ;;  %v164_v10 = vmul.f32 (!%p1256_p0), %v1257_v44, %v93_v7  ;;  %v1749_v39 = vld [vmem:[%s2268_s3] sm:$0xff] (!%p1256_p0)  }
  0x13   :  { %66 = vst [vmem:[#allocation4 + $0x20] sm:$0xff] %v1540_v1  ;;  %67 = vst [vmem:[#allocation4 + $0x28] sm:$0xff] %v1540_v1  ;;  %1402 = vmatpush3.bf16.msra.mxu0 (!%p1256_p0), %v1399_v21  ;;  %v172_v11 = vmul.f32 (!%p1256_p0), %v1257_v44, %v101_v9  ;;  %v1757_v43 = vld [vmem:[%s2268_s3 + $0x20] sm:$0xff] (!%p1256_p0)   ;;  %v1793_v5 = vld [vmem:[%s2268_s3 + $0x28] sm:$0xff] (!%p1256_p0)  }
  0x14   :  { %68 = vst [vmem:[#allocation4 + $0x30] sm:$0xff] %v1540_v1  ;;  %69 = vst [vmem:[#allocation4 + $0x38] sm:$0xff] %v1540_v1  ;;  %1404 = vmatprep.subr.bf16.mxu0 (!%p1256_p0), %v1403_v26  ;;  %1430 = vmatpush3.bf16.msra.mxu1 (!%p1256_p0), %v1399_v21  ;;  %v1278_v47 = vunpack.c.l.bf16 (!%p1256_p0), %v1757_v43  ;;  %v1279_v59 = vunpack.c.h.bf16 (!%p1256_p0), %v1757_v43 }
  0x15   :  { %70 = vst [vmem:[#allocation4 + $0x40] sm:$0xff] %v1540_v1  ;;  %71 = vst [vmem:[#allocation4 + $0x48] sm:$0xff] %v1540_v1  ;;  %1423 = vmatprep.subr.bf16.mxu1 (!%p1256_p0), %v1403_v26 }
  0x16   :  { %72 = vst [vmem:[#allocation4 + $0x50] sm:$0xff] %v1540_v1  ;;  %73 = vst [vmem:[#allocation4 + $0x58] sm:$0xff] %v1540_v1  ;;  %244 = vadd.xlane.f32.xlu0 (!%p1256_p0), %v220_v25  ;;  %246 = vadd.xlane.f32.xlu1 (!%p1256_p0), %v221_v27  ;;  %vm368_vm4 = vcmp.gt.f32.partialorder (!%p1256_p0), %v1278_v47, 0.0  ;;  %vm369_vm8 = vcmp.gt.f32.partialorder (!%p1256_p0), %v1279_v59, 0.0 }
  0x17   :  { %74 = vst [vmem:[#allocation4 + $0x60] sm:$0xff] %v1540_v1  ;;  %75 = vst [vmem:[#allocation4 + $0x68] sm:$0xff] %v1540_v1  ;;  %1406 = vmatpush3.bf16.msra.mxu0 (!%p1256_p0), %v1403_v26 }
  0x18   :  { %76 = vst [vmem:[#allocation4 + $0x70] sm:$0xff] %v1540_v1  ;;  %77 = vst [vmem:[#allocation4 + $0x78] sm:$0xff] %v1540_v1  ;;  %1408 = vmatprep.subr.bf16.mxu0 (!%p1256_p0), %v1407_v31  ;;  %1431 = vmatpush3.bf16.msra.mxu1 (!%p1256_p0), %v1403_v26  ;;  %v99_v1 = vld [vmem:[%s2266_s1 + $0x68] sm:$0xff] (!%p1256_p0) }
  0x19   :  { %1424 = vmatprep.subr.bf16.mxu1 %v1407_v31  ;;  %v170_v4 = vmul.f32 %v1257_v44, %v99_v1 }
  0x1a   :  { %248 = vadd.xlane.f32.xlu0 %v222_v30  ;;  %250 = vadd.xlane.f32.xlu1 %v223_v32 }
  0x1b   :  { %1410 = vmatpush3.bf16.msra.mxu0 %v1407_v31 }
  0x1c   :  { %1412 = vmatprep.subr.bf16.mxu0 %v1411_v36  ;;  %1432 = vmatpush3.bf16.msra.mxu1 %v1407_v31 }
  0x1d   :  { %1425 = vmatprep.subr.bf16.mxu1 %v1411_v36 }
  0x1e   :  { %252 = vadd.xlane.f32.xlu0 %v224_v35  ;;  %254 = vadd.xlane.f32.xlu1 %v225_v37 }
  0x1f   :  { %1414 = vmatpush3.bf16.msra.mxu0 %v1411_v36 }
  0x20   :  { %1416 = vmatprep.subr.bf16.mxu0 %v1415_v41  ;;  %1433 = vmatpush3.bf16.msra.mxu1 %v1411_v36  ;;  %v293_v36 = vshrl.u32 %v292_v34, 7 }
  0x21   :  { %1426 = vmatprep.subr.bf16.mxu1 %v1415_v41 }
  0x22   :  { %256 = vadd.xlane.f32.xlu0 %v226_v40  ;;  %258 = vadd.xlane.f32.xlu1 %v227_v42  ;;  %v294_v38 = vsub.s32 0, %v293_v36  ;;  %v1262_v42 = vunpack.c.l.bf16 %v1749_v39 }
  0x23   :  { %1418 = vmatpush3.bf16.msra.mxu0 %v1415_v41 }
  0x24   :  { %1434 = vmatpush3.bf16.msra.mxu1 %v1415_v41  ;;  %vm360_vm2 = vcmp.gt.f32.partialorder %v1262_v42, 0.0 }
  0x26   :  { %173 = vadd.xlane.f32.xlu0 %v157_v46  ;;  %189 = vadd.xlane.f32.xlu1 %v165_v48 }
  0x2a   :  { %175 = vadd.xlane.f32.xlu0 %v158_v50  ;;  %191 = vadd.xlane.f32.xlu1 %v166_v52 }
  0x2e   :  { %177 = vadd.xlane.f32.xlu0 %v159_v54  ;;  %193 = vadd.xlane.f32.xlu1 %v167_v56  ;;  %v1263_v54 = vunpack.c.h.bf16 %v1749_v39 }
  0x30   :  { %vm361_vm6 = vcmp.gt.f32.partialorder %v1263_v54, 0.0 }
  0x32   :  { %179 = vadd.xlane.f32.xlu0 %v160_v58  ;;  %195 = vadd.xlane.f32.xlu1 %v168_v60 }
  0x36   :  { %181 = vadd.xlane.f32.xlu0 %v161_v62  ;;  %197 = vadd.xlane.f32.xlu1 %v169_v0  ;;  %v1781_v62 = vld [vmem:[%s2268_s3 + $0x8] sm:$0xff]  }
  0x3a   :  { %183 = vadd.xlane.f32.xlu0 %v162_v2  ;;  %199 = vadd.xlane.f32.xlu1 %v170_v4  ;;  %v1266_v2 = vunpack.c.l.bf16 %v1781_v62 }
  0x3c   :  { %vm362_vm10 = vcmp.gt.f32.partialorder %v1266_v2, 0.0 }
  0x3e   :  { %185 = vadd.xlane.f32.xlu0 %v163_v6  ;;  %201 = vadd.xlane.f32.xlu1 %v171_v8  ;;  %v2283_v8 = vunpack.c.l.bf16 %v1793_v5 }
  0x40   :  { %vm370_vm12 = vcmp.gt.f32.partialorder %v2283_v8, 0.0 }
  0x42   :  { %187 = vadd.xlane.f32.xlu0 %v164_v10  ;;  %203 = vadd.xlane.f32.xlu1 %v172_v11 }
  0x93   :  { %v229_v12 = vpop.xlane.xlu0 %228  ;;  %v233_v14 = vpop.xlane.xlu1 %232 }
  0x94   :  { %260 = vxpose.xlu0.b32.start [1/16] (narrow) %v229_v12, 8 }
  0x97   :  { %v231_v13 = vpop.xlane.xlu0 %230  ;;  %v235_v15 = vpop.xlane.xlu1 %234 }
  0x98   :  { %261 = vxpose.xlu0.b32.cont [2/16] (narrow) %v231_v13, 8 }
  0x9b   :  { %v237_v16 = vpop.xlane.xlu0 %236  ;;  %v239_v17 = vpop.xlane.xlu1 %238 }
  0x9c   :  { %262 = vxpose.xlu0.b32.cont [3/16] (narrow) %v233_v14, 8  ;;  %v2282_v14 = vunpack.c.h.bf16 %v1781_v62 }
  0x9e   :  { %vm363_vm14 = vcmp.gt.f32.partialorder %v2282_v14, 0.0 }
  0x9f   :  { %v241_v18 = vpop.xlane.xlu0 %240  ;;  %v243_v19 = vpop.xlane.xlu1 %242 }
  0xa0   :  { %263 = vxpose.xlu0.b32.cont [4/16] (narrow) %v235_v15, 8 }
  0xa3   :  { %v245_v20 = vpop.xlane.xlu0 %244  ;;  %v247_v21 = vpop.xlane.xlu1 %246 }
  0xa4   :  { %264 = vxpose.xlu0.b32.cont [5/16] (narrow) %v237_v16, 8 }
  0xa7   :  { %v249_v22 = vpop.xlane.xlu0 %248  ;;  %v251_v23 = vpop.xlane.xlu1 %250 }
  0xa8   :  { %265 = vxpose.xlu0.b32.cont [6/16] (narrow) %v239_v17, 8 }
  0xab   :  { %v253_v24 = vpop.xlane.xlu0 %252  ;;  %v255_v25 = vpop.xlane.xlu1 %254 }
  0xac   :  { %266 = vxpose.xlu0.b32.cont [7/16] (narrow) %v241_v18, 8 }
  0xaf   :  { %v257_v26 = vpop.xlane.xlu0 %256  ;;  %v259_v27 = vpop.xlane.xlu1 %258 }
  0xb0   :  { %267 = vxpose.xlu0.b32.cont [8/16] (narrow) %v243_v19, 8  ;;  %v2281_v19 = vunpack.c.h.bf16 %v1793_v5 }
  0xb3   :  { %v174_v28 = vpop.xlane.xlu0 %173  ;;  %v190_v44 = vpop.xlane.xlu1 %189 }
  0xb4   :  { %268 = vxpose.xlu0.b32.cont [9/16] (narrow) %v245_v20, 8 }
  0xb7   :  { %v176_v29 = vpop.xlane.xlu0 %175  ;;  %v192_v52 = vpop.xlane.xlu1 %191 }
  0xb8   :  { %269 = vxpose.xlu0.b32.cont [10/16] (narrow) %v247_v21, 8 }
  0xbb   :  { %v178_v30 = vpop.xlane.xlu0 %177  ;;  %v194_v0 = vpop.xlane.xlu1 %193 }
  0xbc   :  { %270 = vxpose.xlu0.b32.cont [11/16] (narrow) %v249_v22, 8  ;;  %v1819_v22 = vld [vmem:[%s2268_s3 + $0x10] sm:$0xff]  }
  0xbf   :  { %v180_v31 = vpop.xlane.xlu0 %179  ;;  %v196_v12 = vpop.xlane.xlu1 %195 }
  0xc0   :  { %271 = vxpose.xlu0.b32.cont [12/16] (narrow) %v251_v23, 8 }
  0xc3   :  { %v1738_v32 = vpop.xlane.xlu0 %181 }
  0xc4   :  { %272 = vxpose.xlu0.b32.cont [13/16] (narrow) %v253_v24, 8  ;;  %v1541_v24 = vmov 0  }
  0xc5   :  { %1439 = vset.pattern.permute.xlu1 %v1541_v24 }
  0xc7   :  { %v1740_v33 = vpop.xlane.xlu0 %183 }
  0xc8   :  { %273 = vxpose.xlu0.b32.cont [14/16] (narrow) %v255_v25, 8  ;;  %v198_v25 = vpop.xlane.xlu1 %197 }
  0xcb   :  { %v1742_v35 = vpop.xlane.xlu0 %185 }
  0xcc   :  { %274 = vxpose.xlu0.b32.cont [15/16] (narrow) %v257_v26, 8 }
  0xcf   :  { %v1744_v37 = vpop.xlane.xlu0 %187 }
  0xd0   :  { %275 = vxpose.xlu0.b32.end [16/16] (narrow) %v259_v27, 8  ;;  %v2280_v27 = vunpack.c.l.bf16 %v1819_v22 }
  0xf9   :  { %1440 = vset.pattern.permute.xlu0 %v1541_v24 }
 0x114   :  { %v276_v40 = vpop.trf.xlu0 }
 0x115   :  { %v1751_v41 = vrot.slane %v276_v40, %v294_v38 }
 0x117   :  { %v296_v45 = vadd.f32 %v1751_v41, %v174_v28  ;;  %v304_v46 = vadd.f32 %v1751_v41, %v190_v44  ;;  %v297_v49 = vadd.f32 %v1751_v41, %v176_v29  ;;  %v305_v57 = vadd.f32 %v1751_v41, %v192_v52  ;;  %v200_v44 = vpop.xlane.xlu1 %199 }
 0x118   :  { %v298_v63 = vadd.f32 %v1751_v41, %v178_v30  ;;  %v306_v6 = vadd.f32 %v1751_v41, %v194_v0  ;;  %v299_v11 = vadd.f32 %v1751_v41, %v180_v31  ;;  %v307_v17 = vadd.f32 %v1751_v41, %v196_v12  ;;  %v1832_v30 = vld [vmem:[%s2268_s3 + $0x30] sm:$0xff]  }
 0x119   :  { %vm312_vm1 = vcmp.gt.f32.partialorder %v296_v45, 0.0  ;;  %v328_v48 = vmul.f32 0.2, %v296_v45  ;;  %vm320_vm3 = vcmp.gt.f32.partialorder %v304_v46, 0.0  ;;  %v336_v50 = vmul.f32 0.2, %v304_v46 }
 0x11a   :  { %v329_v56 = vmul.f32 0.2, %v297_v49  ;;  %vm313_vm5 = vcmp.gt.f32.partialorder %v297_v49, 0.0  ;;  %v337_v61 = vmul.f32 0.2, %v305_v57  ;;  %vm321_vm7 = vcmp.gt.f32.partialorder %v305_v57, 0.0 }
 0x11b   :  { %v344_v51 = vsel %vm312_vm1, %v296_v45, %v328_v48  ;;  %v352_v55 = vsel %vm320_vm3, %v304_v46, %v336_v50  ;;  %v330_v4 = vmul.f32 0.2, %v298_v63  ;;  %vm314_vm9 = vcmp.gt.f32.partialorder %v298_v63, 0.0 }
 0x11c   :  { %v1765_v53 = vsel %vm360_vm2, %v344_v51, -1e+30  ;;  %v1772_v58 = vsel %vm368_vm4, %v352_v55, -1e+30  ;;  %v345_v60 = vsel %vm313_vm5, %v297_v49, %v329_v56  ;;  %v353_v3 = vsel %vm321_vm7, %v305_v57, %v337_v61  ;;  %v1859_v56 = vld [vmem:[%s2268_s3 + $0x18] sm:$0xff]  }
 0x11d   :  { %408 = vmax.xlane.f32.xlu1 %v1765_v53  ;;  %v1784_v1 = vsel %vm361_vm6, %v345_v60, -1e+30  ;;  %v1796_v7 = vsel %vm369_vm8, %v353_v3, -1e+30  ;;  %v346_v9 = vsel %vm314_vm9, %v298_v63, %v330_v4  ;;  %v338_v10 = vmul.f32 0.2, %v306_v6  ;;  %v202_v60 = vpop.xlane.xlu1 %201 }
 0x11e   :  { %vm322_vm11 = vcmp.gt.f32.partialorder %v306_v6, 0.0  ;;  %v1803_v13 = vsel %vm362_vm10, %v346_v9, -1e+30  ;;  %v331_v16 = vmul.f32 0.2, %v299_v11  ;;  %vm315_vm13 = vcmp.gt.f32.partialorder %v299_v11, 0.0 }
 0x11f   :  { %v354_v15 = vsel %vm322_vm11, %v306_v6, %v338_v10  ;;  %v339_v21 = vmul.f32 0.2, %v307_v17  ;;  %v300_v23 = vadd.f32 %v1751_v41, %v1738_v32  ;;  %vm323_vm15 = vcmp.gt.f32.partialorder %v307_v17, 0.0  ;;  %v1872_v4 = vld [vmem:[%s2268_s3 + $0x38] sm:$0xff]  }
 0x120   :  { %v1810_v18 = vsel %vm370_vm12, %v354_v15, -1e+30  ;;  %v347_v20 = vsel %vm315_vm13, %v299_v11, %v331_v16  ;;  %vm371_vm1 = vcmp.gt.f32.partialorder %v2281_v19, 0.0  ;;  %v308_v31 = vadd.f32 %v1751_v41, %v198_v25  ;;  %v1978_v19 = vld [vmem:[#allocation2 + $0x70] sm:$0xff] }
 0x121   :  { %424 = vmax.xlane.f32.xlu1 %v1772_v58  ;;  %v1823_v26 = vsel %vm363_vm14, %v347_v20, -1e+30  ;;  %v355_v28 = vsel %vm323_vm15, %v307_v17, %v339_v21  ;;  %v332_v29 = vmul.f32 0.2, %v300_v23  ;;  %vm316_vm2 = vcmp.gt.f32.partialorder %v300_v23, 0.0  ;;  %v204_v15 = vpop.xlane.xlu1 %203 }
 0x122   :  { %v1835_v32 = vsel %vm371_vm1, %v355_v28, -1e+30  ;;  %v2279_v34 = vunpack.c.l.bf16 %v1832_v30  ;;  %vm364_vm3 = vcmp.gt.f32.partialorder %v2280_v27, 0.0  ;;  %v340_v38 = vmul.f32 0.2, %v308_v31 }
 0x123   :  { %v348_v36 = vsel %vm316_vm2, %v300_v23, %v332_v29  ;;  %v301_v40 = vadd.f32 %v1751_v41, %v1740_v33  ;;  %vm324_vm4 = vcmp.gt.f32.partialorder %v308_v31, 0.0  ;;  %v2278_v46 = vunpack.c.h.bf16 %v1819_v22 }
 0x124   :  { %v1843_v45 = vsel %vm364_vm3, %v348_v36, -1e+30  ;;  %v356_v48 = vsel %vm324_vm4, %v308_v31, %v340_v38  ;;  %vm372_vm5 = vcmp.gt.f32.partialorder %v2279_v34, 0.0  ;;  %v309_v50 = vadd.f32 %v1751_v41, %v200_v44  ;;  %v1904_v36 = vld [vmem:[#allocation2] sm:$0xff] }
 0x125   :  { %410 = vmax.xlane.f32.xlu1 %v1784_v1  ;;  %v333_v49 = vmul.f32 0.2, %v301_v40  ;;  %vm317_vm6 = vcmp.gt.f32.partialorder %v301_v40, 0.0  ;;  %v1850_v51 = vsel %vm372_vm5, %v356_v48, -1e+30  ;;  %v2277_v33 = vunpack.c.h.bf16 %v1832_v30  ;;  %v1909_v44 = vld [vmem:[#allocation2 + $0x40] sm:$0xff] }
 0x126   :  { %vm365_vm7 = vcmp.gt.f32.partialorder %v2278_v46, 0.0  ;;  %v341_v55 = vmul.f32 0.2, %v309_v50  ;;  %v302_v57 = vadd.f32 %v1751_v41, %v1742_v35  ;;  %vm325_vm8 = vcmp.gt.f32.partialorder %v309_v50, 0.0  ;;  %v398_v46 = vld [vmem:[#allocation2 + $0x30] sm:$0xff] }
 0x127   :  { %v349_v52 = vsel %vm317_vm6, %v301_v40, %v333_v49  ;;  %v2276_v63 = vunpack.c.l.bf16 %v1859_v56  ;;  %vm373_vm9 = vcmp.gt.f32.partialorder %v2277_v33, 0.0  ;;  %v310_v35 = vadd.f32 %v1751_v41, %v202_v60  ;;  %v1922_v60 = vld [vmem:[#allocation2 + $0x48] sm:$0xff] }
 0x128   :  { %v1863_v61 = vsel %vm365_vm7, %v349_v52, -1e+30  ;;  %v357_v0 = vsel %vm325_vm8, %v309_v50, %v341_v55  ;;  %v334_v3 = vmul.f32 0.2, %v302_v57  ;;  %vm318_vm10 = vcmp.gt.f32.partialorder %v302_v57, 0.0  ;;  %v393_v50 = vld [vmem:[#allocation2 + $0x8] sm:$0xff] }
 0x129   :  { %426 = vmax.xlane.f32.xlu1 %v1796_v7  ;;  %v1875_v6 = vsel %vm373_vm9, %v357_v0, -1e+30  ;;  %v2275_v9 = vunpack.c.l.bf16 %v1872_v4  ;;  %vm366_vm11 = vcmp.gt.f32.partialorder %v2276_v63, 0.0  ;;  %v342_v11 = vmul.f32 0.2, %v310_v35 }
 0x12a   :  { %v350_v10 = vsel %vm318_vm10, %v302_v57, %v334_v3  ;;  %v303_v12 = vadd.f32 %v1751_v41, %v1744_v37  ;;  %vm326_vm12 = vcmp.gt.f32.partialorder %v310_v35, 0.0  ;;  %v2274_v17 = vunpack.c.h.bf16 %v1859_v56 }
 0x12b   :  { %v1883_v16 = vsel %vm366_vm11, %v350_v10, -1e+30  ;;  %v311_v20 = vadd.f32 %v1751_v41, %v204_v15  ;;  %v358_v21 = vsel %vm326_vm12, %v310_v35, %v342_v11  ;;  %vm374_vm13 = vcmp.gt.f32.partialorder %v2275_v9, 0.0  ;;  %v1928_v35 = vld [vmem:[#allocation2 + $0x10] sm:$0xff] }
 0x12c   :  { %v335_v23 = vmul.f32 0.2, %v303_v12  ;;  %vm319_vm14 = vcmp.gt.f32.partialorder %v303_v12, 0.0  ;;  %v1890_v24 = vsel %vm374_vm13, %v358_v21, -1e+30  ;;  %vm367_vm15 = vcmp.gt.f32.partialorder %v2274_v17, 0.0 }
 0x12d   :  { %412 = vmax.xlane.f32.xlu1 %v1803_v13  ;;  %v343_v25 = vmul.f32 0.2, %v311_v20  ;;  %v2273_v28 = vunpack.c.h.bf16 %v1872_v4  ;;  %vm327_vm1 = vcmp.gt.f32.partialorder %v311_v20, 0.0  ;;  %v1934_v15 = vld [vmem:[#allocation2 + $0x50] sm:$0xff] }
 0x12e   :  { %v351_v37 = vsel %vm319_vm14, %v303_v12, %v335_v23 }
 0x12f   :  { %v1896_v41 = vsel %vm367_vm15, %v351_v37, -1e+30  ;;  %v359_v29 = vsel %vm327_vm1, %v311_v20, %v343_v25  ;;  %vm375_vm2 = vcmp.gt.f32.partialorder %v2273_v28, 0.0  ;;  %v1940_v25 = vld [vmem:[#allocation2 + $0x18] sm:$0xff]  ;;  %v405_v28 = vld [vmem:[#allocation2 + $0x68] sm:$0xff] }
 0x130   :  { %v1901_v31 = vsel %vm375_vm2, %v359_v29, -1e+30 }
 0x131   :  { %428 = vmax.xlane.f32.xlu1 %v1810_v18 }
 0x135   :  { %414 = vmax.xlane.f32.xlu1 %v1823_v26 }
 0x139   :  { %430 = vmax.xlane.f32.xlu1 %v1835_v32 }
 0x13d   :  { %416 = vmax.xlane.f32.xlu1 %v1843_v45 }
 0x141   :  { %432 = vmax.xlane.f32.xlu1 %v1850_v51 }
 0x145   :  { %418 = vmax.xlane.f32.xlu1 %v1863_v61 }
 0x149   :  { %434 = vmax.xlane.f32.xlu1 %v1875_v6 }
 0x14d   :  { %420 = vmax.xlane.f32.xlu1 %v1883_v16 }
 0x151   :  { %436 = vmax.xlane.f32.xlu1 %v1890_v24 }
 0x155   :  { %422 = vmax.xlane.f32.xlu1 %v1896_v41 }
 0x159   :  { %438 = vmax.xlane.f32.xlu1 %v1901_v31 }
 0x1aa   :  { %v409_v38 = vpop.xlane.xlu1 %408 }
 0x1ab   :  { %v1907_v40 = vmax.f32 %v1904_v36, %v409_v38  ;;  %v1946_v38 = vld [vmem:[#allocation2 + $0x58] sm:$0xff] }
 0x1ad   :  { %1034 = vst.msk [vmem:[#allocation2] sm:$0xff] %vm29_vm0, %v1907_v40  ;;  %506 = vperm.xlu1 %1439, %v1907_v40  }
 0x1ae   :  { %v425_v48 = vpop.xlane.xlu1 %424 }
 0x1af   :  { %v1915_v49 = vmax.f32 %v1909_v44, %v425_v48 }
 0x1b1   :  { %v464_v52 = vsub.f32 %v1909_v44, %v1915_v49  ;;  %1042 = vst.msk [vmem:[#allocation2 + $0x40] sm:$0xff] %vm29_vm0, %v1915_v49  ;;  %546 = vperm.xlu1 %1439, %v1915_v49  }
 0x1b2   :  { %v411_v55 = vpop.xlane.xlu1 %410 }
 0x1b3   :  { %v441_v57 = vmax.f32 %v393_v50, %v411_v55  ;;  %v1952_v55 = vld [vmem:[#allocation2 + $0x20] sm:$0xff] }
 0x1b5   :  { %1035 = vst.msk [vmem:[#allocation2 + $0x8] sm:$0xff] %vm29_vm0, %v441_v57  ;;  %511 = vperm.xlu1 %1439, %v441_v57   ;;  %v457_v10 = vsub.f32 %v393_v50, %v441_v57 }
 0x1b6   :  { %v427_v0 = vpop.xlane.xlu1 %426 }
 0x1b7   :  { %v1926_v3 = vmax.f32 %v1922_v60, %v427_v0  ;;  %v474_v20 = vmul.f32 1.442695, %v457_v10 }
 0x1b9   :  { %1043 = vst.msk [vmem:[#allocation2 + $0x48] sm:$0xff] %vm29_vm0, %v1926_v3  ;;  %551 = vperm.xlu1 %1439, %v1926_v3   ;;  %1441 = vpow2.f32 %v474_v20 }
 0x1ba   :  { %v413_v11 = vpop.xlane.xlu1 %412 }
 0x1bb   :  { %v442_v12 = vmax.f32 %v1928_v35, %v413_v11  ;;  %v1962_v11 = vld [vmem:[#allocation2 + $0x60] sm:$0xff] }
 0x1bd   :  { %1036 = vst.msk [vmem:[#allocation2 + $0x10] sm:$0xff] %vm29_vm0, %v442_v12  ;;  %516 = vperm.xlu1 %1439, %v442_v12  }
 0x1be   :  { %v429_v21 = vpop.xlane.xlu1 %428 }
 0x1bf   :  { %v1938_v23 = vmax.f32 %v1934_v15, %v429_v21 }
 0x1c1   :  { %1044 = vst.msk [vmem:[#allocation2 + $0x50] sm:$0xff] %vm29_vm0, %v1938_v23  ;;  %556 = vperm.xlu1 %1439, %v1938_v23  }
 0x1c2   :  { %v415_v37 = vpop.xlane.xlu1 %414 }
 0x1c3   :  { %v443_v29 = vmax.f32 %v1940_v25, %v415_v37  ;;  %v1960_v10 = vpop.eup %1441  ;;  %v397_v37 = vld [vmem:[#allocation2 + $0x28] sm:$0xff] }
 0x1c5   :  { %1037 = vst.msk [vmem:[#allocation2 + $0x18] sm:$0xff] %vm29_vm0, %v443_v29  ;;  %521 = vperm.xlu1 %1439, %v443_v29  }
 0x1c6   :  { %v431_v48 = vpop.xlane.xlu1 %430 }
 0x1c7   :  { %v1950_v50 = vmax.f32 %v1946_v38, %v431_v48 }
 0x1c9   :  { %1045 = vst.msk [vmem:[#allocation2 + $0x58] sm:$0xff] %vm29_vm0, %v1950_v50  ;;  %561 = vperm.xlu0 %1440, %v1950_v50   ;;  %v467_v8 = vsub.f32 %v1946_v38, %v1950_v50 }
 0x1ca   :  { %v417_v57 = vpop.xlane.xlu1 %416 }
 0x1cb   :  { %v1958_v0 = vmax.f32 %v1952_v55, %v417_v57 }
 0x1cd   :  { %1038 = vst.msk [vmem:[#allocation2 + $0x20] sm:$0xff] %vm29_vm0, %v1958_v0  ;;  %768 = vperm.xlu0 %1440, %v1960_v10   ;;  %526 = vperm.xlu1 %1439, %v1958_v0  }
 0x1ce   :  { %v433_v20 = vpop.xlane.xlu1 %432 }
 0x1cf   :  { %v1969_v21 = vmax.f32 %v1962_v11, %v433_v20  ;;  %v456_v20 = vsub.f32 %v1904_v36, %v1907_v40  ;;  %v459_v36 = vsub.f32 %v1940_v25, %v443_v29  ;;  %v460_v25 = vsub.f32 %v1952_v55, %v1958_v0 }
 0x1d1   :  { %1046 = vst.msk [vmem:[#allocation2 + $0x60] sm:$0xff] %vm29_vm0, %v1969_v21  ;;  %566 = vperm.xlu1 %1439, %v1969_v21  }
 0x1d2   :  { %v419_v48 = vpop.xlane.xlu1 %418 }
 0x1d3   :  { %v445_v57 = vmax.f32 %v397_v37, %v419_v48  ;;  %v458_v48 = vsub.f32 %v1928_v35, %v442_v12  ;;  %v1994_v12 = vld [vmem:[#allocation2 + $0x78] sm:$0xff] }
 0x1d5   :  { %v461_v17 = vsub.f32 %v397_v37, %v445_v57  ;;  %1039 = vst.msk [vmem:[#allocation2 + $0x28] sm:$0xff] %vm29_vm0, %v445_v57  ;;  %531 = vperm.xlu1 %1439, %v445_v57   ;;  %v472_v37 = vmul.f32 1.442695, %v456_v20 }
 0x1d6   :  { %v435_v9 = vpop.xlane.xlu1 %434 }
 0x1d7   :  { %v482_v63 = vmul.f32 1.442695, %v461_v17  ;;  %v453_v33 = vmax.f32 %v405_v28, %v435_v9 }
 0x1d9   :  { %1443 = vpow2.f32 %v482_v63  ;;  %1047 = vst.msk [vmem:[#allocation2 + $0x68] sm:$0xff] %vm29_vm0, %v453_v33  ;;  %571 = vperm.xlu1 %1439, %v453_v33   ;;  %v399_v63 = vld [vmem:[#allocation2 + $0x38] sm:$0xff] }
 0x1da   :  { %v421_v34 = vpop.xlane.xlu1 %420  ;;  %1445 = vpow2.f32 %v472_v37  ;;  %v478_v37 = vmul.f32 1.442695, %v459_v36  ;;  %v488_v36 = vmul.f32 1.442695, %v464_v52 }
 0x1db   :  { %v446_v27 = vmax.f32 %v398_v46, %v421_v34  ;;  %v476_v34 = vmul.f32 1.442695, %v458_v48 }
 0x1dd   :  { %1040 = vst.msk [vmem:[#allocation2 + $0x30] sm:$0xff] %vm29_vm0, %v446_v27  ;;  %536 = vperm.xlu1 %1439, %v446_v27   ;;  %1447 = vpow2.f32 %v476_v34  ;;  %v462_v55 = vsub.f32 %v398_v46, %v446_v27  ;;  %v466_v27 = vsub.f32 %v1934_v15, %v1938_v23 }
 0x1de   :  { %v437_v17 = vpop.xlane.xlu1 %436 }
 0x1df   :  { %v1983_v9 = vmax.f32 %v1978_v19, %v437_v17  ;;  %v465_v17 = vsub.f32 %v1922_v60, %v1926_v3  ;;  %v480_v3 = vmul.f32 1.442695, %v460_v25  ;;  %v484_v38 = vmul.f32 1.442695, %v462_v55 }
 0x1e0   :  { %v492_v46 = vmul.f32 1.442695, %v466_v27 }
 0x1e1   :  { %1048 = vst.msk [vmem:[#allocation2 + $0x70] sm:$0xff] %vm29_vm0, %v1983_v9  ;;  %576 = vperm.xlu1 %1439, %v1983_v9   ;;  %v490_v14 = vmul.f32 1.442695, %v465_v17 }
 0x1e2   :  { %v423_v40 = vpop.xlane.xlu1 %422 }
 0x1e3   :  { %v1991_v20 = vpop.eup %1443  ;;  %v447_v35 = vmax.f32 %v399_v63, %v423_v40 }
 0x1e4   :  { %788 = vperm.xlu0 %1440, %v1991_v20   ;;  %v2011_v0 = vpop.eup %1445 }
 0x1e5   :  { %v463_v57 = vsub.f32 %v399_v63, %v447_v35  ;;  %1041 = vst.msk [vmem:[#allocation2 + $0x38] sm:$0xff] %vm29_vm0, %v447_v35  ;;  %541 = vperm.xlu1 %1439, %v447_v35   ;;  %v494_v63 = vmul.f32 1.442695, %v467_v8 }
 0x1e6   :  { %v439_v29 = vpop.xlane.xlu1 %438 }
 0x1e7   :  { %v486_v48 = vmul.f32 1.442695, %v463_v57  ;;  %v2002_v40 = vmax.f32 %v1994_v12, %v439_v29  ;;  %v469_v57 = vsub.f32 %v405_v28, %v453_v33  ;;  %v2014_v50 = vpop.eup %1447  ;;  %v468_v33 = vsub.f32 %v1962_v11, %v1969_v21 }
 0x1e9   :  { %1449 = vpow2.f32 %v486_v48  ;;  %v471_v60 = vsub.f32 %v1994_v12, %v2002_v40  ;;  %1049 = vst.msk [vmem:[#allocation2 + $0x78] sm:$0xff] %vm29_vm0, %v2002_v40  ;;  %581 = vperm.xlu1 %1439, %v2002_v40   ;;  %v498_v34 = vmul.f32 1.442695, %v469_v57  ;;  %v496_v49 = vmul.f32 1.442695, %v468_v33 }
 0x1ea   :  { %1451 = vpow2.f32 %v478_v37 }
 0x1eb   :  { %1453 = vpow2.f32 %v490_v14 }
 0x1ec   :  { %1455 = vpow2.f32 %v480_v3 }
 0x1ed   :  { %763 = vperm.xlu1 %1439, %v2011_v0   ;;  %1457 = vpow2.f32 %v494_v63 }
 0x1ee   :  { %1459 = vpow2.f32 %v484_v38 }
 0x1ef   :  { %1461 = vpow2.f32 %v498_v34 }
 0x1f0   :  { %1463 = vpow2.f32 %v488_v36 }
 0x1f1   :  { %773 = vperm.xlu1 %1439, %v2014_v50   ;;  %1465 = vpow2.f32 %v492_v46 }
 0x1f2   :  { %1467 = vpow2.f32 %v496_v49 }
 0x1f3   :  { %v2022_v8 = vpop.eup %1449 }
 0x1f4   :  { %v2024_v14 = vpop.eup %1451  ;;  %798 = vperm.xlu0 %1440, %v2022_v8  }
 0x1f5   :  { %778 = vperm.xlu1 %1439, %v2024_v14   ;;  %v2030_v28 = vpop.eup %1453 }
 0x1f6   :  { %v2032_v44 = vpop.eup %1455 }
 0x1f7   :  { %v2036_v52 = vpop.eup %1457 }
 0x1f8   :  { %808 = vperm.xlu0 %1440, %v2030_v28   ;;  %v2038_v15 = vpop.eup %1459 }
 0x1f9   :  { %783 = vperm.xlu1 %1439, %v2032_v44   ;;  %v2042_v23 = vpop.eup %1461 }
 0x1fa   :  { %v2044_v11 = vpop.eup %1463 }
 0x1fb   :  { %v2048_v21 = vpop.eup %1465 }
 0x1fc   :  { %818 = vperm.xlu0 %1440, %v2036_v52   ;;  %v2051_v35 = vpop.eup %1467 }
 0x1fd   :  { %793 = vperm.xlu1 %1439, %v2038_v15  }
 0x200   :  { %828 = vperm.xlu0 %1440, %v2042_v23  }
 0x201   :  { %803 = vperm.xlu1 %1439, %v2044_v11  }
 0x205   :  { %813 = vperm.xlu1 %1439, %v2048_v21  }
 0x209   :  { %823 = vperm.xlu1 %1439, %v2051_v35  }
 0x22c   :  { %v507_v17 = vpop.permute.xlu1 %506 }
 0x22d   :  { %v584_v37 = vsub.f32 %v1765_v53, %v507_v17 }
 0x22f   :  { %v600_v25 = vmul.f32 1.442695, %v584_v37 }
 0x230   :  { %v547_v29 = vpop.permute.xlu1 %546 }
 0x231   :  { %1469 = vpow2.f32 %v600_v25  ;;  %v592_v48 = vsub.f32 %v1772_v58, %v547_v29 }
 0x233   :  { %v616_v3 = vmul.f32 1.442695, %v592_v48 }
 0x234   :  { %v512_v55 = vpop.permute.xlu1 %511 }
 0x235   :  { %1471 = vpow2.f32 %v616_v3  ;;  %v585_v63 = vsub.f32 %v1784_v1, %v512_v55 }
 0x237   :  { %v602_v57 = vmul.f32 1.442695, %v585_v63 }
 0x238   :  { %v552_v38 = vpop.permute.xlu1 %551 }
 0x239   :  { %1473 = vpow2.f32 %v602_v57  ;;  %v593_v34 = vsub.f32 %v1796_v7, %v552_v38 }
 0x23b   :  { %v1470_v36 = vpop.eup %1469  ;;  %v618_v27 = vmul.f32 1.442695, %v593_v34  ;;  %v2284_v34 = vunpack.c.l.bf16 %v1793_v5 }
 0x23c   :  { %v517_v46 = vpop.permute.xlu1 %516  ;;  %v632_v53 = vmul.f32 %v1470_v36, %v1262_v42 }
 0x23d   :  { %1475 = vpow2.f32 %v618_v27  ;;  %v586_v33 = vsub.f32 %v1803_v13, %v517_v46 }
 0x23e   :  { %680 = vadd.xlane.f32.xlu1 %v632_v53  ;;  %1363 = vmatprep.mubr.f32.mxu0 %v632_v53 }
 0x23f   :  { %v1472_v58 = vpop.eup %1471  ;;  %v604_v49 = vmul.f32 1.442695, %v586_v33 }
 0x240   :  { %v557_v17 = vpop.permute.xlu1 %556  ;;  %v2063_v1 = vmul.f32 %v1472_v58, %v1278_v47 }
 0x241   :  { %1477 = vpow2.f32 %v604_v49  ;;  %v594_v7 = vsub.f32 %v1810_v18, %v557_v17 }
 0x242   :  { %1375 = vmatprep.mubr.f32.mxu1 %v2063_v1 }
 0x243   :  { %v1474_v37 = vpop.eup %1473  ;;  %v620_v25 = vmul.f32 1.442695, %v594_v7  ;;  %v2286_v7 = vunpack.c.h.bf16 %v1793_v5  ;;  %v2288_v5 = vunpack.c.l.bf16 %v1832_v30 }
 0x244   :  { %v522_v42 = vpop.permute.xlu1 %521  ;;  %v633_v13 = vmul.f32 %v1474_v37, %v1263_v54 }
 0x245   :  { %1479 = vpow2.f32 %v620_v25  ;;  %v587_v29 = vsub.f32 %v1823_v26, %v522_v42 }
 0x246   :  { %682 = vadd.xlane.f32.xlu0 %v633_v13  ;;  %1364 = vmatmul.mubr.f32.vlgmr.msra.gmra.mrb[0].mxu0 %v633_v13 }
 0x247   :  { %v1476_v48 = vpop.eup %1475  ;;  %v606_v3 = vmul.f32 1.442695, %v587_v29 }
 0x248   :  { %v562_v47 = vpop.permute.xlu0 %561  ;;  %v2072_v55 = vmul.f32 %v1476_v48, %v1279_v59 }
 0x249   :  { %1481 = vpow2.f32 %v606_v3  ;;  %v595_v18 = vsub.f32 %v1835_v32, %v562_v47 }
 0x24a   :  { %1376 = vmatmul.mubr.f32.vlgmr.msra.gmra.mrb[0].mxu1 %v2072_v55 }
 0x24b   :  { %v1478_v63 = vpop.eup %1477  ;;  %v622_v39 = vmul.f32 1.442695, %v595_v18 }
 0x24c   :  { %v527_v54 = vpop.permute.xlu1 %526  ;;  %v634_v26 = vmul.f32 %v1478_v63, %v1266_v2  ;;  %v2285_v2 = vunpack.c.h.bf16 %v1781_v62  ;;  %v2287_v62 = vunpack.c.l.bf16 %v1819_v22 }
 0x24d   :  { %1483 = vpow2.f32 %v622_v39  ;;  %v588_v57 = vsub.f32 %v1843_v45, %v527_v54 }
 0x24e   :  { %684 = vadd.xlane.f32.xlu1 %v634_v26  ;;  %1366 = vmatprep.mubr.f32.mxu0 %v634_v26  ;;  %v2289_v26 = vunpack.c.h.bf16 %v1819_v22  ;;  %v2291_v22 = vunpack.c.l.bf16 %v1859_v56 }
 0x24f   :  { %v1480_v38 = vpop.eup %1479  ;;  %v608_v43 = vmul.f32 1.442695, %v588_v57 }
 0x250   :  { %v567_v59 = vpop.permute.xlu1 %566  ;;  %v642_v36 = vmul.f32 %v1480_v38, %v2284_v34  ;;  %v2290_v34 = vunpack.c.h.bf16 %v1832_v30 }
 0x251   :  { %1485 = vpow2.f32 %v608_v43  ;;  %v596_v32 = vsub.f32 %v1850_v51, %v567_v59 }
 0x252   :  { %1378 = vmatprep.mubr.f32.mxu1 %v642_v36 }
 0x253   :  { %v1482_v27 = vpop.eup %1481  ;;  %v624_v46 = vmul.f32 1.442695, %v596_v32 }
 0x254   :  { %v532_v53 = vpop.permute.xlu1 %531  ;;  %v635_v33 = vmul.f32 %v1482_v27, %v2285_v2  ;;  %v2292_v2 = vunpack.c.l.bf16 %v1872_v4 }
 0x255   :  { %1487 = vpow2.f32 %v624_v46  ;;  %v589_v45 = vsub.f32 %v1863_v61, %v532_v53 }
 0x256   :  { %686 = vadd.xlane.f32.xlu0 %v635_v33  ;;  %1367 = vmatmul.mubr.f32.gmra.mrb[2].mxu0 %v635_v33 }
 0x257   :  { %v1484_v58 = vpop.eup %1483  ;;  %v610_v49 = vmul.f32 1.442695, %v589_v45  ;;  %v2293_v45 = vunpack.c.h.bf16 %v1859_v56  ;;  %v502_v56 = vmul.f32 1.442695, %v471_v60 }
 0x258   :  { %v572_v17 = vpop.permute.xlu1 %571  ;;  %v643_v37 = vmul.f32 %v1484_v58, %v2286_v7 }
 0x259   :  { %1489 = vpow2.f32 %v610_v49  ;;  %v597_v51 = vsub.f32 %v1875_v6, %v572_v17  ;;  %v2294_v49 = vunpack.c.h.bf16 %v1872_v4 }
 0x25a   :  { %1379 = vmatmul.mubr.f32.gmra.mrb[2].mxu1 %v643_v37 }
 0x25b   :  { %v1486_v25 = vpop.eup %1485  ;;  %v626_v42 = vmul.f32 1.442695, %v597_v51  ;;  %v2130_v51 = vpop.permute.xlu0 %768 }
 0x25c   :  { %v537_v13 = vpop.permute.xlu1 %536  ;;  %v636_v29 = vmul.f32 %v1486_v25, %v2287_v62 }
 0x25d   :  { %1491 = vpow2.f32 %v626_v42  ;;  %v590_v61 = vsub.f32 %v1883_v16, %v537_v13 }
 0x25e   :  { %688 = vadd.xlane.f32.xlu1 %v636_v29  ;;  %1369 = vmatprep.mubr.f32.mxu0 %v636_v29  ;;  %v648_v29 = vld [vmem:[#allocation3] sm:$0xff] }
 0x25f   :  { %v1488_v48 = vpop.eup %1487  ;;  %v612_v3 = vmul.f32 1.442695, %v590_v61 }
 0x260   :  { %v577_v47 = vpop.permute.xlu1 %576  ;;  %v644_v18 = vmul.f32 %v1488_v48, %v2288_v5  ;;  %v664_v48 = vmul.f32 %v2011_v0, %v648_v29  ;;  %v651_v0 = vld [vmem:[#allocation3 + $0x18] sm:$0xff] }
 0x261   :  { %1493 = vpow2.f32 %v612_v3  ;;  %v598_v6 = vsub.f32 %v1890_v24, %v577_v47 }
 0x262   :  { %1381 = vmatprep.mubr.f32.mxu1 %v644_v18 }
 0x263   :  { %v1490_v63 = vpop.eup %1489  ;;  %v628_v39 = vmul.f32 1.442695, %v598_v6  ;;  %v2134_v40 = vpop.permute.xlu0 %788 }
 0x264   :  { %v542_v54 = vpop.permute.xlu1 %541  ;;  %v637_v57 = vmul.f32 %v1490_v63, %v2289_v26 }
 0x265   :  { %1495 = vpow2.f32 %v628_v39  ;;  %v591_v16 = vsub.f32 %v1896_v41, %v542_v54  ;;  %v650_v54 = vld [vmem:[#allocation3 + $0x10] sm:$0xff] }
 0x266   :  { %690 = vadd.xlane.f32.xlu0 %v637_v57  ;;  %1370 = vmatmul.mubr.f32.gmra.mrb[4].mxu0 %v637_v57  ;;  %v666_v26 = vmul.f32 %v2014_v50, %v650_v54 }
 0x267   :  { %v1492_v38 = vpop.eup %1491  ;;  %v614_v43 = vmul.f32 1.442695, %v591_v16 }
 0x268   :  { %v582_v59 = vpop.permute.xlu1 %581  ;;  %v645_v32 = vmul.f32 %v1492_v38, %v2290_v34  ;;  %v667_v38 = vmul.f32 %v2024_v14, %v651_v0  ;;  %v652_v34 = vld [vmem:[#allocation3 + $0x20] sm:$0xff] }
 0x269   :  { %1497 = vpow2.f32 %v614_v43  ;;  %v599_v24 = vsub.f32 %v1901_v31, %v582_v59 }
 0x26a   :  { %1382 = vmatmul.mubr.f32.gmra.mrb[4].mxu1 %v645_v32 }
 0x26b   :  { %v1494_v27 = vpop.eup %1493  ;;  %v630_v46 = vmul.f32 1.442695, %v599_v24 }
 0x26c   :  { %v638_v53 = vmul.f32 %v1494_v27, %v2291_v22  ;;  %v653_v27 = vld [vmem:[#allocation3 + $0x28] sm:$0xff] }
 0x26d   :  { %1499 = vpow2.f32 %v630_v46  ;;  %v669_v50 = vmul.f32 %v1991_v20, %v653_v27  ;;  %v754_v27 = vld [vmem:[#allocation4 + $0x48] sm:$0xff] }
 0x26e   :  { %692 = vadd.xlane.f32.xlu1 %v638_v53  ;;  %1372 = vmatprep.mubr.f32.mxu0 %v638_v53  ;;  %v654_v53 = vld [vmem:[#allocation3 + $0x30] sm:$0xff] }
 0x26f   :  { %v1496_v41 = vpop.eup %1495  ;;  %v670_v14 = vmul.f32 %v2038_v15, %v654_v53  ;;  %v657_v15 = vld [vmem:[#allocation3 + $0x48] sm:$0xff] }
 0x270   :  { %v646_v33 = vmul.f32 %v1496_v41, %v2292_v2  ;;  %v656_v2 = vld [vmem:[#allocation3 + $0x40] sm:$0xff] }
 0x272   :  { %696 = vadd.xlane.f32.xlu1 %v2063_v1  ;;  %1384 = vmatprep.mubr.f32.mxu1 %v646_v33  ;;  %v2295_v1 = vsub.f32 %v1978_v19, %v1983_v9 }
 0x273   :  { %v1498_v30 = vpop.eup %1497  ;;  %v2138_v25 = vpop.permute.xlu0 %798 }
 0x274   :  { %v639_v31 = vmul.f32 %v1498_v30, %v2293_v45  ;;  %v500_v7 = vmul.f32 1.442695, %v2295_v1  ;;  %v655_v45 = vld [vmem:[#allocation3 + $0x38] sm:$0xff] }
 0x275   :  { %v671_v20 = vmul.f32 %v2022_v8, %v655_v45  ;;  %v662_v8 = vld [vmem:[#allocation3 + $0x70] sm:$0xff] }
 0x276   :  { %700 = vadd.xlane.f32.xlu1 %v642_v36  ;;  %694 = vadd.xlane.f32.xlu0 %v639_v31  ;;  %1501 = vpow2.f32 %v500_v7  ;;  %v660_v7 = vld [vmem:[#allocation3 + $0x60] sm:$0xff] }
 0x277   :  { %v1500_v58 = vpop.eup %1499  ;;  %1373 = vmatmul.mubr.f32.gmra.mrb[6].mxu0 %v639_v31  ;;  %1503 = vpow2.f32 %v502_v56  ;;  %v2142_v13 = vpop.permute.xlu0 %808  ;;  %v658_v31 = vld [vmem:[#allocation3 + $0x50] sm:$0xff] }
 0x278   :  { %v647_v17 = vmul.f32 %v1500_v58, %v2294_v49  ;;  %v674_v49 = vmul.f32 %v2048_v21, %v658_v31  ;;  %v756_v31 = vld [vmem:[#allocation4 + $0x58] sm:$0xff] }
 0x27a   :  { %704 = vadd.xlane.f32.xlu1 %v644_v18  ;;  %698 = vadd.xlane.f32.xlu0 %v2072_v55  ;;  %v2122_v55 = vpop.permute.xlu1 %763  ;;  %v649_v18 = vld [vmem:[#allocation3 + $0x8] sm:$0xff] }
 0x27b   :  { %1385 = vmatmul.mubr.f32.gmra.mrb[6].mxu1 %v647_v17  ;;  %v2146_v61 = vpop.permute.xlu0 %818  ;;  %v665_v6 = vmul.f32 %v1960_v10, %v649_v18  ;;  %v668_v10 = vmul.f32 %v2032_v44, %v652_v34  ;;  %v672_v44 = vmul.f32 %v2044_v11, %v656_v2  ;;  %v673_v11 = vmul.f32 %v2030_v28, %v657_v15  ;;  %v659_v18 = vld [vmem:[#allocation3 + $0x58] sm:$0xff]  ;;  %v746_v34 = vld [vmem:[#allocation4 + $0x8] sm:$0xff] }
 0x27e   :  { %708 = vadd.xlane.f32.xlu1 %v646_v33  ;;  %702 = vadd.xlane.f32.xlu0 %v643_v37  ;;  %v2124_v19 = vpop.permute.xlu1 %773 }
 0x27f   :  { %v2150_v5 = vpop.permute.xlu0 %828 }
 0x280   :  { %v2116_v36 = vpop.eup %1501 }
 0x281   :  { %v2119_v4 = vpop.eup %1503 }
 0x282   :  { %706 = vadd.xlane.f32.xlu0 %v645_v32  ;;  %v2126_v9 = vpop.permute.xlu1 %778 }
 0x286   :  { %710 = vadd.xlane.f32.xlu0 %v647_v17  ;;  %v2128_v37 = vpop.permute.xlu1 %783 }
 0x28a   :  { %v2132_v12 = vpop.permute.xlu1 %793 }
 0x28e   :  { %v2136_v60 = vpop.permute.xlu1 %803 }
 0x28f   :  { %833 = vperm.xlu1 %1439, %v2116_v36  }
 0x292   :  { %v2140_v42 = vpop.permute.xlu1 %813 }
 0x296   :  { %v2144_v62 = vpop.permute.xlu1 %823 }
 0x29c   :  { %838 = vperm.xlu0 %1440, %v2119_v4  }
 0x2cb   :  { %v681_v3 = vpop.xlane.xlu1 %680 }
 0x2cc   :  { %v712_v47 = vadd.f32 %v681_v3, %v664_v48  ;;  %v676_v48 = vmul.f32 %v2051_v35, %v660_v7 }
 0x2ce   :  { %729 = vst.msk [vmem:[#allocation3] sm:$0xff] %vm29_vm0, %v712_v47 }
 0x2d3   :  { %v683_v63 = vpop.xlane.xlu0 %682 }
 0x2d4   :  { %v713_v39 = vadd.f32 %v683_v63, %v665_v6  ;;  %v675_v63 = vmul.f32 %v2036_v52, %v659_v18  ;;  %v757_v18 = vld [vmem:[#allocation4 + $0x60] sm:$0xff] }
 0x2d6   :  { %730 = vst.msk [vmem:[#allocation3 + $0x8] sm:$0xff] %vm29_vm0, %v713_v39  ;;  %v678_v39 = vmul.f32 %v2116_v36, %v662_v8 }
 0x2db   :  { %v685_v57 = vpop.xlane.xlu1 %684 }
 0x2dc   :  { %v714_v16 = vadd.f32 %v685_v57, %v666_v26  ;;  %v661_v57 = vld [vmem:[#allocation3 + $0x68] sm:$0xff] }
 0x2dd   :  { %v677_v35 = vmul.f32 %v2042_v23, %v661_v57  ;;  %v753_v23 = vld [vmem:[#allocation4 + $0x40] sm:$0xff] }
 0x2de   :  { %731 = vst.msk [vmem:[#allocation3 + $0x10] sm:$0xff] %vm29_vm0, %v714_v16 }
 0x2e3   :  { %v687_v43 = vpop.xlane.xlu0 %686 }
 0x2e4   :  { %v715_v59 = vadd.f32 %v687_v43, %v667_v38  ;;  %v663_v38 = vld [vmem:[#allocation3 + $0x78] sm:$0xff] }
 0x2e5   :  { %v679_v52 = vmul.f32 %v2119_v4, %v663_v38  ;;  %v849_v4 = vmul.f32 %v2136_v60, %v753_v23  ;;  %v852_v60 = vmul.f32 %v2146_v61, %v756_v31 }
 0x2e6   :  { %732 = vst.msk [vmem:[#allocation3 + $0x18] sm:$0xff] %vm29_vm0, %v715_v59 }
 0x2eb   :  { %v689_v32 = vpop.xlane.xlu1 %688 }
 0x2ec   :  { %v716_v24 = vadd.f32 %v689_v32, %v668_v10  ;;  %v745_v10 = vld [vmem:[#allocation4] sm:$0xff]  ;;  %v842_v32 = vmul.f32 %v2130_v51, %v746_v34  ;;  %v748_v51 = vld [vmem:[#allocation4 + $0x18] sm:$0xff] }
 0x2ee   :  { %733 = vst.msk [vmem:[#allocation3 + $0x20] sm:$0xff] %vm29_vm0, %v716_v24  ;;  %v841_v24 = vmul.f32 %v2122_v55, %v745_v10  ;;  %v747_v55 = vld [vmem:[#allocation4 + $0x10] sm:$0xff] }
 0x2ef   :  { %v843_v45 = vmul.f32 %v2124_v19, %v747_v55  ;;  %v749_v19 = vld [vmem:[#allocation4 + $0x20] sm:$0xff] }
 0x2f3   :  { %v691_v46 = vpop.xlane.xlu0 %690 }
 0x2f4   :  { %v717_v22 = vadd.f32 %v691_v46, %v669_v50 }
 0x2f6   :  { %734 = vst.msk [vmem:[#allocation3 + $0x28] sm:$0xff] %vm29_vm0, %v717_v22 }
 0x2fb   :  { %v693_v41 = vpop.xlane.xlu1 %692 }
 0x2fc   :  { %v718_v33 = vadd.f32 %v693_v41, %v670_v14  ;;  %v850_v14 = vmul.f32 %v2142_v13, %v754_v27 }
 0x2fe   :  { %735 = vst.msk [vmem:[#allocation3 + $0x30] sm:$0xff] %vm29_vm0, %v718_v33 }
 0x2ff   :  { %v697_v30 = vpop.xlane.xlu1 %696 }
 0x300   :  { %v720_v58 = vadd.f32 %v697_v30, %v672_v44  ;;  %v844_v30 = vmul.f32 %v2126_v9, %v748_v51  ;;  %v750_v9 = vld [vmem:[#allocation4 + $0x28] sm:$0xff] }
 0x302   :  { %737 = vst.msk [vmem:[#allocation3 + $0x40] sm:$0xff] %vm29_vm0, %v720_v58 }
 0x303   :  { %v695_v17 = vpop.xlane.xlu0 %694  ;;  %v701_v1 = vpop.xlane.xlu1 %700 }
 0x304   :  { %v719_v56 = vadd.f32 %v695_v17, %v671_v20  ;;  %v722_v29 = vadd.f32 %v701_v1, %v674_v49  ;;  %v755_v20 = vld [vmem:[#allocation4 + $0x50] sm:$0xff] }
 0x305   :  { %v851_v1 = vmul.f32 %v2140_v42, %v755_v20 }
 0x306   :  { %736 = vst.msk [vmem:[#allocation3 + $0x38] sm:$0xff] %vm29_vm0, %v719_v56  ;;  %739 = vst.msk [vmem:[#allocation3 + $0x50] sm:$0xff] %vm29_vm0, %v722_v29 }
 0x307   :  { %v699_v3 = vpop.xlane.xlu0 %698  ;;  %v705_v47 = vpop.xlane.xlu1 %704 }
 0x308   :  { %v721_v6 = vadd.f32 %v699_v3, %v673_v11  ;;  %v724_v21 = vadd.f32 %v705_v47, %v676_v48  ;;  %v846_v11 = vmul.f32 %v2134_v40, %v750_v9  ;;  %v845_v48 = vmul.f32 %v2128_v37, %v749_v19  ;;  %v758_v3 = vld [vmem:[#allocation4 + $0x68] sm:$0xff]  ;;  %v752_v40 = vld [vmem:[#allocation4 + $0x38] sm:$0xff]  ;;  %v751_v37 = vld [vmem:[#allocation4 + $0x30] sm:$0xff] }
 0x309   :  { %v854_v42 = vmul.f32 %v2150_v5, %v758_v3  ;;  %v848_v57 = vmul.f32 %v2138_v25, %v752_v40  ;;  %v759_v5 = vld [vmem:[#allocation4 + $0x70] sm:$0xff] }
 0x30a   :  { %738 = vst.msk [vmem:[#allocation3 + $0x48] sm:$0xff] %vm29_vm0, %v721_v6  ;;  %741 = vst.msk [vmem:[#allocation3 + $0x60] sm:$0xff] %vm29_vm0, %v724_v21  ;;  %v853_v21 = vmul.f32 %v2144_v62, %v757_v18 }
 0x30b   :  { %v703_v54 = vpop.xlane.xlu0 %702  ;;  %v709_v26 = vpop.xlane.xlu1 %708 }
 0x30c   :  { %v723_v28 = vadd.f32 %v703_v54, %v675_v63  ;;  %v726_v16 = vadd.f32 %v709_v26, %v678_v39 }
 0x30e   :  { %740 = vst.msk [vmem:[#allocation3 + $0x58] sm:$0xff] %vm29_vm0, %v723_v28  ;;  %743 = vst.msk [vmem:[#allocation3 + $0x70] sm:$0xff] %vm29_vm0, %v726_v16  ;;  %v847_v28 = vmul.f32 %v2132_v12, %v751_v37  ;;  %v760_v16 = vld [vmem:[#allocation4 + $0x78] sm:$0xff] }
 0x30f   :  { %v707_v0 = vpop.xlane.xlu0 %706  ;;  %v834_v38 = vpop.permute.xlu1 %833 }
 0x310   :  { %v725_v43 = vadd.f32 %v707_v0, %v677_v35 }
 0x312   :  { %742 = vst.msk [vmem:[#allocation3 + $0x68] sm:$0xff] %vm29_vm0, %v725_v43 }
 0x313   :  { %v711_v59 = vpop.xlane.xlu0 %710 }
 0x314   :  { %v727_v36 = vadd.f32 %v711_v59, %v679_v52 }
 0x316   :  { %744 = vst.msk [vmem:[#allocation3 + $0x78] sm:$0xff] %vm29_vm0, %v727_v36  ;;  %v855_v36 = vmul.f32 %v834_v38, %v759_v5 }
 0x319   :  { %v1365_v50 = vpop.f32.mrb[0].mxu0 }
 0x31a   :  { %v1003_v46 = vadd.f32 %v1365_v50, %v842_v32  ;;  %v923_v22 = vpop.f32.mrb[1].mxu0 }
 0x31b   :  { %v1002_v53 = vadd.f32 %v923_v22, %v841_v24  ;;  %v839_v35 = vpop.permute.xlu0 %838 }
 0x31c   :  { %1019 = vst [vmem:[#allocation4 + $0x8] sm:$0xff] %v1003_v46  ;;  %v856_v59 = vmul.f32 %v839_v35, %v760_v16 }
 0x31d   :  { %1018 = vst [vmem:[#allocation4] sm:$0xff] %v1002_v53  ;;  %v1377_v41 = vpop.f32.mrb[0].mxu1 }
 0x31e   :  { %v1011_v2 = vadd.f32 %v1377_v41, %v850_v14  ;;  %v963_v33 = vpop.f32.mrb[1].mxu1 }
 0x31f   :  { %v1010_v44 = vadd.f32 %v963_v33, %v849_v4 }
 0x320   :  { %1027 = vst [vmem:[#allocation4 + $0x48] sm:$0xff] %v1011_v2 }
 0x321   :  { %1026 = vst [vmem:[#allocation4 + $0x40] sm:$0xff] %v1010_v44 }
 0x329   :  { %v1368_v58 = vpop.f32.mrb[2].mxu0 }
 0x32a   :  { %v1005_v13 = vadd.f32 %v1368_v58, %v844_v30  ;;  %v933_v49 = vpop.f32.mrb[3].mxu0 }
 0x32b   :  { %v1004_v17 = vadd.f32 %v933_v49, %v843_v45 }
 0x32c   :  { %1021 = vst [vmem:[#allocation4 + $0x18] sm:$0xff] %v1005_v13 }
 0x32d   :  { %1020 = vst [vmem:[#allocation4 + $0x10] sm:$0xff] %v1004_v17  ;;  %v1380_v15 = vpop.f32.mrb[2].mxu1 }
 0x32e   :  { %v1013_v7 = vadd.f32 %v1380_v15, %v852_v60  ;;  %v973_v56 = vpop.f32.mrb[3].mxu1 }
 0x32f   :  { %v1012_v29 = vadd.f32 %v973_v56, %v851_v1 }
 0x330   :  { %1029 = vst [vmem:[#allocation4 + $0x58] sm:$0xff] %v1013_v7 }
 0x331   :  { %1028 = vst [vmem:[#allocation4 + $0x50] sm:$0xff] %v1012_v29 }
 0x339   :  { %v1371_v47 = vpop.f32.mrb[4].mxu0 }
 0x33a   :  { %v1007_v61 = vadd.f32 %v1371_v47, %v846_v11  ;;  %v943_v8 = vpop.f32.mrb[5].mxu0 }
 0x33b   :  { %v1006_v6 = vadd.f32 %v943_v8, %v845_v48 }
 0x33c   :  { %1023 = vst [vmem:[#allocation4 + $0x28] sm:$0xff] %v1007_v61 }
 0x33d   :  { %1022 = vst [vmem:[#allocation4 + $0x20] sm:$0xff] %v1006_v6  ;;  %v1383_v63 = vpop.f32.mrb[4].mxu1 }
 0x33e   :  { %v1015_v39 = vadd.f32 %v1383_v63, %v854_v42  ;;  %v983_v54 = vpop.f32.mrb[5].mxu1 }
 0x33f   :  { %v1014_v26 = vadd.f32 %v983_v54, %v853_v21 }
 0x340   :  { %1031 = vst [vmem:[#allocation4 + $0x68] sm:$0xff] %v1015_v39 }
 0x341   :  { %1030 = vst [vmem:[#allocation4 + $0x60] sm:$0xff] %v1014_v26 }
 0x34a   :  { %v1374_v0 = vpop.f32.mrb[6].mxu0 }
 0x34b   :  { %v1009_v43 = vadd.f32 %v1374_v0, %v848_v57  ;;  %v953_v62 = vpop.f32.mrb[7].mxu0 }
 0x34c   :  { %v1008_v52 = vadd.f32 %v953_v62, %v847_v28 }
 0x34d   :  { %1025 = vst [vmem:[#allocation4 + $0x38] sm:$0xff] %v1009_v43 }
 0x34e   :  { %1024 = vst [vmem:[#allocation4 + $0x30] sm:$0xff] %v1008_v52  ;;  %v1386_v34 = vpop.f32.mrb[6].mxu1 }
 0x34f   :  { %v1017_v10 = vadd.f32 %v1386_v34, %v856_v59  ;;  %v993_v32 = vpop.f32.mrb[7].mxu1 }
 0x350   :  { %v1016_v24 = vadd.f32 %v993_v32, %v855_v36 }
 0x351   :  { %1033 = vst [vmem:[#allocation4 + $0x78] sm:$0xff] %v1017_v10 }
 0x352   :  { %1032 = vst [vmem:[#allocation4 + $0x70] sm:$0xff] %v1016_v24 }
 0x353 PF:  { %v1071_v12 = vld [vmem:[#allocation3 + $0x10] sm:$0xff]  ;;  %v1069_v25 = vld [vmem:[#allocation3] sm:$0xff]  ;;  %v1072_v27 = vld [vmem:[#allocation3 + $0x18] sm:$0xff]  ;;  %v1542_v50 = vmov 0  }
 0x354   :  { %1506 = vset.pattern.permute.xlu1 %v1542_v50  ;;  %1505 = vset.pattern.permute.xlu0 %v1542_v50  ;;  %1507 = vrcp.f32 %v1071_v12  ;;  %v1070_v23 = vld [vmem:[#allocation3 + $0x8] sm:$0xff]  ;;  %v1073_v22 = vld [vmem:[#allocation3 + $0x20] sm:$0xff]  ;;  %v1076_v53 = vld [vmem:[#allocation3 + $0x38] sm:$0xff] }
 0x355   :  { %1509 = vrcp.f32 %v1069_v25  ;;  %v1074_v46 = vld [vmem:[#allocation3 + $0x28] sm:$0xff]  ;;  %v1075_v14 = vld [vmem:[#allocation3 + $0x30] sm:$0xff]  ;;  %v1077_v44 = vld [vmem:[#allocation3 + $0x40] sm:$0xff] }
 0x356   :  { %1511 = vrcp.f32 %v1072_v27  ;;  %v1078_v2 = vld [vmem:[#allocation3 + $0x48] sm:$0xff]  ;;  %v1080_v55 = vld [vmem:[#allocation3 + $0x58] sm:$0xff]  ;;  %v1079_v45 = vld [vmem:[#allocation3 + $0x50] sm:$0xff] }
 0x357   :  { %1513 = vrcp.f32 %v1070_v23  ;;  %v1082_v58 = vld [vmem:[#allocation3 + $0x68] sm:$0xff]  ;;  %v1081_v13 = vld [vmem:[#allocation3 + $0x60] sm:$0xff]  ;;  %v1084_v17 = vld [vmem:[#allocation3 + $0x78] sm:$0xff] }
 0x358   :  { %1515 = vrcp.f32 %v1074_v46  ;;  %v1083_v1 = vld [vmem:[#allocation3 + $0x70] sm:$0xff]  ;;  %v1053_v3 = vld [vmem:[#allocation4] sm:$0xff]  ;;  %v1056_v42 = vld [vmem:[#allocation4 + $0x18] sm:$0xff] }
 0x359   :  { %1517 = vrcp.f32 %v1073_v22  ;;  %v1055_v48 = vld [vmem:[#allocation4 + $0x10] sm:$0xff]  ;;  %v2199_v47 = vld [vmem:[%s2271_s6] ss:$0 sm:$0xff]  ;;  %v1054_v63 = vld [vmem:[#allocation4 + $0x8] sm:$0xff] }
 0x35a   :  { %1519 = vrcp.f32 %v1076_v53  ;;  %v1058_v16 = vld [vmem:[#allocation4 + $0x28] sm:$0xff]  ;;  %v1057_v0 = vld [vmem:[#allocation4 + $0x20] sm:$0xff]  ;;  %v1060_v34 = vld [vmem:[#allocation4 + $0x38] sm:$0xff] }
 0x35b   :  { %1521 = vrcp.f32 %v1075_v14  ;;  %v1059_v32 = vld [vmem:[#allocation4 + $0x30] sm:$0xff]  ;;  %v1062_v22 = vld [vmem:[#allocation4 + $0x48] sm:$0xff]  ;;  %v1061_v14 = vld [vmem:[#allocation4 + $0x40] sm:$0xff] }
 0x35c   :  { %1523 = vrcp.f32 %v1078_v2 }
 0x35d   :  { %1525 = vrcp.f32 %v1077_v44 }
 0x35e   :  { %v1508_v4 = vpop.eup %1507  ;;  %1527 = vrcp.f32 %v1080_v55 }
 0x35f   :  { %v1510_v41 = vpop.eup %1509  ;;  %1113 = vperm.xlu1 %1506, %v1508_v4   ;;  %1529 = vrcp.f32 %v1079_v45 }
 0x360   :  { %v1512_v33 = vpop.eup %1511  ;;  %1103 = vperm.xlu0 %1505, %v1510_v41   ;;  %1531 = vrcp.f32 %v1082_v58 }
 0x361   :  { %v1514_v51 = vpop.eup %1513  ;;  %1533 = vrcp.f32 %v1081_v13 }
 0x362   :  { %v1516_v30 = vpop.eup %1515  ;;  %1535 = vrcp.f32 %v1084_v17 }
 0x363   :  { %1118 = vperm.xlu1 %1506, %v1512_v33   ;;  %v1518_v31 = vpop.eup %1517  ;;  %1537 = vrcp.f32 %v1083_v1 }
 0x364   :  { %1108 = vperm.xlu0 %1505, %v1514_v51   ;;  %v1520_v20 = vpop.eup %1519 }
 0x365   :  { %v1522_v49 = vpop.eup %1521 }
 0x366   :  { %v1524_v60 = vpop.eup %1523 }
 0x367   :  { %1128 = vperm.xlu1 %1506, %v1516_v30   ;;  %v1526_v15 = vpop.eup %1525  ;;  %v1064_v30 = vld [vmem:[#allocation4 + $0x58] sm:$0xff] }
 0x368   :  { %1123 = vperm.xlu0 %1505, %v1518_v31   ;;  %v1528_v7 = vpop.eup %1527  ;;  %v1063_v31 = vld [vmem:[#allocation4 + $0x50] sm:$0xff] }
 0x369   :  { %v1530_v56 = vpop.eup %1529 }
 0x36a   :  { %v1532_v29 = vpop.eup %1531 }
 0x36b   :  { %1138 = vperm.xlu1 %1506, %v1520_v20   ;;  %v1534_v9 = vpop.eup %1533 }
 0x36c   :  { %1133 = vperm.xlu0 %1505, %v1522_v49   ;;  %v1536_v19 = vpop.eup %1535 }
 0x36d   :  { %v1538_v11 = vpop.eup %1537 }
 0x36f   :  { %1148 = vperm.xlu1 %1506, %v1524_v60  }
 0x370   :  { %1143 = vperm.xlu0 %1505, %v1526_v15   ;;  %v1066_v15 = vld [vmem:[#allocation4 + $0x68] sm:$0xff] }
 0x373   :  { %1158 = vperm.xlu1 %1506, %v1528_v7  }
 0x374   :  { %1153 = vperm.xlu0 %1505, %v1530_v56   ;;  %v1065_v56 = vld [vmem:[#allocation4 + $0x60] sm:$0xff] }
 0x377   :  { %1168 = vperm.xlu1 %1506, %v1532_v29  }
 0x378   :  { %1163 = vperm.xlu0 %1505, %v1534_v9  }
 0x37b   :  { %1178 = vperm.xlu1 %1506, %v1536_v19  }
 0x37c   :  { %1173 = vperm.xlu0 %1505, %v1538_v11  }
 0x3de   :  { %v1114_v18 = vpop.permute.xlu1 %1113 }
 0x3df   :  { %v1183_v61 = vmul.f32 %v1114_v18, %v1055_v48  ;;  %v1104_v8 = vpop.permute.xlu0 %1103 }
 0x3e0   :  { %v1181_v6 = vmul.f32 %v1104_v8, %v1053_v3 }
 0x3e1   :  { %v1206_v21 = vadd.f32 %v2199_v47, %v1183_v61  ;;  %v1068_v61 = vld [vmem:[#allocation4 + $0x78] sm:$0xff] }
 0x3e2   :  { %v1204_v39 = vadd.f32 %v2199_v47, %v1181_v6  ;;  %v1119_v54 = vpop.permute.xlu1 %1118  ;;  %v1067_v6 = vld [vmem:[#allocation4 + $0x70] sm:$0xff] }
 0x3e3   :  { %v1222_v26 = vmax.f32 %v1206_v21, 0.0  ;;  %v1184_v40 = vmul.f32 %v1119_v54, %v1056_v42  ;;  %v1109_v37 = vpop.permute.xlu0 %1108 }
 0x3e4   :  { %v1220_v57 = vmax.f32 %v1204_v39, 0.0  ;;  %v1182_v28 = vmul.f32 %v1109_v37, %v1054_v63 }
 0x3e5   :  { %1238 = vst [vmem:[%s2272_s7 + $0x10] sm:$0xff] %v1222_v26  ;;  %v1207_v35 = vadd.f32 %v2199_v47, %v1184_v40 }
 0x3e6   :  { %1236 = vst [vmem:[%s2272_s7] sm:$0xff] %v1220_v57  ;;  %v1205_v5 = vadd.f32 %v2199_v47, %v1182_v28  ;;  %v1129_v38 = vpop.permute.xlu1 %1128 }
 0x3e7   :  { %v1223_v43 = vmax.f32 %v1207_v35, 0.0  ;;  %v1186_v62 = vmul.f32 %v1129_v38, %v1058_v16  ;;  %v1124_v52 = vpop.permute.xlu0 %1123 }
 0x3e8   :  { %v1221_v59 = vmax.f32 %v1205_v5, 0.0  ;;  %v1185_v36 = vmul.f32 %v1124_v52, %v1057_v0 }
 0x3e9   :  { %1239 = vst [vmem:[%s2272_s7 + $0x18] sm:$0xff] %v1223_v43  ;;  %v1209_v10 = vadd.f32 %v2199_v47, %v1186_v62 }
 0x3ea   :  { %1237 = vst [vmem:[%s2272_s7 + $0x8] sm:$0xff] %v1221_v59  ;;  %v1208_v24 = vadd.f32 %v2199_v47, %v1185_v36  ;;  %v1139_v12 = vpop.permute.xlu1 %1138 }
 0x3eb   :  { %v1225_v25 = vmax.f32 %v1209_v10, 0.0  ;;  %v1188_v27 = vmul.f32 %v1139_v12, %v1060_v34  ;;  %v1134_v50 = vpop.permute.xlu0 %1133 }
 0x3ec   :  { %v1224_v23 = vmax.f32 %v1208_v24, 0.0  ;;  %v1187_v46 = vmul.f32 %v1134_v50, %v1059_v32 }
 0x3ed   :  { %1241 = vst [vmem:[%s2272_s7 + $0x28] sm:$0xff] %v1225_v25  ;;  %v1211_v53 = vadd.f32 %v2199_v47, %v1188_v27 }
 0x3ee   :  { %1240 = vst [vmem:[%s2272_s7 + $0x20] sm:$0xff] %v1224_v23  ;;  %v1210_v4 = vadd.f32 %v2199_v47, %v1187_v46  ;;  %v1149_v41 = vpop.permute.xlu1 %1148 }
 0x3ef   :  { %v1227_v2 = vmax.f32 %v1211_v53, 0.0  ;;  %v1190_v33 = vmul.f32 %v1149_v41, %v1062_v22  ;;  %v1144_v44 = vpop.permute.xlu0 %1143 }
 0x3f0   :  { %v1226_v51 = vmax.f32 %v1210_v4, 0.0  ;;  %v1189_v55 = vmul.f32 %v1144_v44, %v1061_v14 }
 0x3f1   :  { %1243 = vst [vmem:[%s2272_s7 + $0x38] sm:$0xff] %v1227_v2  ;;  %v1213_v45 = vadd.f32 %v2199_v47, %v1190_v33 }
 0x3f2   :  { %1242 = vst [vmem:[%s2272_s7 + $0x30] sm:$0xff] %v1226_v51  ;;  %v1212_v58 = vadd.f32 %v2199_v47, %v1189_v55  ;;  %v1159_v20 = vpop.permute.xlu1 %1158 }
 0x3f3   :  { %v1229_v13 = vmax.f32 %v1213_v45, 0.0  ;;  %v1192_v49 = vmul.f32 %v1159_v20, %v1064_v30  ;;  %v1154_v17 = vpop.permute.xlu0 %1153 }
 0x3f4   :  { %v1228_v60 = vmax.f32 %v1212_v58, 0.0  ;;  %v1191_v1 = vmul.f32 %v1154_v17, %v1063_v31 }
 0x3f5   :  { %1245 = vst [vmem:[%s2272_s7 + $0x48] sm:$0xff] %v1229_v13  ;;  %v1215_v7 = vadd.f32 %v2199_v47, %v1192_v49 }
 0x3f6   :  { %1244 = vst [vmem:[%s2272_s7 + $0x40] sm:$0xff] %v1228_v60  ;;  %v1214_v29 = vadd.f32 %v2199_v47, %v1191_v1  ;;  %v1169_v9 = vpop.permute.xlu1 %1168 }
 0x3f7   :  { %v1231_v19 = vmax.f32 %v1215_v7, 0.0  ;;  %v1194_v11 = vmul.f32 %v1169_v9, %v1066_v15  ;;  %v1164_v48 = vpop.permute.xlu0 %1163 }
 0x3f8   :  { %v1230_v3 = vmax.f32 %v1214_v29, 0.0  ;;  %v1193_v18 = vmul.f32 %v1164_v48, %v1065_v56 }
 0x3f9   :  { %1247 = vst [vmem:[%s2272_s7 + $0x58] sm:$0xff] %v1231_v19  ;;  %v1217_v8 = vadd.f32 %v2199_v47, %v1194_v11 }
 0x3fa   :  { %1246 = vst [vmem:[%s2272_s7 + $0x50] sm:$0xff] %v1230_v3  ;;  %v1216_v42 = vadd.f32 %v2199_v47, %v1193_v18  ;;  %v1179_v21 = vpop.permute.xlu1 %1178 }
 0x3fb   :  { %v1233_v63 = vmax.f32 %v1217_v8, 0.0  ;;  %v1196_v39 = vmul.f32 %v1179_v21, %v1068_v61  ;;  %v1174_v54 = vpop.permute.xlu0 %1173 }
 0x3fc   :  { %v1232_v26 = vmax.f32 %v1216_v42, 0.0  ;;  %v1195_v40 = vmul.f32 %v1174_v54, %v1067_v6 }
 0x3fd   :  { %1249 = vst [vmem:[%s2272_s7 + $0x68] sm:$0xff] %v1233_v63  ;;  %v1219_v37 = vadd.f32 %v2199_v47, %v1196_v39 }
 0x3fe   :  { %1248 = vst [vmem:[%s2272_s7 + $0x60] sm:$0xff] %v1232_v26  ;;  %v1218_v57 = vadd.f32 %v2199_v47, %v1195_v40 }
 0x3ff   :  { %v1235_v28 = vmax.f32 %v1219_v37, 0.0 }
 0x400   :  { %v1234_v16 = vmax.f32 %v1218_v57, 0.0 }
 0x401   :  { %1251 = vst [vmem:[%s2272_s7 + $0x78] sm:$0xff] %v1235_v28 }
 0x402   :  { %1250 = vst [vmem:[%s2272_s7 + $0x70] sm:$0xff] %v1234_v16 }

// kernel: ssclattr_forward.11
= control target key start
LH: loop header
LB: loop body
LE: loop exit
PB: predicated region body
PF: predicated region fallthrough
CT: control target
= control target key end

     0   :  { %vm29_vm0 = vcmask 7168   ;;  %v1523_v0 = vmov -1e+30   ;;  %v1524_v1 = vmov 0.0   ;;  %s2249_s0 = inlined_call_operand.<no memory space> [shape: s32[1,1], index: 0, kind: input, shape index: {}]   ;;  %s2250_s1 = inlined_call_operand.vmem [shape: f32[128,128], index: 1, kind: input, shape index: {}, may-alias: {1,2}]   ;;  %s2251_s2 = inlined_call_operand.vmem [shape: f32[128,128], index: 2, kind: input, shape index: {}, may-alias: {1,2}]   ;;  %s2252_s3 = inlined_call_operand.vmem [shape: bf16[128,128], index: 3, kind: input, shape index: {}]   ;;  %s2253_s4 = inlined_call_operand.vmem [shape: f32[1,128], index: 4, kind: input, shape index: {}]   ;;  %s2254_s5 = inlined_call_operand.vmem [shape: f32[1,128], index: 5, kind: input, shape index: {}]   ;;  %s2255_s6 = inlined_call_operand.vmem [shape: f32[1,128], index: 6, kind: input, shape index: {}]   ;;  %s2256_s7 = inlined_call_operand.vmem [shape: f32[128,128], index: 7, kind: output, shape index: {}]  }
   0x1   :  { %30 = vst.msk [vmem:[#allocation2] sm:$0xff] %vm29_vm0, %v1523_v0  ;;  %31 = vst.msk [vmem:[#allocation2 + $0x8] sm:$0xff] %vm29_vm0, %v1523_v0  ;;  %p1240_p0 = scmp.le.s32.totalorder %s2249_s0, 0 }
   0x2   :  { %32 = vst.msk [vmem:[#allocation2 + $0x10] sm:$0xff] %vm29_vm0, %v1523_v0  ;;  %33 = vst.msk [vmem:[#allocation2 + $0x18] sm:$0xff] %vm29_vm0, %v1523_v0  ;;  %v102_v2 = vld [vmem:[%s2251_s2] sm:$0xff] (!%p1240_p0)  ;;  %v103_v3 = vld [vmem:[%s2251_s2 + $0x8] sm:$0xff] (!%p1240_p0) }
   0x3   :  { %34 = vst.msk [vmem:[#allocation2 + $0x20] sm:$0xff] %vm29_vm0, %v1523_v0  ;;  %35 = vst.msk [vmem:[#allocation2 + $0x28] sm:$0xff] %vm29_vm0, %v1523_v0  ;;  %v1611_v4 = vld [vmem:[%s2253_s4] ss:$0 sm:$0xff] (!%p1240_p0)  ;;  %v1371_v6 = vpack.c.bf16 (!%p1240_p0), %v103_v3, %v102_v2  ;;  %v104_v7 = vld [vmem:[%s2251_s2 + $0x10] sm:$0xff] (!%p1240_p0) }
   0x4   :  { %36 = vst.msk [vmem:[#allocation2 + $0x30] sm:$0xff] %vm29_vm0, %v1523_v0  ;;  %37 = vst.msk [vmem:[#allocation2 + $0x38] sm:$0xff] %vm29_vm0, %v1523_v0  ;;  %v212_v5 = vmul.f32 (!%p1240_p0), %v1611_v4, %v102_v2  ;;  %v105_v8 = vld [vmem:[%s2251_s2 + $0x18] sm:$0xff] (!%p1240_p0)  ;;  %v214_v9 = vmul.f32 (!%p1240_p0), %v1611_v4, %v104_v7  ;;  %v213_v10 = vmul.f32 (!%p1240_p0), %v1611_v4, %v103_v3  ;;  %v106_v12 = vld [vmem:[%s2251_s2 + $0x20] sm:$0xff] (!%p1240_p0) }
   0x5   :  { %38 = vst.msk [vmem:[#allocation2 + $0x40] sm:$0xff] %vm29_vm0, %v1523_v0  ;;  %39 = vst.msk [vmem:[#allocation2 + $0x48] sm:$0xff] %vm29_vm0, %v1523_v0  ;;  %v215_v11 = vmul.f32 (!%p1240_p0), %v1611_v4, %v105_v8  ;;  %v1375_v13 = vpack.c.bf16 (!%p1240_p0), %v105_v8, %v104_v7  ;;  %v107_v14 = vld [vmem:[%s2251_s2 + $0x28] sm:$0xff] (!%p1240_p0)  ;;  %1372 = vmatprep.subr.bf16.mxu0 (!%p1240_p0), %v1371_v6  ;;  %v216_v15 = vmul.f32 (!%p1240_p0), %v1611_v4, %v106_v12  ;;  %v108_v18 = vld [vmem:[%s2251_s2 + $0x30] sm:$0xff] (!%p1240_p0) }
   0x6   :  { %40 = vst.msk [vmem:[#allocation2 + $0x50] sm:$0xff] %vm29_vm0, %v1523_v0  ;;  %41 = vst.msk [vmem:[#allocation2 + $0x58] sm:$0xff] %vm29_vm0, %v1523_v0  ;;  %228 = vadd.xlane.f32.xlu0 (!%p1240_p0), %v212_v5  ;;  %232 = vadd.xlane.f32.xlu1 (!%p1240_p0), %v214_v9  ;;  %v1379_v16 = vpack.c.bf16 (!%p1240_p0), %v107_v14, %v106_v12  ;;  %v217_v17 = vmul.f32 (!%p1240_p0), %v1611_v4, %v107_v14  ;;  %v109_v19 = vld [vmem:[%s2251_s2 + $0x38] sm:$0xff] (!%p1240_p0)  ;;  %v110_v23 = vld [vmem:[%s2251_s2 + $0x40] sm:$0xff] (!%p1240_p0) }
   0x7   :  { %42 = vst.msk [vmem:[#allocation2 + $0x60] sm:$0xff] %vm29_vm0, %v1523_v0  ;;  %43 = vst.msk [vmem:[#allocation2 + $0x68] sm:$0xff] %vm29_vm0, %v1523_v0  ;;  %1374 = vmatpush3.bf16.msra.mxu0 (!%p1240_p0), %v1371_v6  ;;  %1403 = vmatprep.subr.bf16.mxu1 (!%p1240_p0), %v1371_v6  ;;  %v218_v20 = vmul.f32 (!%p1240_p0), %v1611_v4, %v108_v18  ;;  %v1383_v21 = vpack.c.bf16 (!%p1240_p0), %v109_v19, %v108_v18  ;;  %v111_v24 = vld [vmem:[%s2251_s2 + $0x48] sm:$0xff] (!%p1240_p0)  ;;  %v112_v28 = vld [vmem:[%s2251_s2 + $0x50] sm:$0xff] (!%p1240_p0) }
   0x8   :  { %44 = vst.msk [vmem:[#allocation2 + $0x70] sm:$0xff] %vm29_vm0, %v1523_v0  ;;  %45 = vst.msk [vmem:[#allocation2 + $0x78] sm:$0xff] %vm29_vm0, %v1523_v0  ;;  %1376 = vmatprep.subr.bf16.mxu0 (!%p1240_p0), %v1375_v13  ;;  %1411 = vmatpush3.bf16.msra.mxu1 (!%p1240_p0), %v1371_v6  ;;  %v219_v22 = vmul.f32 (!%p1240_p0), %v1611_v4, %v109_v19  ;;  %v220_v25 = vmul.f32 (!%p1240_p0), %v1611_v4, %v110_v23  ;;  %v113_v29 = vld [vmem:[%s2251_s2 + $0x58] sm:$0xff] (!%p1240_p0)  ;;  %v114_v33 = vld [vmem:[%s2251_s2 + $0x60] sm:$0xff] (!%p1240_p0) }
   0x9   :  { %46 = vst.msk [vmem:[#allocation3] sm:$0xff] %vm29_vm0, %v1524_v1  ;;  %47 = vst.msk [vmem:[#allocation3 + $0x8] sm:$0xff] %vm29_vm0, %v1524_v1  ;;  %1404 = vmatprep.subr.bf16.mxu1 (!%p1240_p0), %v1375_v13  ;;  %v1387_v26 = vpack.c.bf16 (!%p1240_p0), %v111_v24, %v110_v23  ;;  %v221_v27 = vmul.f32 (!%p1240_p0), %v1611_v4, %v111_v24  ;;  %v222_v30 = vmul.f32 (!%p1240_p0), %v1611_v4, %v112_v28  ;;  %v115_v34 = vld [vmem:[%s2251_s2 + $0x68] sm:$0xff] (!%p1240_p0)  ;;  %v116_v38 = vld [vmem:[%s2251_s2 + $0x70] sm:$0xff] (!%p1240_p0) }
   0xa   :  { %48 = vst.msk [vmem:[#allocation3 + $0x10] sm:$0xff] %vm29_vm0, %v1524_v1  ;;  %49 = vst.msk [vmem:[#allocation3 + $0x18] sm:$0xff] %vm29_vm0, %v1524_v1  ;;  %230 = vadd.xlane.f32.xlu0 (!%p1240_p0), %v213_v10  ;;  %234 = vadd.xlane.f32.xlu1 (!%p1240_p0), %v215_v11  ;;  %v1391_v31 = vpack.c.bf16 (!%p1240_p0), %v113_v29, %v112_v28  ;;  %v223_v32 = vmul.f32 (!%p1240_p0), %v1611_v4, %v113_v29  ;;  %v117_v39 = vld [vmem:[%s2251_s2 + $0x78] sm:$0xff] (!%p1240_p0)  ;;  %v86_v43 = vld [vmem:[%s2250_s1] sm:$0xff] (!%p1240_p0) }
   0xb   :  { %50 = vst.msk [vmem:[#allocation3 + $0x20] sm:$0xff] %vm29_vm0, %v1524_v1  ;;  %51 = vst.msk [vmem:[#allocation3 + $0x28] sm:$0xff] %vm29_vm0, %v1524_v1  ;;  %1378 = vmatpush3.bf16.msra.mxu0 (!%p1240_p0), %v1375_v13  ;;  %v224_v35 = vmul.f32 (!%p1240_p0), %v1611_v4, %v114_v33  ;;  %v1395_v36 = vpack.c.bf16 (!%p1240_p0), %v115_v34, %v114_v33  ;;  %v225_v37 = vmul.f32 (!%p1240_p0), %v1611_v4, %v115_v34  ;;  %v1241_v44 = vld [vmem:[%s2254_s5] ss:$0 sm:$0xff] (!%p1240_p0)  ;;  %v87_v47 = vld [vmem:[%s2250_s1 + $0x8] sm:$0xff] (!%p1240_p0)  ;;  %v292_v34 = vlaneseq (!%p1240_p0) }
   0xc   :  { %52 = vst.msk [vmem:[#allocation3 + $0x30] sm:$0xff] %vm29_vm0, %v1524_v1  ;;  %53 = vst.msk [vmem:[#allocation3 + $0x38] sm:$0xff] %vm29_vm0, %v1524_v1  ;;  %1380 = vmatprep.subr.bf16.mxu0 (!%p1240_p0), %v1379_v16  ;;  %1412 = vmatpush3.bf16.msra.mxu1 (!%p1240_p0), %v1375_v13  ;;  %v226_v40 = vmul.f32 (!%p1240_p0), %v1611_v4, %v116_v38  ;;  %v1399_v41 = vpack.c.bf16 (!%p1240_p0), %v117_v39, %v116_v38  ;;  %v94_v45 = vld [vmem:[%s2250_s1 + $0x40] sm:$0xff] (!%p1240_p0)  ;;  %v95_v49 = vld [vmem:[%s2250_s1 + $0x48] sm:$0xff] (!%p1240_p0) }
   0xd   :  { %54 = vst.msk [vmem:[#allocation3 + $0x40] sm:$0xff] %vm29_vm0, %v1524_v1  ;;  %55 = vst.msk [vmem:[#allocation3 + $0x48] sm:$0xff] %vm29_vm0, %v1524_v1  ;;  %1405 = vmatprep.subr.bf16.mxu1 (!%p1240_p0), %v1379_v16  ;;  %v227_v42 = vmul.f32 (!%p1240_p0), %v1611_v4, %v117_v39  ;;  %v157_v46 = vmul.f32 (!%p1240_p0), %v1241_v44, %v86_v43  ;;  %v165_v48 = vmul.f32 (!%p1240_p0), %v1241_v44, %v94_v45  ;;  %v88_v51 = vld [vmem:[%s2250_s1 + $0x10] sm:$0xff] (!%p1240_p0)  ;;  %v89_v55 = vld [vmem:[%s2250_s1 + $0x18] sm:$0xff] (!%p1240_p0) }
   0xe   :  { %56 = vst.msk [vmem:[#allocation3 + $0x50] sm:$0xff] %vm29_vm0, %v1524_v1  ;;  %57 = vst.msk [vmem:[#allocation3 + $0x58] sm:$0xff] %vm29_vm0, %v1524_v1  ;;  %236 = vadd.xlane.f32.xlu0 (!%p1240_p0), %v216_v15  ;;  %238 = vadd.xlane.f32.xlu1 (!%p1240_p0), %v217_v17  ;;  %v158_v50 = vmul.f32 (!%p1240_p0), %v1241_v44, %v87_v47  ;;  %v166_v52 = vmul.f32 (!%p1240_p0), %v1241_v44, %v95_v49  ;;  %v96_v53 = vld [vmem:[%s2250_s1 + $0x50] sm:$0xff] (!%p1240_p0)  ;;  %v97_v57 = vld [vmem:[%s2250_s1 + $0x58] sm:$0xff] (!%p1240_p0) }
   0xf   :  { %58 = vst.msk [vmem:[#allocation3 + $0x60] sm:$0xff] %vm29_vm0, %v1524_v1  ;;  %59 = vst.msk [vmem:[#allocation3 + $0x68] sm:$0xff] %vm29_vm0, %v1524_v1  ;;  %1382 = vmatpush3.bf16.msra.mxu0 (!%p1240_p0), %v1379_v16  ;;  %v159_v54 = vmul.f32 (!%p1240_p0), %v1241_v44, %v88_v51  ;;  %v167_v56 = vmul.f32 (!%p1240_p0), %v1241_v44, %v96_v53  ;;  %v160_v58 = vmul.f32 (!%p1240_p0), %v1241_v44, %v89_v55  ;;  %v90_v59 = vld [vmem:[%s2250_s1 + $0x20] sm:$0xff] (!%p1240_p0)  ;;  %v91_v63 = vld [vmem:[%s2250_s1 + $0x28] sm:$0xff] (!%p1240_p0) }
  0x10   :  { %60 = vst.msk [vmem:[#allocation3 + $0x70] sm:$0xff] %vm29_vm0, %v1524_v1  ;;  %61 = vst.msk [vmem:[#allocation3 + $0x78] sm:$0xff] %vm29_vm0, %v1524_v1  ;;  %1384 = vmatprep.subr.bf16.mxu0 (!%p1240_p0), %v1383_v21  ;;  %1413 = vmatpush3.bf16.msra.mxu1 (!%p1240_p0), %v1379_v16  ;;  %v168_v60 = vmul.f32 (!%p1240_p0), %v1241_v44, %v97_v57  ;;  %v98_v61 = vld [vmem:[%s2250_s1 + $0x60] sm:$0xff] (!%p1240_p0)  ;;  %v161_v62 = vmul.f32 (!%p1240_p0), %v1241_v44, %v90_v59  ;;  %v92_v3 = vld [vmem:[%s2250_s1 + $0x30] sm:$0xff] (!%p1240_p0) }
  0x11   :  { %62 = vst [vmem:[#allocation4] sm:$0xff] %v1524_v1  ;;  %63 = vst [vmem:[#allocation4 + $0x8] sm:$0xff] %v1524_v1  ;;  %1406 = vmatprep.subr.bf16.mxu1 (!%p1240_p0), %v1383_v21  ;;  %v169_v0 = vmul.f32 (!%p1240_p0), %v1241_v44, %v98_v61  ;;  %v162_v2 = vmul.f32 (!%p1240_p0), %v1241_v44, %v91_v63  ;;  %v100_v5 = vld [vmem:[%s2250_s1 + $0x70] sm:$0xff] (!%p1240_p0)  ;;  %v163_v6 = vmul.f32 (!%p1240_p0), %v1241_v44, %v92_v3  ;;  %v93_v7 = vld [vmem:[%s2250_s1 + $0x38] sm:$0xff] (!%p1240_p0) }
  0x12   :  { %64 = vst [vmem:[#allocation4 + $0x10] sm:$0xff] %v1524_v1  ;;  %65 = vst [vmem:[#allocation4 + $0x18] sm:$0xff] %v1524_v1  ;;  %85 = sbr.rel (%p1240_p0) target bundleno = 851 (0x353), region = 33  ;;  %240 = vadd.xlane.f32.xlu0 (!%p1240_p0), %v218_v20  ;;  %242 = vadd.xlane.f32.xlu1 (!%p1240_p0), %v219_v22  ;;  %v171_v8 = vmul.f32 (!%p1240_p0), %v1241_v44, %v100_v5  ;;  %v101_v9 = vld [vmem:[%s2250_s1 + $0x78] sm:$0xff] (!%p1240_p0)  ;;  %v164_v10 = vmul.f32 (!%p1240_p0), %v1241_v44, %v93_v7  ;;  %v1733_v39 = vld [vmem:[%s2252_s3] sm:$0xff] (!%p1240_p0)  }
  0x13   :  { %66 = vst [vmem:[#allocation4 + $0x20] sm:$0xff] %v1524_v1  ;;  %67 = vst [vmem:[#allocation4 + $0x28] sm:$0xff] %v1524_v1  ;;  %1386 = vmatpush3.bf16.msra.mxu0 (!%p1240_p0), %v1383_v21  ;;  %v172_v11 = vmul.f32 (!%p1240_p0), %v1241_v44, %v101_v9  ;;  %v1741_v43 = vld [vmem:[%s2252_s3 + $0x20] sm:$0xff] (!%p1240_p0)   ;;  %v1777_v5 = vld [vmem:[%s2252_s3 + $0x28] sm:$0xff] (!%p1240_p0)  }
  0x14   :  { %68 = vst [vmem:[#allocation4 + $0x30] sm:$0xff] %v1524_v1  ;;  %69 = vst [vmem:[#allocation4 + $0x38] sm:$0xff] %v1524_v1  ;;  %1388 = vmatprep.subr.bf16.mxu0 (!%p1240_p0), %v1387_v26  ;;  %1414 = vmatpush3.bf16.msra.mxu1 (!%p1240_p0), %v1383_v21  ;;  %v1262_v47 = vunpack.c.l.bf16 (!%p1240_p0), %v1741_v43  ;;  %v1263_v59 = vunpack.c.h.bf16 (!%p1240_p0), %v1741_v43 }
  0x15   :  { %70 = vst [vmem:[#allocation4 + $0x40] sm:$0xff] %v1524_v1  ;;  %71 = vst [vmem:[#allocation4 + $0x48] sm:$0xff] %v1524_v1  ;;  %1407 = vmatprep.subr.bf16.mxu1 (!%p1240_p0), %v1387_v26 }
  0x16   :  { %72 = vst [vmem:[#allocation4 + $0x50] sm:$0xff] %v1524_v1  ;;  %73 = vst [vmem:[#allocation4 + $0x58] sm:$0xff] %v1524_v1  ;;  %244 = vadd.xlane.f32.xlu0 (!%p1240_p0), %v220_v25  ;;  %246 = vadd.xlane.f32.xlu1 (!%p1240_p0), %v221_v27  ;;  %vm368_vm4 = vcmp.gt.f32.partialorder (!%p1240_p0), %v1262_v47, 0.0  ;;  %vm369_vm8 = vcmp.gt.f32.partialorder (!%p1240_p0), %v1263_v59, 0.0 }
  0x17   :  { %74 = vst [vmem:[#allocation4 + $0x60] sm:$0xff] %v1524_v1  ;;  %75 = vst [vmem:[#allocation4 + $0x68] sm:$0xff] %v1524_v1  ;;  %1390 = vmatpush3.bf16.msra.mxu0 (!%p1240_p0), %v1387_v26 }
  0x18   :  { %76 = vst [vmem:[#allocation4 + $0x70] sm:$0xff] %v1524_v1  ;;  %77 = vst [vmem:[#allocation4 + $0x78] sm:$0xff] %v1524_v1  ;;  %1392 = vmatprep.subr.bf16.mxu0 (!%p1240_p0), %v1391_v31  ;;  %1415 = vmatpush3.bf16.msra.mxu1 (!%p1240_p0), %v1387_v26  ;;  %v99_v1 = vld [vmem:[%s2250_s1 + $0x68] sm:$0xff] (!%p1240_p0) }
  0x19   :  { %1408 = vmatprep.subr.bf16.mxu1 %v1391_v31  ;;  %v170_v4 = vmul.f32 %v1241_v44, %v99_v1 }
  0x1a   :  { %248 = vadd.xlane.f32.xlu0 %v222_v30  ;;  %250 = vadd.xlane.f32.xlu1 %v223_v32 }
  0x1b   :  { %1394 = vmatpush3.bf16.msra.mxu0 %v1391_v31 }
  0x1c   :  { %1396 = vmatprep.subr.bf16.mxu0 %v1395_v36  ;;  %1416 = vmatpush3.bf16.msra.mxu1 %v1391_v31 }
  0x1d   :  { %1409 = vmatprep.subr.bf16.mxu1 %v1395_v36 }
  0x1e   :  { %252 = vadd.xlane.f32.xlu0 %v224_v35  ;;  %254 = vadd.xlane.f32.xlu1 %v225_v37 }
  0x1f   :  { %1398 = vmatpush3.bf16.msra.mxu0 %v1395_v36 }
  0x20   :  { %1400 = vmatprep.subr.bf16.mxu0 %v1399_v41  ;;  %1417 = vmatpush3.bf16.msra.mxu1 %v1395_v36  ;;  %v293_v36 = vshrl.u32 %v292_v34, 7 }
  0x21   :  { %1410 = vmatprep.subr.bf16.mxu1 %v1399_v41 }
  0x22   :  { %256 = vadd.xlane.f32.xlu0 %v226_v40  ;;  %258 = vadd.xlane.f32.xlu1 %v227_v42  ;;  %v294_v38 = vsub.s32 0, %v293_v36  ;;  %v1246_v42 = vunpack.c.l.bf16 %v1733_v39 }
  0x23   :  { %1402 = vmatpush3.bf16.msra.mxu0 %v1399_v41 }
  0x24   :  { %1418 = vmatpush3.bf16.msra.mxu1 %v1399_v41  ;;  %vm360_vm2 = vcmp.gt.f32.partialorder %v1246_v42, 0.0 }
  0x26   :  { %173 = vadd.xlane.f32.xlu0 %v157_v46  ;;  %189 = vadd.xlane.f32.xlu1 %v165_v48 }
  0x2a   :  { %175 = vadd.xlane.f32.xlu0 %v158_v50  ;;  %191 = vadd.xlane.f32.xlu1 %v166_v52 }
  0x2e   :  { %177 = vadd.xlane.f32.xlu0 %v159_v54  ;;  %193 = vadd.xlane.f32.xlu1 %v167_v56  ;;  %v1247_v54 = vunpack.c.h.bf16 %v1733_v39 }
  0x30   :  { %vm361_vm6 = vcmp.gt.f32.partialorder %v1247_v54, 0.0 }
  0x32   :  { %179 = vadd.xlane.f32.xlu0 %v160_v58  ;;  %195 = vadd.xlane.f32.xlu1 %v168_v60 }
  0x36   :  { %181 = vadd.xlane.f32.xlu0 %v161_v62  ;;  %197 = vadd.xlane.f32.xlu1 %v169_v0  ;;  %v1765_v62 = vld [vmem:[%s2252_s3 + $0x8] sm:$0xff]  }
  0x3a   :  { %183 = vadd.xlane.f32.xlu0 %v162_v2  ;;  %199 = vadd.xlane.f32.xlu1 %v170_v4  ;;  %v1250_v2 = vunpack.c.l.bf16 %v1765_v62 }
  0x3c   :  { %vm362_vm10 = vcmp.gt.f32.partialorder %v1250_v2, 0.0 }
  0x3e   :  { %185 = vadd.xlane.f32.xlu0 %v163_v6  ;;  %201 = vadd.xlane.f32.xlu1 %v171_v8  ;;  %v2267_v8 = vunpack.c.l.bf16 %v1777_v5 }
  0x40   :  { %vm370_vm12 = vcmp.gt.f32.partialorder %v2267_v8, 0.0 }
  0x42   :  { %187 = vadd.xlane.f32.xlu0 %v164_v10  ;;  %203 = vadd.xlane.f32.xlu1 %v172_v11 }
  0x93   :  { %v229_v12 = vpop.xlane.xlu0 %228  ;;  %v233_v14 = vpop.xlane.xlu1 %232 }
  0x94   :  { %260 = vxpose.xlu0.b32.start [1/16] (narrow) %v229_v12, 8 }
  0x97   :  { %v231_v13 = vpop.xlane.xlu0 %230  ;;  %v235_v15 = vpop.xlane.xlu1 %234 }
  0x98   :  { %261 = vxpose.xlu0.b32.cont [2/16] (narrow) %v231_v13, 8 }
  0x9b   :  { %v237_v16 = vpop.xlane.xlu0 %236  ;;  %v239_v17 = vpop.xlane.xlu1 %238 }
  0x9c   :  { %262 = vxpose.xlu0.b32.cont [3/16] (narrow) %v233_v14, 8  ;;  %v2266_v14 = vunpack.c.h.bf16 %v1765_v62 }
  0x9e   :  { %vm363_vm14 = vcmp.gt.f32.partialorder %v2266_v14, 0.0 }
  0x9f   :  { %v241_v18 = vpop.xlane.xlu0 %240  ;;  %v243_v19 = vpop.xlane.xlu1 %242 }
  0xa0   :  { %263 = vxpose.xlu0.b32.cont [4/16] (narrow) %v235_v15, 8 }
  0xa3   :  { %v245_v20 = vpop.xlane.xlu0 %244  ;;  %v247_v21 = vpop.xlane.xlu1 %246 }
  0xa4   :  { %264 = vxpose.xlu0.b32.cont [5/16] (narrow) %v237_v16, 8 }
  0xa7   :  { %v249_v22 = vpop.xlane.xlu0 %248  ;;  %v251_v23 = vpop.xlane.xlu1 %250 }
  0xa8   :  { %265 = vxpose.xlu0.b32.cont [6/16] (narrow) %v239_v17, 8 }
  0xab   :  { %v253_v24 = vpop.xlane.xlu0 %252  ;;  %v255_v25 = vpop.xlane.xlu1 %254 }
  0xac   :  { %266 = vxpose.xlu0.b32.cont [7/16] (narrow) %v241_v18, 8 }
  0xaf   :  { %v257_v26 = vpop.xlane.xlu0 %256  ;;  %v259_v27 = vpop.xlane.xlu1 %258 }
  0xb0   :  { %267 = vxpose.xlu0.b32.cont [8/16] (narrow) %v243_v19, 8  ;;  %v2265_v19 = vunpack.c.h.bf16 %v1777_v5 }
  0xb3   :  { %v174_v28 = vpop.xlane.xlu0 %173  ;;  %v190_v44 = vpop.xlane.xlu1 %189 }
  0xb4   :  { %268 = vxpose.xlu0.b32.cont [9/16] (narrow) %v245_v20, 8 }
  0xb7   :  { %v176_v29 = vpop.xlane.xlu0 %175  ;;  %v192_v52 = vpop.xlane.xlu1 %191 }
  0xb8   :  { %269 = vxpose.xlu0.b32.cont [10/16] (narrow) %v247_v21, 8 }
  0xbb   :  { %v178_v30 = vpop.xlane.xlu0 %177  ;;  %v194_v0 = vpop.xlane.xlu1 %193 }
  0xbc   :  { %270 = vxpose.xlu0.b32.cont [11/16] (narrow) %v249_v22, 8  ;;  %v1803_v22 = vld [vmem:[%s2252_s3 + $0x10] sm:$0xff]  }
  0xbf   :  { %v180_v31 = vpop.xlane.xlu0 %179  ;;  %v196_v12 = vpop.xlane.xlu1 %195 }
  0xc0   :  { %271 = vxpose.xlu0.b32.cont [12/16] (narrow) %v251_v23, 8 }
  0xc3   :  { %v1722_v32 = vpop.xlane.xlu0 %181 }
  0xc4   :  { %272 = vxpose.xlu0.b32.cont [13/16] (narrow) %v253_v24, 8  ;;  %v1525_v24 = vmov 0  }
  0xc5   :  { %1423 = vset.pattern.permute.xlu1 %v1525_v24 }
  0xc7   :  { %v1724_v33 = vpop.xlane.xlu0 %183 }
  0xc8   :  { %273 = vxpose.xlu0.b32.cont [14/16] (narrow) %v255_v25, 8  ;;  %v198_v25 = vpop.xlane.xlu1 %197 }
  0xcb   :  { %v1726_v35 = vpop.xlane.xlu0 %185 }
  0xcc   :  { %274 = vxpose.xlu0.b32.cont [15/16] (narrow) %v257_v26, 8 }
  0xcf   :  { %v1728_v37 = vpop.xlane.xlu0 %187 }
  0xd0   :  { %275 = vxpose.xlu0.b32.end [16/16] (narrow) %v259_v27, 8  ;;  %v2264_v27 = vunpack.c.l.bf16 %v1803_v22 }
  0xf9   :  { %1424 = vset.pattern.permute.xlu0 %v1525_v24 }
 0x114   :  { %v276_v40 = vpop.trf.xlu0 }
 0x115   :  { %v1735_v41 = vrot.slane %v276_v40, %v294_v38 }
 0x117   :  { %v296_v45 = vadd.f32 %v1735_v41, %v174_v28  ;;  %v304_v46 = vadd.f32 %v1735_v41, %v190_v44  ;;  %v297_v49 = vadd.f32 %v1735_v41, %v176_v29  ;;  %v305_v57 = vadd.f32 %v1735_v41, %v192_v52  ;;  %v200_v44 = vpop.xlane.xlu1 %199 }
 0x118   :  { %v298_v63 = vadd.f32 %v1735_v41, %v178_v30  ;;  %v306_v6 = vadd.f32 %v1735_v41, %v194_v0  ;;  %v299_v11 = vadd.f32 %v1735_v41, %v180_v31  ;;  %v307_v17 = vadd.f32 %v1735_v41, %v196_v12  ;;  %v1816_v30 = vld [vmem:[%s2252_s3 + $0x30] sm:$0xff]  }
 0x119   :  { %vm312_vm1 = vcmp.gt.f32.partialorder %v296_v45, 0.0  ;;  %v328_v48 = vmul.f32 0.2, %v296_v45  ;;  %vm320_vm3 = vcmp.gt.f32.partialorder %v304_v46, 0.0  ;;  %v336_v50 = vmul.f32 0.2, %v304_v46 }
 0x11a   :  { %v329_v56 = vmul.f32 0.2, %v297_v49  ;;  %vm313_vm5 = vcmp.gt.f32.partialorder %v297_v49, 0.0  ;;  %v337_v61 = vmul.f32 0.2, %v305_v57  ;;  %vm321_vm7 = vcmp.gt.f32.partialorder %v305_v57, 0.0 }
 0x11b   :  { %v344_v51 = vsel %vm312_vm1, %v296_v45, %v328_v48  ;;  %v352_v55 = vsel %vm320_vm3, %v304_v46, %v336_v50  ;;  %v330_v4 = vmul.f32 0.2, %v298_v63  ;;  %vm314_vm9 = vcmp.gt.f32.partialorder %v298_v63, 0.0 }
 0x11c   :  { %v1749_v53 = vsel %vm360_vm2, %v344_v51, -1e+30  ;;  %v1756_v58 = vsel %vm368_vm4, %v352_v55, -1e+30  ;;  %v345_v60 = vsel %vm313_vm5, %v297_v49, %v329_v56  ;;  %v353_v3 = vsel %vm321_vm7, %v305_v57, %v337_v61  ;;  %v1843_v56 = vld [vmem:[%s2252_s3 + $0x18] sm:$0xff]  }
 0x11d   :  { %408 = vmax.xlane.f32.xlu1 %v1749_v53  ;;  %v1768_v1 = vsel %vm361_vm6, %v345_v60, -1e+30  ;;  %v1780_v7 = vsel %vm369_vm8, %v353_v3, -1e+30  ;;  %v346_v9 = vsel %vm314_vm9, %v298_v63, %v330_v4  ;;  %v338_v10 = vmul.f32 0.2, %v306_v6  ;;  %v202_v60 = vpop.xlane.xlu1 %201 }
 0x11e   :  { %vm322_vm11 = vcmp.gt.f32.partialorder %v306_v6, 0.0  ;;  %v1787_v13 = vsel %vm362_vm10, %v346_v9, -1e+30  ;;  %v331_v16 = vmul.f32 0.2, %v299_v11  ;;  %vm315_vm13 = vcmp.gt.f32.partialorder %v299_v11, 0.0 }
 0x11f   :  { %v354_v15 = vsel %vm322_vm11, %v306_v6, %v338_v10  ;;  %v339_v21 = vmul.f32 0.2, %v307_v17  ;;  %v300_v23 = vadd.f32 %v1735_v41, %v1722_v32  ;;  %vm323_vm15 = vcmp.gt.f32.partialorder %v307_v17, 0.0  ;;  %v1856_v4 = vld [vmem:[%s2252_s3 + $0x38] sm:$0xff]  }
 0x120   :  { %v1794_v18 = vsel %vm370_vm12, %v354_v15, -1e+30  ;;  %v347_v20 = vsel %vm315_vm13, %v299_v11, %v331_v16  ;;  %vm371_vm1 = vcmp.gt.f32.partialorder %v2265_v19, 0.0  ;;  %v308_v31 = vadd.f32 %v1735_v41, %v198_v25  ;;  %v1962_v19 = vld [vmem:[#allocation2 + $0x70] sm:$0xff] }
 0x121   :  { %424 = vmax.xlane.f32.xlu1 %v1756_v58  ;;  %v1807_v26 = vsel %vm363_vm14, %v347_v20, -1e+30  ;;  %v355_v28 = vsel %vm323_vm15, %v307_v17, %v339_v21  ;;  %v332_v29 = vmul.f32 0.2, %v300_v23  ;;  %vm316_vm2 = vcmp.gt.f32.partialorder %v300_v23, 0.0  ;;  %v204_v15 = vpop.xlane.xlu1 %203 }
 0x122   :  { %v1819_v32 = vsel %vm371_vm1, %v355_v28, -1e+30  ;;  %v2263_v34 = vunpack.c.l.bf16 %v1816_v30  ;;  %vm364_vm3 = vcmp.gt.f32.partialorder %v2264_v27, 0.0  ;;  %v340_v38 = vmul.f32 0.2, %v308_v31 }
 0x123   :  { %v348_v36 = vsel %vm316_vm2, %v300_v23, %v332_v29  ;;  %v301_v40 = vadd.f32 %v1735_v41, %v1724_v33  ;;  %vm324_vm4 = vcmp.gt.f32.partialorder %v308_v31, 0.0  ;;  %v2262_v46 = vunpack.c.h.bf16 %v1803_v22 }
 0x124   :  { %v1827_v45 = vsel %vm364_vm3, %v348_v36, -1e+30  ;;  %v356_v48 = vsel %vm324_vm4, %v308_v31, %v340_v38  ;;  %vm372_vm5 = vcmp.gt.f32.partialorder %v2263_v34, 0.0  ;;  %v309_v50 = vadd.f32 %v1735_v41, %v200_v44  ;;  %v1888_v36 = vld [vmem:[#allocation2] sm:$0xff] }
 0x125   :  { %410 = vmax.xlane.f32.xlu1 %v1768_v1  ;;  %v333_v49 = vmul.f32 0.2, %v301_v40  ;;  %vm317_vm6 = vcmp.gt.f32.partialorder %v301_v40, 0.0  ;;  %v1834_v51 = vsel %vm372_vm5, %v356_v48, -1e+30  ;;  %v2261_v33 = vunpack.c.h.bf16 %v1816_v30  ;;  %v1893_v44 = vld [vmem:[#allocation2 + $0x40] sm:$0xff] }
 0x126   :  { %vm365_vm7 = vcmp.gt.f32.partialorder %v2262_v46, 0.0  ;;  %v341_v55 = vmul.f32 0.2, %v309_v50  ;;  %v302_v57 = vadd.f32 %v1735_v41, %v1726_v35  ;;  %vm325_vm8 = vcmp.gt.f32.partialorder %v309_v50, 0.0  ;;  %v398_v46 = vld [vmem:[#allocation2 + $0x30] sm:$0xff] }
 0x127   :  { %v349_v52 = vsel %vm317_vm6, %v301_v40, %v333_v49  ;;  %v2260_v63 = vunpack.c.l.bf16 %v1843_v56  ;;  %vm373_vm9 = vcmp.gt.f32.partialorder %v2261_v33, 0.0  ;;  %v310_v35 = vadd.f32 %v1735_v41, %v202_v60  ;;  %v1906_v60 = vld [vmem:[#allocation2 + $0x48] sm:$0xff] }
 0x128   :  { %v1847_v61 = vsel %vm365_vm7, %v349_v52, -1e+30  ;;  %v357_v0 = vsel %vm325_vm8, %v309_v50, %v341_v55  ;;  %v334_v3 = vmul.f32 0.2, %v302_v57  ;;  %vm318_vm10 = vcmp.gt.f32.partialorder %v302_v57, 0.0  ;;  %v393_v50 = vld [vmem:[#allocation2 + $0x8] sm:$0xff] }
 0x129   :  { %426 = vmax.xlane.f32.xlu1 %v1780_v7  ;;  %v1859_v6 = vsel %vm373_vm9, %v357_v0, -1e+30  ;;  %v2259_v9 = vunpack.c.l.bf16 %v1856_v4  ;;  %vm366_vm11 = vcmp.gt.f32.partialorder %v2260_v63, 0.0  ;;  %v342_v11 = vmul.f32 0.2, %v310_v35 }
 0x12a   :  { %v350_v10 = vsel %vm318_vm10, %v302_v57, %v334_v3  ;;  %v303_v12 = vadd.f32 %v1735_v41, %v1728_v37  ;;  %vm326_vm12 = vcmp.gt.f32.partialorder %v310_v35, 0.0  ;;  %v2258_v17 = vunpack.c.h.bf16 %v1843_v56 }
 0x12b   :  { %v1867_v16 = vsel %vm366_vm11, %v350_v10, -1e+30  ;;  %v311_v20 = vadd.f32 %v1735_v41, %v204_v15  ;;  %v358_v21 = vsel %vm326_vm12, %v310_v35, %v342_v11  ;;  %vm374_vm13 = vcmp.gt.f32.partialorder %v2259_v9, 0.0  ;;  %v1912_v35 = vld [vmem:[#allocation2 + $0x10] sm:$0xff] }
 0x12c   :  { %v335_v23 = vmul.f32 0.2, %v303_v12  ;;  %vm319_vm14 = vcmp.gt.f32.partialorder %v303_v12, 0.0  ;;  %v1874_v24 = vsel %vm374_vm13, %v358_v21, -1e+30  ;;  %vm367_vm15 = vcmp.gt.f32.partialorder %v2258_v17, 0.0 }
 0x12d   :  { %412 = vmax.xlane.f32.xlu1 %v1787_v13  ;;  %v343_v25 = vmul.f32 0.2, %v311_v20  ;;  %v2257_v28 = vunpack.c.h.bf16 %v1856_v4  ;;  %vm327_vm1 = vcmp.gt.f32.partialorder %v311_v20, 0.0  ;;  %v1918_v15 = vld [vmem:[#allocation2 + $0x50] sm:$0xff] }
 0x12e   :  { %v351_v37 = vsel %vm319_vm14, %v303_v12, %v335_v23 }
 0x12f   :  { %v1880_v41 = vsel %vm367_vm15, %v351_v37, -1e+30  ;;  %v359_v29 = vsel %vm327_vm1, %v311_v20, %v343_v25  ;;  %vm375_vm2 = vcmp.gt.f32.partialorder %v2257_v28, 0.0  ;;  %v1924_v25 = vld [vmem:[#allocation2 + $0x18] sm:$0xff]  ;;  %v405_v28 = vld [vmem:[#allocation2 + $0x68] sm:$0xff] }
 0x130   :  { %v1885_v31 = vsel %vm375_vm2, %v359_v29, -1e+30 }
 0x131   :  { %428 = vmax.xlane.f32.xlu1 %v1794_v18 }
 0x135   :  { %414 = vmax.xlane.f32.xlu1 %v1807_v26 }
 0x139   :  { %430 = vmax.xlane.f32.xlu1 %v1819_v32 }
 0x13d   :  { %416 = vmax.xlane.f32.xlu1 %v1827_v45 }
 0x141   :  { %432 = vmax.xlane.f32.xlu1 %v1834_v51 }
 0x145   :  { %418 = vmax.xlane.f32.xlu1 %v1847_v61 }
 0x149   :  { %434 = vmax.xlane.f32.xlu1 %v1859_v6 }
 0x14d   :  { %420 = vmax.xlane.f32.xlu1 %v1867_v16 }
 0x151   :  { %436 = vmax.xlane.f32.xlu1 %v1874_v24 }
 0x155   :  { %422 = vmax.xlane.f32.xlu1 %v1880_v41 }
 0x159   :  { %438 = vmax.xlane.f32.xlu1 %v1885_v31 }
 0x1aa   :  { %v409_v38 = vpop.xlane.xlu1 %408 }
 0x1ab   :  { %v1891_v40 = vmax.f32 %v1888_v36, %v409_v38  ;;  %v1930_v38 = vld [vmem:[#allocation2 + $0x58] sm:$0xff] }
 0x1ad   :  { %1034 = vst.msk [vmem:[#allocation2] sm:$0xff] %vm29_vm0, %v1891_v40  ;;  %506 = vperm.xlu1 %1423, %v1891_v40  }
 0x1ae   :  { %v425_v48 = vpop.xlane.xlu1 %424 }
 0x1af   :  { %v1899_v49 = vmax.f32 %v1893_v44, %v425_v48 }
 0x1b1   :  { %v464_v52 = vsub.f32 %v1893_v44, %v1899_v49  ;;  %1042 = vst.msk [vmem:[#allocation2 + $0x40] sm:$0xff] %vm29_vm0, %v1899_v49  ;;  %546 = vperm.xlu1 %1423, %v1899_v49  }
 0x1b2   :  { %v411_v55 = vpop.xlane.xlu1 %410 }
 0x1b3   :  { %v441_v57 = vmax.f32 %v393_v50, %v411_v55  ;;  %v1936_v55 = vld [vmem:[#allocation2 + $0x20] sm:$0xff] }
 0x1b5   :  { %1035 = vst.msk [vmem:[#allocation2 + $0x8] sm:$0xff] %vm29_vm0, %v441_v57  ;;  %511 = vperm.xlu1 %1423, %v441_v57   ;;  %v457_v10 = vsub.f32 %v393_v50, %v441_v57 }
 0x1b6   :  { %v427_v0 = vpop.xlane.xlu1 %426 }
 0x1b7   :  { %v1910_v3 = vmax.f32 %v1906_v60, %v427_v0  ;;  %v474_v20 = vmul.f32 1.442695, %v457_v10 }
 0x1b9   :  { %1043 = vst.msk [vmem:[#allocation2 + $0x48] sm:$0xff] %vm29_vm0, %v1910_v3  ;;  %551 = vperm.xlu1 %1423, %v1910_v3   ;;  %1425 = vpow2.f32 %v474_v20 }
 0x1ba   :  { %v413_v11 = vpop.xlane.xlu1 %412 }
 0x1bb   :  { %v442_v12 = vmax.f32 %v1912_v35, %v413_v11  ;;  %v1946_v11 = vld [vmem:[#allocation2 + $0x60] sm:$0xff] }
 0x1bd   :  { %1036 = vst.msk [vmem:[#allocation2 + $0x10] sm:$0xff] %vm29_vm0, %v442_v12  ;;  %516 = vperm.xlu1 %1423, %v442_v12  }
 0x1be   :  { %v429_v21 = vpop.xlane.xlu1 %428 }
 0x1bf   :  { %v1922_v23 = vmax.f32 %v1918_v15, %v429_v21 }
 0x1c1   :  { %1044 = vst.msk [vmem:[#allocation2 + $0x50] sm:$0xff] %vm29_vm0, %v1922_v23  ;;  %556 = vperm.xlu1 %1423, %v1922_v23  }
 0x1c2   :  { %v415_v37 = vpop.xlane.xlu1 %414 }
 0x1c3   :  { %v443_v29 = vmax.f32 %v1924_v25, %v415_v37  ;;  %v1944_v10 = vpop.eup %1425  ;;  %v397_v37 = vld [vmem:[#allocation2 + $0x28] sm:$0xff] }
 0x1c5   :  { %1037 = vst.msk [vmem:[#allocation2 + $0x18] sm:$0xff] %vm29_vm0, %v443_v29  ;;  %521 = vperm.xlu1 %1423, %v443_v29  }
 0x1c6   :  { %v431_v48 = vpop.xlane.xlu1 %430 }
 0x1c7   :  { %v1934_v50 = vmax.f32 %v1930_v38, %v431_v48 }
 0x1c9   :  { %1045 = vst.msk [vmem:[#allocation2 + $0x58] sm:$0xff] %vm29_vm0, %v1934_v50  ;;  %561 = vperm.xlu0 %1424, %v1934_v50   ;;  %v467_v8 = vsub.f32 %v1930_v38, %v1934_v50 }
 0x1ca   :  { %v417_v57 = vpop.xlane.xlu1 %416 }
 0x1cb   :  { %v1942_v0 = vmax.f32 %v1936_v55, %v417_v57 }
 0x1cd   :  { %1038 = vst.msk [vmem:[#allocation2 + $0x20] sm:$0xff] %vm29_vm0, %v1942_v0  ;;  %768 = vperm.xlu0 %1424, %v1944_v10   ;;  %526 = vperm.xlu1 %1423, %v1942_v0  }
 0x1ce   :  { %v433_v20 = vpop.xlane.xlu1 %432 }
 0x1cf   :  { %v1953_v21 = vmax.f32 %v1946_v11, %v433_v20  ;;  %v456_v20 = vsub.f32 %v1888_v36, %v1891_v40  ;;  %v459_v36 = vsub.f32 %v1924_v25, %v443_v29  ;;  %v460_v25 = vsub.f32 %v1936_v55, %v1942_v0 }
 0x1d1   :  { %1046 = vst.msk [vmem:[#allocation2 + $0x60] sm:$0xff] %vm29_vm0, %v1953_v21  ;;  %566 = vperm.xlu1 %1423, %v1953_v21  }
 0x1d2   :  { %v419_v48 = vpop.xlane.xlu1 %418 }
 0x1d3   :  { %v445_v57 = vmax.f32 %v397_v37, %v419_v48  ;;  %v458_v48 = vsub.f32 %v1912_v35, %v442_v12  ;;  %v1978_v12 = vld [vmem:[#allocation2 + $0x78] sm:$0xff] }
 0x1d5   :  { %v461_v17 = vsub.f32 %v397_v37, %v445_v57  ;;  %1039 = vst.msk [vmem:[#allocation2 + $0x28] sm:$0xff] %vm29_vm0, %v445_v57  ;;  %531 = vperm.xlu1 %1423, %v445_v57   ;;  %v472_v37 = vmul.f32 1.442695, %v456_v20 }
 0x1d6   :  { %v435_v9 = vpop.xlane.xlu1 %434 }
 0x1d7   :  { %v482_v63 = vmul.f32 1.442695, %v461_v17  ;;  %v453_v33 = vmax.f32 %v405_v28, %v435_v9 }
 0x1d9   :  { %1427 = vpow2.f32 %v482_v63  ;;  %1047 = vst.msk [vmem:[#allocation2 + $0x68] sm:$0xff] %vm29_vm0, %v453_v33  ;;  %571 = vperm.xlu1 %1423, %v453_v33   ;;  %v399_v63 = vld [vmem:[#allocation2 + $0x38] sm:$0xff] }
 0x1da   :  { %v421_v34 = vpop.xlane.xlu1 %420  ;;  %1429 = vpow2.f32 %v472_v37  ;;  %v478_v37 = vmul.f32 1.442695, %v459_v36  ;;  %v488_v36 = vmul.f32 1.442695, %v464_v52 }
 0x1db   :  { %v446_v27 = vmax.f32 %v398_v46, %v421_v34  ;;  %v476_v34 = vmul.f32 1.442695, %v458_v48 }
 0x1dd   :  { %1040 = vst.msk [vmem:[#allocation2 + $0x30] sm:$0xff] %vm29_vm0, %v446_v27  ;;  %536 = vperm.xlu1 %1423, %v446_v27   ;;  %1431 = vpow2.f32 %v476_v34  ;;  %v462_v55 = vsub.f32 %v398_v46, %v446_v27  ;;  %v466_v27 = vsub.f32 %v1918_v15, %v1922_v23 }
 0x1de   :  { %v437_v17 = vpop.xlane.xlu1 %436 }
 0x1df   :  { %v1967_v9 = vmax.f32 %v1962_v19, %v437_v17  ;;  %v465_v17 = vsub.f32 %v1906_v60, %v1910_v3  ;;  %v480_v3 = vmul.f32 1.442695, %v460_v25  ;;  %v484_v38 = vmul.f32 1.442695, %v462_v55 }
 0x1e0   :  { %v492_v46 = vmul.f32 1.442695, %v466_v27 }
 0x1e1   :  { %1048 = vst.msk [vmem:[#allocation2 + $0x70] sm:$0xff] %vm29_vm0, %v1967_v9  ;;  %576 = vperm.xlu1 %1423, %v1967_v9   ;;  %v490_v14 = vmul.f32 1.442695, %v465_v17 }
 0x1e2   :  { %v423_v40 = vpop.xlane.xlu1 %422 }
 0x1e3   :  { %v1975_v20 = vpop.eup %1427  ;;  %v447_v35 = vmax.f32 %v399_v63, %v423_v40 }
 0x1e4   :  { %788 = vperm.xlu0 %1424, %v1975_v20   ;;  %v1995_v0 = vpop.eup %1429 }
 0x1e5   :  { %v463_v57 = vsub.f32 %v399_v63, %v447_v35  ;;  %1041 = vst.msk [vmem:[#allocation2 + $0x38] sm:$0xff] %vm29_vm0, %v447_v35  ;;  %541 = vperm.xlu1 %1423, %v447_v35   ;;  %v494_v63 = vmul.f32 1.442695, %v467_v8 }
 0x1e6   :  { %v439_v29 = vpop.xlane.xlu1 %438 }
 0x1e7   :  { %v486_v48 = vmul.f32 1.442695, %v463_v57  ;;  %v1986_v40 = vmax.f32 %v1978_v12, %v439_v29  ;;  %v469_v57 = vsub.f32 %v405_v28, %v453_v33  ;;  %v1998_v50 = vpop.eup %1431  ;;  %v468_v33 = vsub.f32 %v1946_v11, %v1953_v21 }
 0x1e9   :  { %1433 = vpow2.f32 %v486_v48  ;;  %v471_v60 = vsub.f32 %v1978_v12, %v1986_v40  ;;  %1049 = vst.msk [vmem:[#allocation2 + $0x78] sm:$0xff] %vm29_vm0, %v1986_v40  ;;  %581 = vperm.xlu1 %1423, %v1986_v40   ;;  %v498_v34 = vmul.f32 1.442695, %v469_v57  ;;  %v496_v49 = vmul.f32 1.442695, %v468_v33 }
 0x1ea   :  { %1435 = vpow2.f32 %v478_v37 }
 0x1eb   :  { %1437 = vpow2.f32 %v490_v14 }
 0x1ec   :  { %1439 = vpow2.f32 %v480_v3 }
 0x1ed   :  { %763 = vperm.xlu1 %1423, %v1995_v0   ;;  %1441 = vpow2.f32 %v494_v63 }
 0x1ee   :  { %1443 = vpow2.f32 %v484_v38 }
 0x1ef   :  { %1445 = vpow2.f32 %v498_v34 }
 0x1f0   :  { %1447 = vpow2.f32 %v488_v36 }
 0x1f1   :  { %773 = vperm.xlu1 %1423, %v1998_v50   ;;  %1449 = vpow2.f32 %v492_v46 }
 0x1f2   :  { %1451 = vpow2.f32 %v496_v49 }
 0x1f3   :  { %v2006_v8 = vpop.eup %1433 }
 0x1f4   :  { %v2008_v14 = vpop.eup %1435  ;;  %798 = vperm.xlu0 %1424, %v2006_v8  }
 0x1f5   :  { %778 = vperm.xlu1 %1423, %v2008_v14   ;;  %v2014_v28 = vpop.eup %1437 }
 0x1f6   :  { %v2016_v44 = vpop.eup %1439 }
 0x1f7   :  { %v2020_v52 = vpop.eup %1441 }
 0x1f8   :  { %808 = vperm.xlu0 %1424, %v2014_v28   ;;  %v2022_v15 = vpop.eup %1443 }
 0x1f9   :  { %783 = vperm.xlu1 %1423, %v2016_v44   ;;  %v2026_v23 = vpop.eup %1445 }
 0x1fa   :  { %v2028_v11 = vpop.eup %1447 }
 0x1fb   :  { %v2032_v21 = vpop.eup %1449 }
 0x1fc   :  { %818 = vperm.xlu0 %1424, %v2020_v52   ;;  %v2035_v35 = vpop.eup %1451 }
 0x1fd   :  { %793 = vperm.xlu1 %1423, %v2022_v15  }
 0x200   :  { %828 = vperm.xlu0 %1424, %v2026_v23  }
 0x201   :  { %803 = vperm.xlu1 %1423, %v2028_v11  }
 0x205   :  { %813 = vperm.xlu1 %1423, %v2032_v21  }
 0x209   :  { %823 = vperm.xlu1 %1423, %v2035_v35  }
 0x22c   :  { %v507_v17 = vpop.permute.xlu1 %506 }
 0x22d   :  { %v584_v37 = vsub.f32 %v1749_v53, %v507_v17 }
 0x22f   :  { %v600_v25 = vmul.f32 1.442695, %v584_v37 }
 0x230   :  { %v547_v29 = vpop.permute.xlu1 %546 }
 0x231   :  { %1453 = vpow2.f32 %v600_v25  ;;  %v592_v48 = vsub.f32 %v1756_v58, %v547_v29 }
 0x233   :  { %v616_v3 = vmul.f32 1.442695, %v592_v48 }
 0x234   :  { %v512_v55 = vpop.permute.xlu1 %511 }
 0x235   :  { %1455 = vpow2.f32 %v616_v3  ;;  %v585_v63 = vsub.f32 %v1768_v1, %v512_v55 }
 0x237   :  { %v602_v57 = vmul.f32 1.442695, %v585_v63 }
 0x238   :  { %v552_v38 = vpop.permute.xlu1 %551 }
 0x239   :  { %1457 = vpow2.f32 %v602_v57  ;;  %v593_v34 = vsub.f32 %v1780_v7, %v552_v38 }
 0x23b   :  { %v1454_v36 = vpop.eup %1453  ;;  %v618_v27 = vmul.f32 1.442695, %v593_v34  ;;  %v2268_v34 = vunpack.c.l.bf16 %v1777_v5 }
 0x23c   :  { %v517_v46 = vpop.permute.xlu1 %516  ;;  %v632_v53 = vmul.f32 %v1454_v36, %v1246_v42 }
 0x23d   :  { %1459 = vpow2.f32 %v618_v27  ;;  %v586_v33 = vsub.f32 %v1787_v13, %v517_v46 }
 0x23e   :  { %680 = vadd.xlane.f32.xlu1 %v632_v53  ;;  %1347 = vmatprep.mubr.f32.mxu0 %v632_v53 }
 0x23f   :  { %v1456_v58 = vpop.eup %1455  ;;  %v604_v49 = vmul.f32 1.442695, %v586_v33 }
 0x240   :  { %v557_v17 = vpop.permute.xlu1 %556  ;;  %v2047_v1 = vmul.f32 %v1456_v58, %v1262_v47 }
 0x241   :  { %1461 = vpow2.f32 %v604_v49  ;;  %v594_v7 = vsub.f32 %v1794_v18, %v557_v17 }
 0x242   :  { %1359 = vmatprep.mubr.f32.mxu1 %v2047_v1 }
 0x243   :  { %v1458_v37 = vpop.eup %1457  ;;  %v620_v25 = vmul.f32 1.442695, %v594_v7  ;;  %v2270_v7 = vunpack.c.h.bf16 %v1777_v5  ;;  %v2272_v5 = vunpack.c.l.bf16 %v1816_v30 }
 0x244   :  { %v522_v42 = vpop.permute.xlu1 %521  ;;  %v633_v13 = vmul.f32 %v1458_v37, %v1247_v54 }
 0x245   :  { %1463 = vpow2.f32 %v620_v25  ;;  %v587_v29 = vsub.f32 %v1807_v26, %v522_v42 }
 0x246   :  { %682 = vadd.xlane.f32.xlu0 %v633_v13  ;;  %1348 = vmatmul.mubr.f32.vlgmr.msra.gmra.mrb[0].mxu0 %v633_v13 }
 0x247   :  { %v1460_v48 = vpop.eup %1459  ;;  %v606_v3 = vmul.f32 1.442695, %v587_v29 }
 0x248   :  { %v562_v47 = vpop.permute.xlu0 %561  ;;  %v2056_v55 = vmul.f32 %v1460_v48, %v1263_v59 }
 0x249   :  { %1465 = vpow2.f32 %v606_v3  ;;  %v595_v18 = vsub.f32 %v1819_v32, %v562_v47 }
 0x24a   :  { %1360 = vmatmul.mubr.f32.vlgmr.msra.gmra.mrb[0].mxu1 %v2056_v55 }
 0x24b   :  { %v1462_v63 = vpop.eup %1461  ;;  %v622_v39 = vmul.f32 1.442695, %v595_v18 }
 0x24c   :  { %v527_v54 = vpop.permute.xlu1 %526  ;;  %v634_v26 = vmul.f32 %v1462_v63, %v1250_v2  ;;  %v2269_v2 = vunpack.c.h.bf16 %v1765_v62  ;;  %v2271_v62 = vunpack.c.l.bf16 %v1803_v22 }
 0x24d   :  { %1467 = vpow2.f32 %v622_v39  ;;  %v588_v57 = vsub.f32 %v1827_v45, %v527_v54 }
 0x24e   :  { %684 = vadd.xlane.f32.xlu1 %v634_v26  ;;  %1350 = vmatprep.mubr.f32.mxu0 %v634_v26  ;;  %v2273_v26 = vunpack.c.h.bf16 %v1803_v22  ;;  %v2275_v22 = vunpack.c.l.bf16 %v1843_v56 }
 0x24f   :  { %v1464_v38 = vpop.eup %1463  ;;  %v608_v43 = vmul.f32 1.442695, %v588_v57 }
 0x250   :  { %v567_v59 = vpop.permute.xlu1 %566  ;;  %v642_v36 = vmul.f32 %v1464_v38, %v2268_v34  ;;  %v2274_v34 = vunpack.c.h.bf16 %v1816_v30 }
 0x251   :  { %1469 = vpow2.f32 %v608_v43  ;;  %v596_v32 = vsub.f32 %v1834_v51, %v567_v59 }
 0x252   :  { %1362 = vmatprep.mubr.f32.mxu1 %v642_v36 }
 0x253   :  { %v1466_v27 = vpop.eup %1465  ;;  %v624_v46 = vmul.f32 1.442695, %v596_v32 }
 0x254   :  { %v532_v53 = vpop.permute.xlu1 %531  ;;  %v635_v33 = vmul.f32 %v1466_v27, %v2269_v2  ;;  %v2276_v2 = vunpack.c.l.bf16 %v1856_v4 }
 0x255   :  { %1471 = vpow2.f32 %v624_v46  ;;  %v589_v45 = vsub.f32 %v1847_v61, %v532_v53 }
 0x256   :  { %686 = vadd.xlane.f32.xlu0 %v635_v33  ;;  %1351 = vmatmul.mubr.f32.gmra.mrb[2].mxu0 %v635_v33 }
 0x257   :  { %v1468_v58 = vpop.eup %1467  ;;  %v610_v49 = vmul.f32 1.442695, %v589_v45  ;;  %v2277_v45 = vunpack.c.h.bf16 %v1843_v56  ;;  %v502_v56 = vmul.f32 1.442695, %v471_v60 }
 0x258   :  { %v572_v17 = vpop.permute.xlu1 %571  ;;  %v643_v37 = vmul.f32 %v1468_v58, %v2270_v7 }
 0x259   :  { %1473 = vpow2.f32 %v610_v49  ;;  %v597_v51 = vsub.f32 %v1859_v6, %v572_v17  ;;  %v2278_v49 = vunpack.c.h.bf16 %v1856_v4 }
 0x25a   :  { %1363 = vmatmul.mubr.f32.gmra.mrb[2].mxu1 %v643_v37 }
 0x25b   :  { %v1470_v25 = vpop.eup %1469  ;;  %v626_v42 = vmul.f32 1.442695, %v597_v51  ;;  %v2114_v51 = vpop.permute.xlu0 %768 }
 0x25c   :  { %v537_v13 = vpop.permute.xlu1 %536  ;;  %v636_v29 = vmul.f32 %v1470_v25, %v2271_v62 }
 0x25d   :  { %1475 = vpow2.f32 %v626_v42  ;;  %v590_v61 = vsub.f32 %v1867_v16, %v537_v13 }
 0x25e   :  { %688 = vadd.xlane.f32.xlu1 %v636_v29  ;;  %1353 = vmatprep.mubr.f32.mxu0 %v636_v29  ;;  %v648_v29 = vld [vmem:[#allocation3] sm:$0xff] }
 0x25f   :  { %v1472_v48 = vpop.eup %1471  ;;  %v612_v3 = vmul.f32 1.442695, %v590_v61 }
 0x260   :  { %v577_v47 = vpop.permute.xlu1 %576  ;;  %v644_v18 = vmul.f32 %v1472_v48, %v2272_v5  ;;  %v664_v48 = vmul.f32 %v1995_v0, %v648_v29  ;;  %v651_v0 = vld [vmem:[#allocation3 + $0x18] sm:$0xff] }
 0x261   :  { %1477 = vpow2.f32 %v612_v3  ;;  %v598_v6 = vsub.f32 %v1874_v24, %v577_v47 }
 0x262   :  { %1365 = vmatprep.mubr.f32.mxu1 %v644_v18 }
 0x263   :  { %v1474_v63 = vpop.eup %1473  ;;  %v628_v39 = vmul.f32 1.442695, %v598_v6  ;;  %v2118_v40 = vpop.permute.xlu0 %788 }
 0x264   :  { %v542_v54 = vpop.permute.xlu1 %541  ;;  %v637_v57 = vmul.f32 %v1474_v63, %v2273_v26 }
 0x265   :  { %1479 = vpow2.f32 %v628_v39  ;;  %v591_v16 = vsub.f32 %v1880_v41, %v542_v54  ;;  %v650_v54 = vld [vmem:[#allocation3 + $0x10] sm:$0xff] }
 0x266   :  { %690 = vadd.xlane.f32.xlu0 %v637_v57  ;;  %1354 = vmatmul.mubr.f32.gmra.mrb[4].mxu0 %v637_v57  ;;  %v666_v26 = vmul.f32 %v1998_v50, %v650_v54 }
 0x267   :  { %v1476_v38 = vpop.eup %1475  ;;  %v614_v43 = vmul.f32 1.442695, %v591_v16 }
 0x268   :  { %v582_v59 = vpop.permute.xlu1 %581  ;;  %v645_v32 = vmul.f32 %v1476_v38, %v2274_v34  ;;  %v667_v38 = vmul.f32 %v2008_v14, %v651_v0  ;;  %v652_v34 = vld [vmem:[#allocation3 + $0x20] sm:$0xff] }
 0x269   :  { %1481 = vpow2.f32 %v614_v43  ;;  %v599_v24 = vsub.f32 %v1885_v31, %v582_v59 }
 0x26a   :  { %1366 = vmatmul.mubr.f32.gmra.mrb[4].mxu1 %v645_v32 }
 0x26b   :  { %v1478_v27 = vpop.eup %1477  ;;  %v630_v46 = vmul.f32 1.442695, %v599_v24 }
 0x26c   :  { %v638_v53 = vmul.f32 %v1478_v27, %v2275_v22  ;;  %v653_v27 = vld [vmem:[#allocation3 + $0x28] sm:$0xff] }
 0x26d   :  { %1483 = vpow2.f32 %v630_v46  ;;  %v669_v50 = vmul.f32 %v1975_v20, %v653_v27  ;;  %v754_v27 = vld [vmem:[#allocation4 + $0x48] sm:$0xff] }
 0x26e   :  { %692 = vadd.xlane.f32.xlu1 %v638_v53  ;;  %1356 = vmatprep.mubr.f32.mxu0 %v638_v53  ;;  %v654_v53 = vld [vmem:[#allocation3 + $0x30] sm:$0xff] }
 0x26f   :  { %v1480_v41 = vpop.eup %1479  ;;  %v670_v14 = vmul.f32 %v2022_v15, %v654_v53  ;;  %v657_v15 = vld [vmem:[#allocation3 + $0x48] sm:$0xff] }
 0x270   :  { %v646_v33 = vmul.f32 %v1480_v41, %v2276_v2  ;;  %v656_v2 = vld [vmem:[#allocation3 + $0x40] sm:$0xff] }
 0x272   :  { %696 = vadd.xlane.f32.xlu1 %v2047_v1  ;;  %1368 = vmatprep.mubr.f32.mxu1 %v646_v33  ;;  %v2279_v1 = vsub.f32 %v1962_v19, %v1967_v9 }
 0x273   :  { %v1482_v30 = vpop.eup %1481  ;;  %v2122_v25 = vpop.permute.xlu0 %798 }
 0x274   :  { %v639_v31 = vmul.f32 %v1482_v30, %v2277_v45  ;;  %v500_v7 = vmul.f32 1.442695, %v2279_v1  ;;  %v655_v45 = vld [vmem:[#allocation3 + $0x38] sm:$0xff] }
 0x275   :  { %v671_v20 = vmul.f32 %v2006_v8, %v655_v45  ;;  %v662_v8 = vld [vmem:[#allocation3 + $0x70] sm:$0xff] }
 0x276   :  { %700 = vadd.xlane.f32.xlu1 %v642_v36  ;;  %694 = vadd.xlane.f32.xlu0 %v639_v31  ;;  %1485 = vpow2.f32 %v500_v7  ;;  %v660_v7 = vld [vmem:[#allocation3 + $0x60] sm:$0xff] }
 0x277   :  { %v1484_v58 = vpop.eup %1483  ;;  %1357 = vmatmul.mubr.f32.gmra.mrb[6].mxu0 %v639_v31  ;;  %1487 = vpow2.f32 %v502_v56  ;;  %v2126_v13 = vpop.permute.xlu0 %808  ;;  %v658_v31 = vld [vmem:[#allocation3 + $0x50] sm:$0xff] }
 0x278   :  { %v647_v17 = vmul.f32 %v1484_v58, %v2278_v49  ;;  %v674_v49 = vmul.f32 %v2032_v21, %v658_v31  ;;  %v756_v31 = vld [vmem:[#allocation4 + $0x58] sm:$0xff] }
 0x27a   :  { %704 = vadd.xlane.f32.xlu1 %v644_v18  ;;  %698 = vadd.xlane.f32.xlu0 %v2056_v55  ;;  %v2106_v55 = vpop.permute.xlu1 %763  ;;  %v649_v18 = vld [vmem:[#allocation3 + $0x8] sm:$0xff] }
 0x27b   :  { %1369 = vmatmul.mubr.f32.gmra.mrb[6].mxu1 %v647_v17  ;;  %v2130_v61 = vpop.permute.xlu0 %818  ;;  %v665_v6 = vmul.f32 %v1944_v10, %v649_v18  ;;  %v668_v10 = vmul.f32 %v2016_v44, %v652_v34  ;;  %v672_v44 = vmul.f32 %v2028_v11, %v656_v2  ;;  %v673_v11 = vmul.f32 %v2014_v28, %v657_v15  ;;  %v659_v18 = vld [vmem:[#allocation3 + $0x58] sm:$0xff]  ;;  %v746_v34 = vld [vmem:[#allocation4 + $0x8] sm:$0xff] }
 0x27e   :  { %708 = vadd.xlane.f32.xlu1 %v646_v33  ;;  %702 = vadd.xlane.f32.xlu0 %v643_v37  ;;  %v2108_v19 = vpop.permute.xlu1 %773 }
 0x27f   :  { %v2134_v5 = vpop.permute.xlu0 %828 }
 0x280   :  { %v2100_v36 = vpop.eup %1485 }
 0x281   :  { %v2103_v4 = vpop.eup %1487 }
 0x282   :  { %706 = vadd.xlane.f32.xlu0 %v645_v32  ;;  %v2110_v9 = vpop.permute.xlu1 %778 }
 0x286   :  { %710 = vadd.xlane.f32.xlu0 %v647_v17  ;;  %v2112_v37 = vpop.permute.xlu1 %783 }
 0x28a   :  { %v2116_v12 = vpop.permute.xlu1 %793 }
 0x28e   :  { %v2120_v60 = vpop.permute.xlu1 %803 }
 0x28f   :  { %833 = vperm.xlu1 %1423, %v2100_v36  }
 0x292   :  { %v2124_v42 = vpop.permute.xlu1 %813 }
 0x296   :  { %v2128_v62 = vpop.permute.xlu1 %823 }
 0x29c   :  { %838 = vperm.xlu0 %1424, %v2103_v4  }
 0x2cb   :  { %v681_v3 = vpop.xlane.xlu1 %680 }
 0x2cc   :  { %v712_v47 = vadd.f32 %v681_v3, %v664_v48  ;;  %v676_v48 = vmul.f32 %v2035_v35, %v660_v7 }
 0x2ce   :  { %729 = vst.msk [vmem:[#allocation3] sm:$0xff] %vm29_vm0, %v712_v47 }
 0x2d3   :  { %v683_v63 = vpop.xlane.xlu0 %682 }
 0x2d4   :  { %v713_v39 = vadd.f32 %v683_v63, %v665_v6  ;;  %v675_v63 = vmul.f32 %v2020_v52, %v659_v18  ;;  %v757_v18 = vld [vmem:[#allocation4 + $0x60] sm:$0xff] }
 0x2d6   :  { %730 = vst.msk [vmem:[#allocation3 + $0x8] sm:$0xff] %vm29_vm0, %v713_v39  ;;  %v678_v39 = vmul.f32 %v2100_v36, %v662_v8 }
 0x2db   :  { %v685_v57 = vpop.xlane.xlu1 %684 }
 0x2dc   :  { %v714_v16 = vadd.f32 %v685_v57, %v666_v26  ;;  %v661_v57 = vld [vmem:[#allocation3 + $0x68] sm:$0xff] }
 0x2dd   :  { %v677_v35 = vmul.f32 %v2026_v23, %v661_v57  ;;  %v753_v23 = vld [vmem:[#allocation4 + $0x40] sm:$0xff] }
 0x2de   :  { %731 = vst.msk [vmem:[#allocation3 + $0x10] sm:$0xff] %vm29_vm0, %v714_v16 }
 0x2e3   :  { %v687_v43 = vpop.xlane.xlu0 %686 }
 0x2e4   :  { %v715_v59 = vadd.f32 %v687_v43, %v667_v38  ;;  %v663_v38 = vld [vmem:[#allocation3 + $0x78] sm:$0xff] }
 0x2e5   :  { %v679_v52 = vmul.f32 %v2103_v4, %v663_v38  ;;  %v849_v4 = vmul.f32 %v2120_v60, %v753_v23  ;;  %v852_v60 = vmul.f32 %v2130_v61, %v756_v31 }
 0x2e6   :  { %732 = vst.msk [vmem:[#allocation3 + $0x18] sm:$0xff] %vm29_vm0, %v715_v59 }
 0x2eb   :  { %v689_v32 = vpop.xlane.xlu1 %688 }
 0x2ec   :  { %v716_v24 = vadd.f32 %v689_v32, %v668_v10  ;;  %v745_v10 = vld [vmem:[#allocation4] sm:$0xff]  ;;  %v842_v32 = vmul.f32 %v2114_v51, %v746_v34  ;;  %v748_v51 = vld [vmem:[#allocation4 + $0x18] sm:$0xff] }
 0x2ee   :  { %733 = vst.msk [vmem:[#allocation3 + $0x20] sm:$0xff] %vm29_vm0, %v716_v24  ;;  %v841_v24 = vmul.f32 %v2106_v55, %v745_v10  ;;  %v747_v55 = vld [vmem:[#allocation4 + $0x10] sm:$0xff] }
 0x2ef   :  { %v843_v45 = vmul.f32 %v2108_v19, %v747_v55  ;;  %v749_v19 = vld [vmem:[#allocation4 + $0x20] sm:$0xff] }
 0x2f3   :  { %v691_v46 = vpop.xlane.xlu0 %690 }
 0x2f4   :  { %v717_v22 = vadd.f32 %v691_v46, %v669_v50 }
 0x2f6   :  { %734 = vst.msk [vmem:[#allocation3 + $0x28] sm:$0xff] %vm29_vm0, %v717_v22 }
 0x2fb   :  { %v693_v41 = vpop.xlane.xlu1 %692 }
 0x2fc   :  { %v718_v33 = vadd.f32 %v693_v41, %v670_v14  ;;  %v850_v14 = vmul.f32 %v2126_v13, %v754_v27 }
 0x2fe   :  { %735 = vst.msk [vmem:[#allocation3 + $0x30] sm:$0xff] %vm29_vm0, %v718_v33 }
 0x2ff   :  { %v697_v30 = vpop.xlane.xlu1 %696 }
 0x300   :  { %v720_v58 = vadd.f32 %v697_v30, %v672_v44  ;;  %v844_v30 = vmul.f32 %v2110_v9, %v748_v51  ;;  %v750_v9 = vld [vmem:[#allocation4 + $0x28] sm:$0xff] }
 0x302   :  { %737 = vst.msk [vmem:[#allocation3 + $0x40] sm:$0xff] %vm29_vm0, %v720_v58 }
 0x303   :  { %v695_v17 = vpop.xlane.xlu0 %694  ;;  %v701_v1 = vpop.xlane.xlu1 %700 }
 0x304   :  { %v719_v56 = vadd.f32 %v695_v17, %v671_v20  ;;  %v722_v29 = vadd.f32 %v701_v1, %v674_v49  ;;  %v755_v20 = vld [vmem:[#allocation4 + $0x50] sm:$0xff] }
 0x305   :  { %v851_v1 = vmul.f32 %v2124_v42, %v755_v20 }
 0x306   :  { %736 = vst.msk [vmem:[#allocation3 + $0x38] sm:$0xff] %vm29_vm0, %v719_v56  ;;  %739 = vst.msk [vmem:[#allocation3 + $0x50] sm:$0xff] %vm29_vm0, %v722_v29 }
 0x307   :  { %v699_v3 = vpop.xlane.xlu0 %698  ;;  %v705_v47 = vpop.xlane.xlu1 %704 }
 0x308   :  { %v721_v6 = vadd.f32 %v699_v3, %v673_v11  ;;  %v724_v21 = vadd.f32 %v705_v47, %v676_v48  ;;  %v846_v11 = vmul.f32 %v2118_v40, %v750_v9  ;;  %v845_v48 = vmul.f32 %v2112_v37, %v749_v19  ;;  %v758_v3 = vld [vmem:[#allocation4 + $0x68] sm:$0xff]  ;;  %v752_v40 = vld [vmem:[#allocation4 + $0x38] sm:$0xff]  ;;  %v751_v37 = vld [vmem:[#allocation4 + $0x30] sm:$0xff] }
 0x309   :  { %v854_v42 = vmul.f32 %v2134_v5, %v758_v3  ;;  %v848_v57 = vmul.f32 %v2122_v25, %v752_v40  ;;  %v759_v5 = vld [vmem:[#allocation4 + $0x70] sm:$0xff] }
 0x30a   :  { %738 = vst.msk [vmem:[#allocation3 + $0x48] sm:$0xff] %vm29_vm0, %v721_v6  ;;  %741 = vst.msk [vmem:[#allocation3 + $0x60] sm:$0xff] %vm29_vm0, %v724_v21  ;;  %v853_v21 = vmul.f32 %v2128_v62, %v757_v18 }
 0x30b   :  { %v703_v54 = vpop.xlane.xlu0 %702  ;;  %v709_v26 = vpop.xlane.xlu1 %708 }
 0x30c   :  { %v723_v28 = vadd.f32 %v703_v54, %v675_v63  ;;  %v726_v16 = vadd.f32 %v709_v26, %v678_v39 }
 0x30e   :  { %740 = vst.msk [vmem:[#allocation3 + $0x58] sm:$0xff] %vm29_vm0, %v723_v28  ;;  %743 = vst.msk [vmem:[#allocation3 + $0x70] sm:$0xff] %vm29_vm0, %v726_v16  ;;  %v847_v28 = vmul.f32 %v2116_v12, %v751_v37  ;;  %v760_v16 = vld [vmem:[#allocation4 + $0x78] sm:$0xff] }
 0x30f   :  { %v707_v0 = vpop.xlane.xlu0 %706  ;;  %v834_v38 = vpop.permute.xlu1 %833 }
 0x310   :  { %v725_v43 = vadd.f32 %v707_v0, %v677_v35 }
 0x312   :  { %742 = vst.msk [vmem:[#allocation3 + $0x68] sm:$0xff] %vm29_vm0, %v725_v43 }
 0x313   :  { %v711_v59 = vpop.xlane.xlu0 %710 }
 0x314   :  { %v727_v36 = vadd.f32 %v711_v59, %v679_v52 }
 0x316   :  { %744 = vst.msk [vmem:[#allocation3 + $0x78] sm:$0xff] %vm29_vm0, %v727_v36  ;;  %v855_v36 = vmul.f32 %v834_v38, %v759_v5 }
 0x319   :  { %v1349_v50 = vpop.f32.mrb[0].mxu0 }
 0x31a   :  { %v1003_v46 = vadd.f32 %v1349_v50, %v842_v32  ;;  %v923_v22 = vpop.f32.mrb[1].mxu0 }
 0x31b   :  { %v1002_v53 = vadd.f32 %v923_v22, %v841_v24  ;;  %v839_v35 = vpop.permute.xlu0 %838 }
 0x31c   :  { %1019 = vst [vmem:[#allocation4 + $0x8] sm:$0xff] %v1003_v46  ;;  %v856_v59 = vmul.f32 %v839_v35, %v760_v16 }
 0x31d   :  { %1018 = vst [vmem:[#allocation4] sm:$0xff] %v1002_v53  ;;  %v1361_v41 = vpop.f32.mrb[0].mxu1 }
 0x31e   :  { %v1011_v2 = vadd.f32 %v1361_v41, %v850_v14  ;;  %v963_v33 = vpop.f32.mrb[1].mxu1 }
 0x31f   :  { %v1010_v44 = vadd.f32 %v963_v33, %v849_v4 }
 0x320   :  { %1027 = vst [vmem:[#allocation4 + $0x48] sm:$0xff] %v1011_v2 }
 0x321   :  { %1026 = vst [vmem:[#allocation4 + $0x40] sm:$0xff] %v1010_v44 }
 0x329   :  { %v1352_v58 = vpop.f32.mrb[2].mxu0 }
 0x32a   :  { %v1005_v13 = vadd.f32 %v1352_v58, %v844_v30  ;;  %v933_v49 = vpop.f32.mrb[3].mxu0 }
 0x32b   :  { %v1004_v17 = vadd.f32 %v933_v49, %v843_v45 }
 0x32c   :  { %1021 = vst [vmem:[#allocation4 + $0x18] sm:$0xff] %v1005_v13 }
 0x32d   :  { %1020 = vst [vmem:[#allocation4 + $0x10] sm:$0xff] %v1004_v17  ;;  %v1364_v15 = vpop.f32.mrb[2].mxu1 }
 0x32e   :  { %v1013_v7 = vadd.f32 %v1364_v15, %v852_v60  ;;  %v973_v56 = vpop.f32.mrb[3].mxu1 }
 0x32f   :  { %v1012_v29 = vadd.f32 %v973_v56, %v851_v1 }
 0x330   :  { %1029 = vst [vmem:[#allocation4 + $0x58] sm:$0xff] %v1013_v7 }
 0x331   :  { %1028 = vst [vmem:[#allocation4 + $0x50] sm:$0xff] %v1012_v29 }
 0x339   :  { %v1355_v47 = vpop.f32.mrb[4].mxu0 }
 0x33a   :  { %v1007_v61 = vadd.f32 %v1355_v47, %v846_v11  ;;  %v943_v8 = vpop.f32.mrb[5].mxu0 }
 0x33b   :  { %v1006_v6 = vadd.f32 %v943_v8, %v845_v48 }
 0x33c   :  { %1023 = vst [vmem:[#allocation4 + $0x28] sm:$0xff] %v1007_v61 }
 0x33d   :  { %1022 = vst [vmem:[#allocation4 + $0x20] sm:$0xff] %v1006_v6  ;;  %v1367_v63 = vpop.f32.mrb[4].mxu1 }
 0x33e   :  { %v1015_v39 = vadd.f32 %v1367_v63, %v854_v42  ;;  %v983_v54 = vpop.f32.mrb[5].mxu1 }
 0x33f   :  { %v1014_v26 = vadd.f32 %v983_v54, %v853_v21 }
 0x340   :  { %1031 = vst [vmem:[#allocation4 + $0x68] sm:$0xff] %v1015_v39 }
 0x341   :  { %1030 = vst [vmem:[#allocation4 + $0x60] sm:$0xff] %v1014_v26 }
 0x34a   :  { %v1358_v0 = vpop.f32.mrb[6].mxu0 }
 0x34b   :  { %v1009_v43 = vadd.f32 %v1358_v0, %v848_v57  ;;  %v953_v62 = vpop.f32.mrb[7].mxu0 }
 0x34c   :  { %v1008_v52 = vadd.f32 %v953_v62, %v847_v28 }
 0x34d   :  { %1025 = vst [vmem:[#allocation4 + $0x38] sm:$0xff] %v1009_v43 }
 0x34e   :  { %1024 = vst [vmem:[#allocation4 + $0x30] sm:$0xff] %v1008_v52  ;;  %v1370_v34 = vpop.f32.mrb[6].mxu1 }
 0x34f   :  { %v1017_v10 = vadd.f32 %v1370_v34, %v856_v59  ;;  %v993_v32 = vpop.f32.mrb[7].mxu1 }
 0x350   :  { %v1016_v24 = vadd.f32 %v993_v32, %v855_v36 }
 0x351   :  { %1033 = vst [vmem:[#allocation4 + $0x78] sm:$0xff] %v1017_v10 }
 0x352   :  { %1032 = vst [vmem:[#allocation4 + $0x70] sm:$0xff] %v1016_v24 }
 0x353 PF:  { %v1071_v12 = vld [vmem:[#allocation3 + $0x10] sm:$0xff]  ;;  %v1069_v25 = vld [vmem:[#allocation3] sm:$0xff]  ;;  %v1072_v27 = vld [vmem:[#allocation3 + $0x18] sm:$0xff]  ;;  %v1526_v50 = vmov 0  }
 0x354   :  { %1490 = vset.pattern.permute.xlu1 %v1526_v50  ;;  %1489 = vset.pattern.permute.xlu0 %v1526_v50  ;;  %1491 = vrcp.f32 %v1071_v12  ;;  %v1070_v23 = vld [vmem:[#allocation3 + $0x8] sm:$0xff]  ;;  %v1073_v22 = vld [vmem:[#allocation3 + $0x20] sm:$0xff]  ;;  %v1076_v53 = vld [vmem:[#allocation3 + $0x38] sm:$0xff] }
 0x355   :  { %1493 = vrcp.f32 %v1069_v25  ;;  %v1074_v46 = vld [vmem:[#allocation3 + $0x28] sm:$0xff]  ;;  %v1075_v14 = vld [vmem:[#allocation3 + $0x30] sm:$0xff]  ;;  %v1077_v44 = vld [vmem:[#allocation3 + $0x40] sm:$0xff] }
 0x356   :  { %1495 = vrcp.f32 %v1072_v27  ;;  %v1078_v2 = vld [vmem:[#allocation3 + $0x48] sm:$0xff]  ;;  %v1080_v55 = vld [vmem:[#allocation3 + $0x58] sm:$0xff]  ;;  %v1079_v45 = vld [vmem:[#allocation3 + $0x50] sm:$0xff] }
 0x357   :  { %1497 = vrcp.f32 %v1070_v23  ;;  %v1082_v58 = vld [vmem:[#allocation3 + $0x68] sm:$0xff]  ;;  %v1081_v13 = vld [vmem:[#allocation3 + $0x60] sm:$0xff]  ;;  %v1084_v17 = vld [vmem:[#allocation3 + $0x78] sm:$0xff] }
 0x358   :  { %1499 = vrcp.f32 %v1074_v46  ;;  %v1083_v1 = vld [vmem:[#allocation3 + $0x70] sm:$0xff]  ;;  %v1053_v3 = vld [vmem:[#allocation4] sm:$0xff]  ;;  %v1056_v42 = vld [vmem:[#allocation4 + $0x18] sm:$0xff] }
 0x359   :  { %1501 = vrcp.f32 %v1073_v22  ;;  %v1055_v48 = vld [vmem:[#allocation4 + $0x10] sm:$0xff]  ;;  %v2183_v47 = vld [vmem:[%s2255_s6] ss:$0 sm:$0xff]  ;;  %v1054_v63 = vld [vmem:[#allocation4 + $0x8] sm:$0xff] }
 0x35a   :  { %1503 = vrcp.f32 %v1076_v53  ;;  %v1058_v57 = vld [vmem:[#allocation4 + $0x28] sm:$0xff]  ;;  %v1057_v16 = vld [vmem:[#allocation4 + $0x20] sm:$0xff]  ;;  %v1060_v62 = vld [vmem:[#allocation4 + $0x38] sm:$0xff] }
 0x35b   :  { %1505 = vrcp.f32 %v1075_v14  ;;  %v1059_v59 = vld [vmem:[#allocation4 + $0x30] sm:$0xff]  ;;  %v1062_v12 = vld [vmem:[#allocation4 + $0x48] sm:$0xff]  ;;  %v1061_v27 = vld [vmem:[#allocation4 + $0x40] sm:$0xff] }
 0x35c   :  { %1507 = vrcp.f32 %v1078_v2  ;;  %v1064_v14 = vld [vmem:[#allocation4 + $0x58] sm:$0xff] }
 0x35d   :  { %1509 = vrcp.f32 %v1077_v44 }
 0x35e   :  { %v1492_v4 = vpop.eup %1491  ;;  %1511 = vrcp.f32 %v1080_v55 }
 0x35f   :  { %v1494_v41 = vpop.eup %1493  ;;  %1113 = vperm.xlu1 %1490, %v1492_v4   ;;  %1513 = vrcp.f32 %v1079_v45 }
 0x360   :  { %v1496_v33 = vpop.eup %1495  ;;  %1103 = vperm.xlu0 %1489, %v1494_v41   ;;  %1515 = vrcp.f32 %v1082_v58  ;;  %v1063_v41 = vld [vmem:[#allocation4 + $0x50] sm:$0xff] }
 0x361   :  { %v1498_v51 = vpop.eup %1497  ;;  %1517 = vrcp.f32 %v1081_v13 }
 0x362   :  { %v1500_v30 = vpop.eup %1499  ;;  %1519 = vrcp.f32 %v1084_v17 }
 0x363   :  { %1118 = vperm.xlu1 %1490, %v1496_v33   ;;  %v1502_v31 = vpop.eup %1501  ;;  %1521 = vrcp.f32 %v1083_v1 }
 0x364   :  { %1108 = vperm.xlu0 %1489, %v1498_v51   ;;  %v1504_v20 = vpop.eup %1503 }
 0x365   :  { %v1506_v49 = vpop.eup %1505 }
 0x366   :  { %v1508_v60 = vpop.eup %1507 }
 0x367   :  { %1128 = vperm.xlu1 %1490, %v1500_v30   ;;  %v1510_v15 = vpop.eup %1509  ;;  %v1066_v30 = vld [vmem:[#allocation4 + $0x68] sm:$0xff] }
 0x368   :  { %1123 = vperm.xlu0 %1489, %v1502_v31   ;;  %v1512_v7 = vpop.eup %1511  ;;  %v1065_v31 = vld [vmem:[#allocation4 + $0x60] sm:$0xff] }
 0x369   :  { %v1514_v56 = vpop.eup %1513 }
 0x36a   :  { %v1516_v29 = vpop.eup %1515 }
 0x36b   :  { %1138 = vperm.xlu1 %1490, %v1504_v20   ;;  %v1518_v9 = vpop.eup %1517 }
 0x36c   :  { %1133 = vperm.xlu0 %1489, %v1506_v49   ;;  %v1520_v19 = vpop.eup %1519 }
 0x36d   :  { %v1522_v11 = vpop.eup %1521 }
 0x36f   :  { %1148 = vperm.xlu1 %1490, %v1508_v60   ;;  %v1068_v60 = vld [vmem:[#allocation4 + $0x78] sm:$0xff] }
 0x370   :  { %1143 = vperm.xlu0 %1489, %v1510_v15   ;;  %v1067_v15 = vld [vmem:[#allocation4 + $0x70] sm:$0xff] }
 0x373   :  { %1158 = vperm.xlu1 %1490, %v1512_v7  }
 0x374   :  { %1153 = vperm.xlu0 %1489, %v1514_v56  }
 0x377   :  { %1168 = vperm.xlu1 %1490, %v1516_v29  }
 0x378   :  { %1163 = vperm.xlu0 %1489, %v1518_v9  }
 0x37b   :  { %1178 = vperm.xlu1 %1490, %v1520_v19  }
 0x37c   :  { %1173 = vperm.xlu0 %1489, %v1522_v11  }
 0x3de   :  { %v1114_v18 = vpop.permute.xlu1 %1113 }
 0x3df   :  { %v1183_v61 = vmul.f32 %v1114_v18, %v1055_v48  ;;  %v1104_v8 = vpop.permute.xlu0 %1103 }
 0x3e0   :  { %v1181_v6 = vmul.f32 %v1104_v8, %v1053_v3 }
 0x3e1   :  { %v1206_v21 = vadd.f32 %v2183_v47, %v1183_v61 }
 0x3e2   :  { %v1204_v39 = vadd.f32 %v2183_v47, %v1181_v6  ;;  %v1119_v54 = vpop.permute.xlu1 %1118 }
 0x3e3   :  { %1222 = vst [vmem:[%s2256_s7 + $0x10] sm:$0xff] %v1206_v21  ;;  %v1184_v26 = vmul.f32 %v1119_v54, %v1056_v42  ;;  %v1109_v40 = vpop.permute.xlu0 %1108 }
 0x3e4   :  { %1220 = vst [vmem:[%s2256_s7] sm:$0xff] %v1204_v39  ;;  %v1182_v37 = vmul.f32 %v1109_v40, %v1054_v63 }
 0x3e5   :  { %v1207_v28 = vadd.f32 %v2183_v47, %v1184_v26 }
 0x3e6   :  { %v1205_v35 = vadd.f32 %v2183_v47, %v1182_v37  ;;  %v1129_v0 = vpop.permute.xlu1 %1128 }
 0x3e7   :  { %1223 = vst [vmem:[%s2256_s7 + $0x18] sm:$0xff] %v1207_v28  ;;  %v1186_v5 = vmul.f32 %v1129_v0, %v1058_v57  ;;  %v1124_v38 = vpop.permute.xlu0 %1123 }
 0x3e8   :  { %1221 = vst [vmem:[%s2256_s7 + $0x8] sm:$0xff] %v1205_v35  ;;  %v1185_v43 = vmul.f32 %v1124_v38, %v1057_v16 }
 0x3e9   :  { %v1209_v52 = vadd.f32 %v2183_v47, %v1186_v5 }
 0x3ea   :  { %v1208_v36 = vadd.f32 %v2183_v47, %v1185_v43  ;;  %v1139_v34 = vpop.permute.xlu1 %1138 }
 0x3eb   :  { %1225 = vst [vmem:[%s2256_s7 + $0x28] sm:$0xff] %v1209_v52  ;;  %v1188_v10 = vmul.f32 %v1139_v34, %v1060_v62  ;;  %v1134_v32 = vpop.permute.xlu0 %1133 }
 0x3ec   :  { %1224 = vst [vmem:[%s2256_s7 + $0x20] sm:$0xff] %v1208_v36  ;;  %v1187_v24 = vmul.f32 %v1134_v32, %v1059_v59 }
 0x3ed   :  { %v1211_v25 = vadd.f32 %v2183_v47, %v1188_v10 }
 0x3ee   :  { %v1210_v50 = vadd.f32 %v2183_v47, %v1187_v24  ;;  %v1149_v23 = vpop.permute.xlu1 %1148 }
 0x3ef   :  { %1227 = vst [vmem:[%s2256_s7 + $0x38] sm:$0xff] %v1211_v25  ;;  %v1190_v46 = vmul.f32 %v1149_v23, %v1062_v12  ;;  %v1144_v22 = vpop.permute.xlu0 %1143 }
 0x3f0   :  { %1226 = vst [vmem:[%s2256_s7 + $0x30] sm:$0xff] %v1210_v50  ;;  %v1189_v53 = vmul.f32 %v1144_v22, %v1061_v27 }
 0x3f1   :  { %v1213_v4 = vadd.f32 %v2183_v47, %v1190_v46 }
 0x3f2   :  { %v1212_v2 = vadd.f32 %v2183_v47, %v1189_v53  ;;  %v1159_v33 = vpop.permute.xlu1 %1158 }
 0x3f3   :  { %1229 = vst [vmem:[%s2256_s7 + $0x48] sm:$0xff] %v1213_v4  ;;  %v1192_v44 = vmul.f32 %v1159_v33, %v1064_v14  ;;  %v1154_v51 = vpop.permute.xlu0 %1153 }
 0x3f4   :  { %1228 = vst [vmem:[%s2256_s7 + $0x40] sm:$0xff] %v1212_v2  ;;  %v1191_v55 = vmul.f32 %v1154_v51, %v1063_v41 }
 0x3f5   :  { %v1215_v45 = vadd.f32 %v2183_v47, %v1192_v44 }
 0x3f6   :  { %v1214_v58 = vadd.f32 %v2183_v47, %v1191_v55  ;;  %v1169_v20 = vpop.permute.xlu1 %1168 }
 0x3f7   :  { %1231 = vst [vmem:[%s2256_s7 + $0x58] sm:$0xff] %v1215_v45  ;;  %v1194_v13 = vmul.f32 %v1169_v20, %v1066_v30  ;;  %v1164_v49 = vpop.permute.xlu0 %1163 }
 0x3f8   :  { %1230 = vst [vmem:[%s2256_s7 + $0x50] sm:$0xff] %v1214_v58  ;;  %v1193_v17 = vmul.f32 %v1164_v49, %v1065_v31 }
 0x3f9   :  { %v1217_v1 = vadd.f32 %v2183_v47, %v1194_v13 }
 0x3fa   :  { %v1216_v7 = vadd.f32 %v2183_v47, %v1193_v17  ;;  %v1179_v56 = vpop.permute.xlu1 %1178 }
 0x3fb   :  { %1233 = vst [vmem:[%s2256_s7 + $0x68] sm:$0xff] %v1217_v1  ;;  %v1196_v29 = vmul.f32 %v1179_v56, %v1068_v60  ;;  %v1174_v9 = vpop.permute.xlu0 %1173 }
 0x3fc   :  { %1232 = vst [vmem:[%s2256_s7 + $0x60] sm:$0xff] %v1216_v7  ;;  %v1195_v19 = vmul.f32 %v1174_v9, %v1067_v15 }
 0x3fd   :  { %v1219_v11 = vadd.f32 %v2183_v47, %v1196_v29 }
 0x3fe   :  { %v1218_v48 = vadd.f32 %v2183_v47, %v1195_v19 }
 0x3ff   :  { %1235 = vst [vmem:[%s2256_s7 + $0x78] sm:$0xff] %v1219_v11 }
 0x400   :  { %1234 = vst [vmem:[%s2256_s7 + $0x70] sm:$0xff] %v1218_v48 }

</bundles_post_ra>
